<compile_context>
chip_gen: v7x
topology: tpu7x:2x2x1
jax: 0.10.0
libtpu: 0.0.40
codegen_flags: <defaults>
</compile_context>

<pallas_src>
import jax
import jax.numpy as jnp
from jax.experimental import pallas as pl
from jax.experimental.pallas import tpu as pltpu

EPS = 0.0      # GINConv default eps (train_eps=False)
LANE = 128     # lane width: feature dims AND node dim padded to a multiple of this


def _round_up(n, m):
    return ((n + m - 1) // m) * m


def _pad2d(a, rows, cols):
    out = jnp.zeros((rows, cols), a.dtype)
    return out.at[: a.shape[0], : a.shape[1]].set(a)


def _gin_model_kernel(a_ref, x_ref,
                      w1a_ref, b1a_ref, w1b_ref, b1b_ref,
                      w2a_ref, b2a_ref, w2b_ref, b2b_ref,
                      w3a_ref, b3a_ref, w3b_ref, b3b_ref,
                      out_ref):
    """G graphs per grid step. `a_ref` already contains the (1+eps)*I self term."""
    G, Np, _ = a_ref.shape
    A = a_ref[...]            # (G, Np, Np), compute dtype
    cdt = A.dtype

    def gin_layer(h_flat, w_a, b_a, w_b, b_b):
        fin = h_flat.shape[-1]
        # Per-graph neighborhood sum (+ folded self term) as a batched MXU matmul.
        h = h_flat.astype(cdt).reshape(G, Np, fin)
        z = jnp.einsum('gij,gjf->gif', A, h, preferred_element_type=jnp.float32)
        # 2-layer MLP on the stacked (G*Np, F) slab: full MXU M-dim, shared weights.
        z = z.reshape(G * Np, fin).astype(cdt)
        z = jnp.dot(z, w_a[...], preferred_element_type=jnp.float32) + b_a[...]
        z = jnp.maximum(z, 0.0).astype(cdt)
        return jnp.dot(z, w_b[...], preferred_element_type=jnp.float32) + b_b[...]

    h = x_ref[...].reshape(G * Np, x_ref.shape[-1])
    h = jnp.maximum(gin_layer(h, w1a_ref, b1a_ref, w1b_ref, b1b_ref), 0.0)  # relu(conv1)
    h = jnp.maximum(gin_layer(h, w2a_ref, b2a_ref, w2b_ref, b2b_ref), 0.0)  # relu(conv2)
    out = gin_layer(h, w3a_ref, b3a_ref, w3b_ref, b3b_ref)                  # conv3
    out_ref[...] = out.reshape(G, Np, out_ref.shape[-1]).astype(out_ref.dtype)


def init_params(key, input_dim, hidden_dim, output_dim):
    """nn.Linear-style uniform(-1/sqrt(fan_in), 1/sqrt(fan_in)); weights stored [in, out]."""
    half = hidden_dim // 2
    layer_dims = [
        (input_dim, half), (half, hidden_dim),          # conv1 MLP
        (hidden_dim, hidden_dim), (hidden_dim, half),   # conv2 MLP
        (half, half), (half, output_dim),               # conv3 MLP
    ]
    params = []
    for (fan_in, fan_out) in layer_dims:
        key, kw, kb = jax.random.split(key, 3)
        bound = 1.0 / jnp.sqrt(fan_in)
        w = jax.random.uniform(kw, (fan_in, fan_out), jnp.float32, -bound, bound)
        b = jax.random.uniform(kb, (fan_out,), jnp.float32, -bound, bound)
        params.append((w, b))
    return [tuple(params[2 * i] + params[2 * i + 1]) for i in range(3)]  # (wA,bA,wB,bB) x3


def gin_graph_model_batched(x_b, edge_index_b, params, output_dim,
                            graphs_per_step=4, compute_dtype=jnp.float32):
    """x_b: [B, N, Fin] f32; edge_index_b: [B, 2, E] int32 (row 0 = src, row 1 = dst)."""
    B, N, Fin = x_b.shape
    Np = _round_up(N, LANE)          # lane-dense adjacency (A's last dim)
    Fin_p = _round_up(Fin, LANE)
    out_p = _round_up(output_dim, LANE)

    G = max(1, min(graphs_per_step, B))   # graphs packed per grid step
    Bp = _round_up(B, G)

    # Dense adjacency per graph with the (1+eps)*I self term folded in.
    def one_adj(ei):
        A = jnp.zeros((Np, Np), jnp.float32).at[ei[1], ei[0]].add(1.0)
        return A + (1.0 + EPS) * jnp.eye(Np, dtype=jnp.float32)

    A_b = jax.vmap(one_adj)(edge_index_b).astype(compute_dtype)
    A_b = jnp.zeros((Bp, Np, Np), compute_dtype).at[:B].set(A_b)   # pad batch to multiple of G

    # Zero-pad node features to lane-dense [Bp, Np, Fin_p].
    x_pad = jnp.zeros((Bp, Np, Fin_p), compute_dtype).at[:B, :N, :Fin].set(
        x_b.astype(compute_dtype))

    # Zero-pad every weight/bias to lane-dense shapes. Padded rows/cols/bias lanes
    # are exactly 0, so padded lanes stay 0 through ReLU and all three layers.
    # Weights carry the compute dtype; biases stay f32 (added on the f32 accumulator).
    flat = []
    for (wA, bA, wB, bB) in params:
        ia, oa = wA.shape
        ib, ob = wB.shape
        flat += [
            _pad2d(wA, _round_up(ia, LANE), _round_up(oa, LANE)).astype(compute_dtype),
            _pad2d(bA.reshape(1, -1), 1, _round_up(oa, LANE)),
            _pad2d(wB, _round_up(ib, LANE), _round_up(ob, LANE)).astype(compute_dtype),
            _pad2d(bB.reshape(1, -1), 1, _round_up(ob, LANE)),
        ]

    # Per-step blocks of G graphs for A / x / out; weights resident across grid steps.
    def per_step(shape):
        return pl.BlockSpec((G,) + shape, lambda b: (b, 0, 0))

    def resident(arr):
        nd = arr.ndim
        return pl.BlockSpec(arr.shape, lambda b, _nd=nd: (0,) * _nd)

    in_specs = ([per_step((Np, Np)), per_step((Np, Fin_p))]
                + [resident(a) for a in flat])
    out_spec = per_step((Np, out_p))

    # Explicit scoped-VMEM budget: double-buffered IO blocks + (double-buffered)
    # resident weights + headroom for compiler-internal scratch.
    cd_bytes = jnp.dtype(compute_dtype).itemsize
    io_bytes = (G * Np * (Np + Fin_p)) * cd_bytes + G * Np * out_p * 4
    w_bytes = sum(int(a.size) * a.dtype.itemsize for a in flat)
    vmem_limit = min(int(2 * (io_bytes + w_bytes) + (8 << 20)), 100 << 20)

    out = pl.pallas_call(
        _gin_model_kernel,
        grid=(Bp // G,),
        out_shape=jax.ShapeDtypeStruct((Bp, Np, out_p), jnp.float32),
        in_specs=in_specs,
        out_specs=out_spec,
        compiler_params=pltpu.CompilerParams(
            dimension_semantics=("parallel",),  # shard packed-graph steps across TCs (v7x)
            vmem_limit_bytes=vmem_limit,
        ),
    )(A_b, x_pad, *flat)

    # Slice away batch / node / lane padding.
    return out[:B, :N, :output_dim]


def gin_graph_model(x, edge_index, params, output_dim, compute_dtype=jnp.float32):
    """Single-graph entry matching the PyTorch module's forward(x, edge_index)."""
    return gin_graph_model_batched(x[None], edge_index[None], params, output_dim,
                                   graphs_per_step=1, compute_dtype=compute_dtype)[0]


def _reference(x, edge_index, params):
    """Pure-JAX f32 reference (mirrors the PyTorch forward)."""
    N = x.shape[0]
    A = jnp.zeros((N, N), jnp.float32).at[edge_index[1], edge_index[0]].add(1.0)

    def layer(h, wA, bA, wB, bB):
        z = (1.0 + EPS) * h + A @ h
        z = jnp.maximum(z @ wA + bA, 0.0)
        return z @ wB + bB

    h = jnp.maximum(layer(x, *params[0]), 0.0)
    h = jnp.maximum(layer(h, *params[1]), 0.0)
    return layer(h, *params[2])


if __name__ == "__main__":
    key = jax.random.PRNGKey(0)
    B, N, E = 8, 16, 40
    input_dim, hidden_dim, output_dim = 8, 32, 8

    k_x, k_e, k_p = jax.random.split(key, 3)
    x_b = jax.random.normal(k_x, (B, N, input_dim), jnp.float32)
    edge_index_b = jax.random.randint(k_e, (B, 2, E), 0, N, jnp.int32)
    params = init_params(k_p, input_dim, hidden_dim, output_dim)

    refs = [_reference(x_b[b], edge_index_b[b], params) for b in range(B)]

    # f32 compute path: exact parity with the reference.
    out = gin_graph_model_batched(x_b, edge_index_b, params, output_dim, graphs_per_step=4)
    out = jax.block_until_ready(out)
    assert out.shape == (B, N, output_dim)
    for b in range(B):
        err = jnp.max(jnp.abs(out[b] - refs[b]))
        assert jnp.allclose(out[b], refs[b], atol=1e-4, rtol=1e-4), f"graph {b}: max err {err}"

    # bf16 compute path (v6e/v7x throughput option): loose tolerance vs the f32 reference.
    out_bf16 = gin_graph_model_batched(x_b, edge_index_b, params, output_dim,
                                       graphs_per_step=4, compute_dtype=jnp.bfloat16)
    out_bf16 = jax.block_until_ready(out_bf16)
    for b in range(B):
        err = float(jnp.max(jnp.abs(out_bf16[b] - refs[b])))
        tol = 0.1 * max(1.0, float(jnp.max(jnp.abs(refs[b]))))
        assert err <= tol, f"bf16 graph {b}: max err {err} > {tol}"

    # Single-graph entry point (same signature as the torch module's forward).
    single = gin_graph_model(x_b[0], edge_index_b[0], params, output_dim)
    single = jax.block_until_ready(single)
    assert jnp.allclose(single, refs[0], atol=1e-4, rtol=1e-4)

    print("KERNEL_OK")
</pallas_src>

<mosaic_0001>
module attributes {stable_mosaic.version = 11 : i64} {
  func.func @_gin_model_kernel(%arg0: i32, %arg1: memref<4x128x128xf32, #tpu.memory_space<vmem>>, %arg2: memref<4x128x128xf32, #tpu.memory_space<vmem>>, %arg3: memref<128x128xf32, #tpu.memory_space<vmem>>, %arg4: memref<1x128xf32, #tpu.memory_space<vmem>>, %arg5: memref<128x128xf32, #tpu.memory_space<vmem>>, %arg6: memref<1x128xf32, #tpu.memory_space<vmem>>, %arg7: memref<128x128xf32, #tpu.memory_space<vmem>>, %arg8: memref<1x128xf32, #tpu.memory_space<vmem>>, %arg9: memref<128x128xf32, #tpu.memory_space<vmem>>, %arg10: memref<1x128xf32, #tpu.memory_space<vmem>>, %arg11: memref<128x128xf32, #tpu.memory_space<vmem>>, %arg12: memref<1x128xf32, #tpu.memory_space<vmem>>, %arg13: memref<128x128xf32, #tpu.memory_space<vmem>>, %arg14: memref<1x128xf32, #tpu.memory_space<vmem>>, %arg15: memref<4x128x128xf32, #tpu.memory_space<vmem>>) attributes {dimension_semantics = [#tpu.dimension_semantics<parallel>], iteration_bounds = array<i64: 2>, scalar_prefetch = 0 : i64, scratch_operands = 0 : i64, tpu.core_type = #tpu.core_type<tc>, window_params = [{transform_indices = @transform_0, window_bounds = array<i64: 4, 128, 128>}, {transform_indices = @transform_1, window_bounds = array<i64: 4, 128, 128>}, {pipeline_mode = #tpu.pipeline_mode<synchronous>, transform_indices = @transform_2, window_bounds = array<i64: 128, 128>}, {pipeline_mode = #tpu.pipeline_mode<synchronous>, transform_indices = @transform_3, window_bounds = array<i64: 1, 128>}, {pipeline_mode = #tpu.pipeline_mode<synchronous>, transform_indices = @transform_4, window_bounds = array<i64: 128, 128>}, {pipeline_mode = #tpu.pipeline_mode<synchronous>, transform_indices = @transform_5, window_bounds = array<i64: 1, 128>}, {pipeline_mode = #tpu.pipeline_mode<synchronous>, transform_indices = @transform_6, window_bounds = array<i64: 128, 128>}, {pipeline_mode = #tpu.pipeline_mode<synchronous>, transform_indices = @transform_7, window_bounds = array<i64: 1, 128>}, {pipeline_mode = #tpu.pipeline_mode<synchronous>, transform_indices = @transform_8, window_bounds = array<i64: 128, 128>}, {pipeline_mode = #tpu.pipeline_mode<synchronous>, transform_indices = @transform_9, window_bounds = array<i64: 1, 128>}, {pipeline_mode = #tpu.pipeline_mode<synchronous>, transform_indices = @transform_10, window_bounds = array<i64: 128, 128>}, {pipeline_mode = #tpu.pipeline_mode<synchronous>, transform_indices = @transform_11, window_bounds = array<i64: 1, 128>}, {pipeline_mode = #tpu.pipeline_mode<synchronous>, transform_indices = @transform_12, window_bounds = array<i64: 128, 128>}, {pipeline_mode = #tpu.pipeline_mode<synchronous>, transform_indices = @transform_13, window_bounds = array<i64: 1, 128>}, {transform_indices = @transform_14, window_bounds = array<i64: 4, 128, 128>}]} {
    %c0 = arith.constant 0 : index
    %c0_0 = arith.constant 0 : index
    %c0_1 = arith.constant 0 : index
    %0 = vector.load %arg1[%c0, %c0_0, %c0_1] : memref<4x128x128xf32, #tpu.memory_space<vmem>>, vector<4x128x128xf32>
    %c0_2 = arith.constant 0 : index
    %c0_3 = arith.constant 0 : index
    %c0_4 = arith.constant 0 : index
    %1 = vector.load %arg2[%c0_2, %c0_3, %c0_4] : memref<4x128x128xf32, #tpu.memory_space<vmem>>, vector<4x128x128xf32>
    %2 = vector.shape_cast %1 : vector<4x128x128xf32> to vector<512x128xf32>
    %3 = vector.shape_cast %2 : vector<512x128xf32> to vector<4x128x128xf32>
    "tpu.trace_start"() <{level = 10 : i32, message = "gij,gjf->gif"}> : () -> ()
    %cst = arith.constant dense<0.000000e+00> : vector<4x128x128xf32>
    %4 = tpu.matmul %0, %3, %cst {dimension_numbers = #tpu.dot_dimension_numbers<[2], [1], [1], [2], [0, 0, 0, 1, 1, 2], [0], [0]>} : vector<4x128x128xf32>, vector<4x128x128xf32>, vector<4x128x128xf32> -> vector<4x128x128xf32>
    "tpu.trace_stop"() : () -> ()
    %5 = vector.shape_cast %4 : vector<4x128x128xf32> to vector<512x128xf32>
    %c0_5 = arith.constant 0 : index
    %c0_6 = arith.constant 0 : index
    %6 = vector.load %arg3[%c0_5, %c0_6] : memref<128x128xf32, #tpu.memory_space<vmem>>, vector<128x128xf32>
    %cst_7 = arith.constant dense<0.000000e+00> : vector<512x128xf32>
    %7 = tpu.matmul %5, %6, %cst_7 {dimension_numbers = #tpu.dot_dimension_numbers<[1], [0], [0], [1], [0, 0, 1, 1], [], []>} : vector<512x128xf32>, vector<128x128xf32>, vector<512x128xf32> -> vector<512x128xf32>
    %c0_8 = arith.constant 0 : index
    %c0_9 = arith.constant 0 : index
    %8 = vector.load %arg4[%c0_8, %c0_9] : memref<1x128xf32, #tpu.memory_space<vmem>>, vector<1x128xf32>
    %9 = vector.broadcast %8 : vector<1x128xf32> to vector<512x128xf32>
    %10 = arith.addf %7, %9 : vector<512x128xf32>
    %cst_10 = arith.constant 0.000000e+00 : f32
    %11 = vector.broadcast %cst_10 : f32 to vector<512x128xf32>
    %12 = arith.maximumf %10, %11 : vector<512x128xf32>
    %c0_11 = arith.constant 0 : index
    %c0_12 = arith.constant 0 : index
    %13 = vector.load %arg5[%c0_11, %c0_12] : memref<128x128xf32, #tpu.memory_space<vmem>>, vector<128x128xf32>
    %cst_13 = arith.constant dense<0.000000e+00> : vector<512x128xf32>
    %14 = tpu.matmul %12, %13, %cst_13 {dimension_numbers = #tpu.dot_dimension_numbers<[1], [0], [0], [1], [0, 0, 1, 1], [], []>} : vector<512x128xf32>, vector<128x128xf32>, vector<512x128xf32> -> vector<512x128xf32>
    %c0_14 = arith.constant 0 : index
    %c0_15 = arith.constant 0 : index
    %15 = vector.load %arg6[%c0_14, %c0_15] : memref<1x128xf32, #tpu.memory_space<vmem>>, vector<1x128xf32>
    %16 = vector.broadcast %15 : vector<1x128xf32> to vector<512x128xf32>
    %17 = arith.addf %14, %16 : vector<512x128xf32>
    %cst_16 = arith.constant 0.000000e+00 : f32
    %18 = vector.broadcast %cst_16 : f32 to vector<512x128xf32>
    %19 = arith.maximumf %17, %18 : vector<512x128xf32>
    %20 = vector.shape_cast %19 : vector<512x128xf32> to vector<4x128x128xf32>
    "tpu.trace_start"() <{level = 10 : i32, message = "gij,gjf->gif"}> : () -> ()
    %cst_17 = arith.constant dense<0.000000e+00> : vector<4x128x128xf32>
    %21 = tpu.matmul %0, %20, %cst_17 {dimension_numbers = #tpu.dot_dimension_numbers<[2], [1], [1], [2], [0, 0, 0, 1, 1, 2], [0], [0]>} : vector<4x128x128xf32>, vector<4x128x128xf32>, vector<4x128x128xf32> -> vector<4x128x128xf32>
    "tpu.trace_stop"() : () -> ()
    %22 = vector.shape_cast %21 : vector<4x128x128xf32> to vector<512x128xf32>
    %c0_18 = arith.constant 0 : index
    %c0_19 = arith.constant 0 : index
    %23 = vector.load %arg7[%c0_18, %c0_19] : memref<128x128xf32, #tpu.memory_space<vmem>>, vector<128x128xf32>
    %cst_20 = arith.constant dense<0.000000e+00> : vector<512x128xf32>
    %24 = tpu.matmul %22, %23, %cst_20 {dimension_numbers = #tpu.dot_dimension_numbers<[1], [0], [0], [1], [0, 0, 1, 1], [], []>} : vector<512x128xf32>, vector<128x128xf32>, vector<512x128xf32> -> vector<512x128xf32>
    %c0_21 = arith.constant 0 : index
    %c0_22 = arith.constant 0 : index
    %25 = vector.load %arg8[%c0_21, %c0_22] : memref<1x128xf32, #tpu.memory_space<vmem>>, vector<1x128xf32>
    %26 = vector.broadcast %25 : vector<1x128xf32> to vector<512x128xf32>
    %27 = arith.addf %24, %26 : vector<512x128xf32>
    %cst_23 = arith.constant 0.000000e+00 : f32
    %28 = vector.broadcast %cst_23 : f32 to vector<512x128xf32>
    %29 = arith.maximumf %27, %28 : vector<512x128xf32>
    %c0_24 = arith.constant 0 : index
    %c0_25 = arith.constant 0 : index
    %30 = vector.load %arg9[%c0_24, %c0_25] : memref<128x128xf32, #tpu.memory_space<vmem>>, vector<128x128xf32>
    %cst_26 = arith.constant dense<0.000000e+00> : vector<512x128xf32>
    %31 = tpu.matmul %29, %30, %cst_26 {dimension_numbers = #tpu.dot_dimension_numbers<[1], [0], [0], [1], [0, 0, 1, 1], [], []>} : vector<512x128xf32>, vector<128x128xf32>, vector<512x128xf32> -> vector<512x128xf32>
    %c0_27 = arith.constant 0 : index
    %c0_28 = arith.constant 0 : index
    %32 = vector.load %arg10[%c0_27, %c0_28] : memref<1x128xf32, #tpu.memory_space<vmem>>, vector<1x128xf32>
    %33 = vector.broadcast %32 : vector<1x128xf32> to vector<512x128xf32>
    %34 = arith.addf %31, %33 : vector<512x128xf32>
    %cst_29 = arith.constant 0.000000e+00 : f32
    %35 = vector.broadcast %cst_29 : f32 to vector<512x128xf32>
    %36 = arith.maximumf %34, %35 : vector<512x128xf32>
    %37 = vector.shape_cast %36 : vector<512x128xf32> to vector<4x128x128xf32>
    "tpu.trace_start"() <{level = 10 : i32, message = "gij,gjf->gif"}> : () -> ()
    %cst_30 = arith.constant dense<0.000000e+00> : vector<4x128x128xf32>
    %38 = tpu.matmul %0, %37, %cst_30 {dimension_numbers = #tpu.dot_dimension_numbers<[2], [1], [1], [2], [0, 0, 0, 1, 1, 2], [0], [0]>} : vector<4x128x128xf32>, vector<4x128x128xf32>, vector<4x128x128xf32> -> vector<4x128x128xf32>
    "tpu.trace_stop"() : () -> ()
    %39 = vector.shape_cast %38 : vector<4x128x128xf32> to vector<512x128xf32>
    %c0_31 = arith.constant 0 : index
    %c0_32 = arith.constant 0 : index
    %40 = vector.load %arg11[%c0_31, %c0_32] : memref<128x128xf32, #tpu.memory_space<vmem>>, vector<128x128xf32>
    %cst_33 = arith.constant dense<0.000000e+00> : vector<512x128xf32>
    %41 = tpu.matmul %39, %40, %cst_33 {dimension_numbers = #tpu.dot_dimension_numbers<[1], [0], [0], [1], [0, 0, 1, 1], [], []>} : vector<512x128xf32>, vector<128x128xf32>, vector<512x128xf32> -> vector<512x128xf32>
    %c0_34 = arith.constant 0 : index
    %c0_35 = arith.constant 0 : index
    %42 = vector.load %arg12[%c0_34, %c0_35] : memref<1x128xf32, #tpu.memory_space<vmem>>, vector<1x128xf32>
    %43 = vector.broadcast %42 : vector<1x128xf32> to vector<512x128xf32>
    %44 = arith.addf %41, %43 : vector<512x128xf32>
    %cst_36 = arith.constant 0.000000e+00 : f32
    %45 = vector.broadcast %cst_36 : f32 to vector<512x128xf32>
    %46 = arith.maximumf %44, %45 : vector<512x128xf32>
    %c0_37 = arith.constant 0 : index
    %c0_38 = arith.constant 0 : index
    %47 = vector.load %arg13[%c0_37, %c0_38] : memref<128x128xf32, #tpu.memory_space<vmem>>, vector<128x128xf32>
    %cst_39 = arith.constant dense<0.000000e+00> : vector<512x128xf32>
    %48 = tpu.matmul %46, %47, %cst_39 {dimension_numbers = #tpu.dot_dimension_numbers<[1], [0], [0], [1], [0, 0, 1, 1], [], []>} : vector<512x128xf32>, vector<128x128xf32>, vector<512x128xf32> -> vector<512x128xf32>
    %c0_40 = arith.constant 0 : index
    %c0_41 = arith.constant 0 : index
    %49 = vector.load %arg14[%c0_40, %c0_41] : memref<1x128xf32, #tpu.memory_space<vmem>>, vector<1x128xf32>
    %50 = vector.broadcast %49 : vector<1x128xf32> to vector<512x128xf32>
    %51 = arith.addf %48, %50 : vector<512x128xf32>
    %52 = vector.shape_cast %51 : vector<512x128xf32> to vector<4x128x128xf32>
    %c0_42 = arith.constant 0 : index
    %c0_43 = arith.constant 0 : index
    %c0_44 = arith.constant 0 : index
    %53 = vector.load %arg15[%c0_42, %c0_43, %c0_44] : memref<4x128x128xf32, #tpu.memory_space<vmem>>, vector<4x128x128xf32>
    tpu.vector_store %arg15[%c0_42, %c0_43, %c0_44], %52 {strides = array<i32>} : memref<4x128x128xf32, #tpu.memory_space<vmem>>, vector<4x128x128xf32>,
    return
  }
  func.func @transform_0(%arg0: i32) -> (i32, i32, i32) {
    %c0_i32 = arith.constant 0 : i32
    %c0_i32_0 = arith.constant 0 : i32
    %c0_i32_1 = arith.constant 0 : i32
    return %arg0, %c0_i32, %c0_i32_0 : i32, i32, i32
  }
  func.func @transform_1(%arg0: i32) -> (i32, i32, i32) {
    %c0_i32 = arith.constant 0 : i32
    %c0_i32_0 = arith.constant 0 : i32
    %c0_i32_1 = arith.constant 0 : i32
    return %arg0, %c0_i32, %c0_i32_0 : i32, i32, i32
  }
  func.func @transform_2(%arg0: i32) -> (i32, i32) {
    %c0_i32 = arith.constant 0 : i32
    %c0_i32_0 = arith.constant 0 : i32
    %c0_i32_1 = arith.constant 0 : i32
    return %c0_i32, %c0_i32_0 : i32, i32
  }
  func.func @transform_3(%arg0: i32) -> (i32, i32) {
    %c0_i32 = arith.constant 0 : i32
    %c0_i32_0 = arith.constant 0 : i32
    %c0_i32_1 = arith.constant 0 : i32
    return %c0_i32, %c0_i32_0 : i32, i32
  }
  func.func @transform_4(%arg0: i32) -> (i32, i32) {
    %c0_i32 = arith.constant 0 : i32
    %c0_i32_0 = arith.constant 0 : i32
    %c0_i32_1 = arith.constant 0 : i32
    return %c0_i32, %c0_i32_0 : i32, i32
  }
  func.func @transform_5(%arg0: i32) -> (i32, i32) {
    %c0_i32 = arith.constant 0 : i32
    %c0_i32_0 = arith.constant 0 : i32
    %c0_i32_1 = arith.constant 0 : i32
    return %c0_i32, %c0_i32_0 : i32, i32
  }
  func.func @transform_6(%arg0: i32) -> (i32, i32) {
    %c0_i32 = arith.constant 0 : i32
    %c0_i32_0 = arith.constant 0 : i32
    %c0_i32_1 = arith.constant 0 : i32
    return %c0_i32, %c0_i32_0 : i32, i32
  }
  func.func @transform_7(%arg0: i32) -> (i32, i32) {
    %c0_i32 = arith.constant 0 : i32
    %c0_i32_0 = arith.constant 0 : i32
    %c0_i32_1 = arith.constant 0 : i32
    return %c0_i32, %c0_i32_0 : i32, i32
  }
  func.func @transform_8(%arg0: i32) -> (i32, i32) {
    %c0_i32 = arith.constant 0 : i32
    %c0_i32_0 = arith.constant 0 : i32
    %c0_i32_1 = arith.constant 0 : i32
    return %c0_i32, %c0_i32_0 : i32, i32
  }
  func.func @transform_9(%arg0: i32) -> (i32, i32) {
    %c0_i32 = arith.constant 0 : i32
    %c0_i32_0 = arith.constant 0 : i32
    %c0_i32_1 = arith.constant 0 : i32
    return %c0_i32, %c0_i32_0 : i32, i32
  }
  func.func @transform_10(%arg0: i32) -> (i32, i32) {
    %c0_i32 = arith.constant 0 : i32
    %c0_i32_0 = arith.constant 0 : i32
    %c0_i32_1 = arith.constant 0 : i32
    return %c0_i32, %c0_i32_0 : i32, i32
  }
  func.func @transform_11(%arg0: i32) -> (i32, i32) {
    %c0_i32 = arith.constant 0 : i32
    %c0_i32_0 = arith.constant 0 : i32
    %c0_i32_1 = arith.constant 0 : i32
    return %c0_i32, %c0_i32_0 : i32, i32
  }
  func.func @transform_12(%arg0: i32) -> (i32, i32) {
    %c0_i32 = arith.constant 0 : i32
    %c0_i32_0 = arith.constant 0 : i32
    %c0_i32_1 = arith.constant 0 : i32
    return %c0_i32, %c0_i32_0 : i32, i32
  }
  func.func @transform_13(%arg0: i32) -> (i32, i32) {
    %c0_i32 = arith.constant 0 : i32
    %c0_i32_0 = arith.constant 0 : i32
    %c0_i32_1 = arith.constant 0 : i32
    return %c0_i32, %c0_i32_0 : i32, i32
  }
  func.func @transform_14(%arg0: i32) -> (i32, i32, i32) {
    %c0_i32 = arith.constant 0 : i32
    %c0_i32_0 = arith.constant 0 : i32
    %c0_i32_1 = arith.constant 0 : i32
    return %arg0, %c0_i32, %c0_i32_0 : i32, i32, i32
  }
}

</mosaic_0001>

<bundles_post_ra>
// kernel: tpu_custom_call.1
= control target key start
LH: loop header
LB: loop body
LE: loop exit
PB: predicated region body
PF: predicated region fallthrough
CT: control target
= control target key end

     0   :  { %s10202_s0 = inlined_call_operand.hbm [shape: f32[8,128,128], index: 0, kind: input, shape index: {}]   ;;  %s10203_s1 = inlined_call_operand.hbm [shape: f32[8,128,128], index: 1, kind: input, shape index: {}]   ;;  %s10204_s2 = inlined_call_operand.hbm [shape: f32[128,128], index: 2, kind: input, shape index: {}]   ;;  %s10205_s3 = inlined_call_operand.vmem [shape: f32[1,128], index: 3, kind: input, shape index: {}]   ;;  %s10206_s4 = inlined_call_operand.hbm [shape: f32[128,128], index: 4, kind: input, shape index: {}]   ;;  %s10207_s5 = inlined_call_operand.vmem [shape: f32[1,128], index: 5, kind: input, shape index: {}]   ;;  %s10208_s6 = inlined_call_operand.hbm [shape: f32[128,128], index: 6, kind: input, shape index: {}]   ;;  %s10209_s7 = inlined_call_operand.vmem [shape: f32[1,128], index: 7, kind: input, shape index: {}]   ;;  %s10210_s8 = inlined_call_operand.hbm [shape: f32[128,128], index: 8, kind: input, shape index: {}]   ;;  %s10211_s9 = inlined_call_operand.vmem [shape: f32[1,128], index: 9, kind: input, shape index: {}]   ;;  %s10212_s10 = inlined_call_operand.hbm [shape: f32[128,128], index: 10, kind: input, shape index: {}]   ;;  %s10213_s11 = inlined_call_operand.vmem [shape: f32[1,128], index: 11, kind: input, shape index: {}]   ;;  %s10214_s12 = inlined_call_operand.hbm [shape: f32[128,128], index: 12, kind: input, shape index: {}]   ;;  %s10215_s13 = inlined_call_operand.vmem [shape: f32[1,128], index: 13, kind: input, shape index: {}]   ;;  %s10216_s14 = inlined_call_operand.hbm [shape: f32[8,128,128], index: 14, kind: output, shape index: {}]  }
   0x1   :  { %10225 = sst [smem:[#allocation24_spill]] %s10202_s0 }
   0x2   :  { %10226 = sst [smem:[#allocation25_spill]] %s10204_s2 }
   0x3   :  { %10227 = sst [smem:[#allocation26_spill]] %s10206_s4 }
   0x4   :  { %10228 = sst [smem:[#allocation27_spill]] %s10207_s5 }
   0x5   :  { %10229 = sst [smem:[#allocation28_spill]] %s10208_s6 }
   0x6   :  { %10230 = sst [smem:[#allocation29_spill]] %s10209_s7 }
   0x7   :  { %10231 = sst [smem:[#allocation30_spill]] %s10210_s8 }
   0x8   :  { %10232 = sst [smem:[#allocation31_spill]] %s10211_s9 }
   0x9   :  { %10233 = sst [smem:[#allocation32_spill]] %s10213_s11 }
   0xa   :  { %10234 = sst [smem:[#allocation33_spill]] %s10215_s13 }
   0xb   :  { %10235 = sst [smem:[#allocation34_spill]] %s10216_s14 }
   0xc   :  { %19 = vsyncpa [#allocation3], 0 }
   0xd   :  { %21 = vsyncpa [#allocation3 + $0x1], 0 }
   0xe   :  { %22 = vsyncpa [#allocation6], 0 }
   0xf   :  { %24 = vsyncpa [#allocation6 + $0x1], 0 }
  0x10   :  { %25 = vsyncpa [#allocation9], 0 }
  0x11   :  { %26 = vsyncpa [#allocation12], 0 }
  0x12   :  { %27 = vsyncpa [#allocation15], 0 }
  0x13   :  { %28 = vsyncpa [#allocation4], 0 }
  0x14   :  { %30 = vsyncpa [#allocation4 + $0x1], 0  ;;  %s9058_s29 = smov 0   ;;  %s9060_s30 = smov 0  }
  0x15   :  { %s9062_s15 = smov 0   ;;  %s9064_s16 = smov 0  }
  0x16 LB: > { %s8970_s17 = smov [#allocation7]   ;;  %s9079_s19 = sadd.s32 4294967295, %s8968_s16   ;;  %s8968_s16 = sphi %s9064_s16, %s10273_s16   ;;  %s8964_s15 = sphi %s9062_s15, %s10272_s15   ;;  %s8960_s30 = sphi %s9060_s30, %s10271_s30   ;;  %s8956_s29 = sphi %s9058_s29, %s10270_s29  }
  0x17   : > { %s383_s18 = sshll.u32 %s8970_s17, 4  ;;  %p5487_p0 = scmp.ge.s32.totalorder %s8968_s16, 1  ;;  %s9084_s18 = int_to_ptr.vmem [resolvable:$true] %s383_s18 }
  0x18   : > { %p10218_p1 = scmp.eq.s32.totalorder %s9079_s19, 0  ;;  %p371_p2 = scmp.lt.s32.totalorder %s8968_s16, 3 }
  0x19   : > { %s8971_s21 = smov [#allocation8]   ;;  %s8972_s24 = smov [#allocation11]  }
  0x1a   : > { %p9086_p3 = pnand %p5487_p0, %p371_p2  ;;  %s399_s22 = sshll.u32 %s8971_s21, 4  ;;  %s9099_s22 = int_to_ptr.vmem [resolvable:$true] %s399_s22 }
  0x1b   : > { %s431_s25 = sshll.u32 %s8972_s24, 4  ;;  %s10238_s2 = sld [smem:[#allocation25_spill]]  ;;  %s9101_s25 = int_to_ptr.vmem [resolvable:$true] %s431_s25 }
  0x1c   : > { %s10236_s20 = scalar_select %p9086_p3, 1, 0 }
  0x1d   : > { %p8441_p5 = pneg %p9086_p3 }
  0x1f   : > { %p9095_p6 = pnand %p8441_p5, %p10218_p1 }
  0x21   : > { %s8654_s28 = scalar_lea.hbm %s10238_s2, 2048  ;;  %p9111_p8 = pneg %p9095_p6 }
  0x22   : > { %p8655_p7 = scmp.ne.s32.totalorder %s10238_s2, %s8654_s28  ;;  %p8661_p11 = scmp.lt.u32.totalorder %s8654_s28, %s10238_s2 }
  0x24   : > { %p8657_p9 = pnand %p9111_p8, %p8655_p7 }
  0x26   : > { %p8658_p10 = pneg %p8657_p9 }
  0x28   : > { %p8663_p12 = pnand %p8661_p11, %p8658_p10 }
  0x2a   : > { %8666 = shalt.err (!%p8663_p12)
}
  0x2b   : > { %s8667_s14 = scalar_lea.vmem %s9084_s18, 2048  ;;  %p8675_p5 = scmp.lt.s32.totalorder %s9084_s18, %s9084_s18 }
  0x2c   : > { %p8668_p13 = scmp.ne.s32.totalorder %s9084_s18, %s8667_s14  ;;  %p8676_p4 = scmp.lt.s32.totalorder %s8667_s14, %s8667_s14 }
  0x2e   : > { %p8670_p0 = pnand %p8668_p13, %p9111_p8  ;;  %p8677_p7 = por %p8676_p4, %p8675_p5 }
  0x30   : > { %p8671_p2 = pneg %p8670_p0 }
  0x32   : > { %p8678_p9 = pnand %p8677_p7, %p8671_p2 }
  0x34   : > { %8681 = shalt.err (!%p8678_p9)
}
  0x35   : > { %s10220_s26 = smov 128   ;;  %s10222_s13 = smov 8  }
  0x36   : > { %8444 = dma.hbm_to_vmem [thread:$0]  (!%p9095_p6), %s10238_s2, 2048, %s9084_s18, [#allocation6], %s10220_s26, %s10220_s26, %s10222_s13  }
  0x37   : > { %s10240_s4 = sld [smem:[#allocation26_spill]] }
  0x3d   : > { %s8682_s14 = scalar_lea.hbm %s10240_s4, 2048 }
  0x3e   : > { %p8683_p4 = scmp.ne.s32.totalorder %s10240_s4, %s8682_s14  ;;  %p8689_p12 = scmp.lt.u32.totalorder %s8682_s14, %s10240_s4 }
  0x40   : > { %p8685_p10 = pnand %p8683_p4, %p9111_p8 }
  0x42   : > { %p8686_p11 = pneg %p8685_p10 }
  0x44   : > { %p8691_p13 = pnand %p8689_p12, %p8686_p11 }
  0x46   : > { %8694 = shalt.err (!%p8691_p13)
}
  0x47   : > { %s8695_s18 = scalar_lea.vmem %s9099_s22, 2048  ;;  %p8703_p7 = scmp.lt.s32.totalorder %s9099_s22, %s9099_s22 }
  0x48   : > { %p8696_p0 = scmp.ne.s32.totalorder %s9099_s22, %s8695_s18  ;;  %p8704_p9 = scmp.lt.s32.totalorder %s8695_s18, %s8695_s18 }
  0x4a   : > { %p8698_p2 = pnand %p8696_p0, %p9111_p8  ;;  %p8705_p4 = por %p8704_p9, %p8703_p7 }
  0x4c   : > { %p8699_p5 = pneg %p8698_p2 }
  0x4e   : > { %p8706_p10 = pnand %p8705_p4, %p8699_p5 }
  0x50   : > { %8709 = shalt.err (!%p8706_p10)
}
  0x51   : > { %8447 = dma.hbm_to_vmem [thread:$0]  (!%p9095_p6), %s10240_s4, 2048, %s9099_s22, [#allocation9], %s10220_s26, %s10220_s26, %s10222_s13  }
  0x52   : > { %s10241_s8 = sld [smem:[#allocation30_spill]] }
  0x58   : > { %s8710_s27 = scalar_lea.hbm %s10241_s8, 2048 }
  0x59   : > { %p8711_p11 = scmp.ne.s32.totalorder %s10241_s8, %s8710_s27  ;;  %p8717_p0 = scmp.lt.u32.totalorder %s8710_s27, %s10241_s8 }
  0x5b   : > { %p8713_p12 = pnand %p8711_p11, %p9111_p8 }
  0x5d   : > { %p8714_p13 = pneg %p8713_p12 }
  0x5f   : > { %p8719_p2 = pnand %p8717_p0, %p8714_p13 }
  0x61   : > { %8722 = shalt.err (!%p8719_p2)
}
  0x62   : > { %s8723_s22 = scalar_lea.vmem %s9101_s25, 2048  ;;  %p8731_p4 = scmp.lt.s32.totalorder %s9101_s25, %s9101_s25 }
  0x63   : > { %p8724_p5 = scmp.ne.s32.totalorder %s9101_s25, %s8723_s22  ;;  %p8732_p10 = scmp.lt.s32.totalorder %s8723_s22, %s8723_s22 }
  0x65   : > { %p8726_p7 = pnand %p8724_p5, %p9111_p8  ;;  %p8733_p11 = por %p8732_p10, %p8731_p4 }
  0x67   : > { %p8727_p9 = pneg %p8726_p7 }
  0x69   : > { %p8734_p12 = pnand %p8733_p11, %p8727_p9 }
  0x6b   : > { %8737 = shalt.err (!%p8734_p12)
}
  0x6c   : > { %8453 = dma.hbm_to_vmem [thread:$0]  (!%p9095_p6), %s10241_s8, 2048, %s9101_s25, [#allocation12], %s10220_s26, %s10220_s26, %s10222_s13  }
  0x6d   : > { %s8975_s7 = smov [#allocation10]   ;;  %s8976_s11 = smov [#allocation13]  }
  0x6e   : > { %s415_s9 = sshll.u32 %s8975_s7, 4  ;;  %s447_s27 = sshll.u32 %s8976_s11, 4  ;;  %s416_s9 = int_to_ptr.vmem [resolvable:$true] %s415_s9  ;;  %s448_s27 = int_to_ptr.vmem [resolvable:$true] %s447_s27 }
  0x6f   : > { %s10242_s6 = sld [smem:[#allocation28_spill]] }
  0x75   : > { %s8738_s24 = scalar_lea.hbm %s10242_s6, 2048 }
  0x76   : > { %p8739_p13 = scmp.ne.s32.totalorder %s10242_s6, %s8738_s24  ;;  %p8745_p5 = scmp.lt.u32.totalorder %s8738_s24, %s10242_s6 }
  0x78   : > { %p8741_p0 = pnand %p8739_p13, %p9111_p8 }
  0x7a   : > { %p8742_p2 = pneg %p8741_p0 }
  0x7c   : > { %p8747_p7 = pnand %p8745_p5, %p8742_p2 }
  0x7e   : > { %8750 = shalt.err (!%p8747_p7)
}
  0x7f   : > { %s8751_s25 = scalar_lea.vmem %s416_s9, 2048  ;;  %p8759_p11 = scmp.lt.s32.totalorder %s416_s9, %s416_s9 }
  0x80   : > { %p8752_p9 = scmp.ne.s32.totalorder %s416_s9, %s8751_s25  ;;  %p8760_p12 = scmp.lt.s32.totalorder %s8751_s25, %s8751_s25 }
  0x82   : > { %p8754_p4 = pnand %p8752_p9, %p9111_p8  ;;  %p8761_p1 = por %p8760_p12, %p8759_p11 }
  0x84   : > { %p8755_p10 = pneg %p8754_p4 }
  0x86   : > { %p8762_p3 = pnand %p8761_p1, %p8755_p10 }
  0x88   : > { %8765 = shalt.err (!%p8762_p3)
}
  0x89   : > { %8450 = dma.hbm_to_vmem [thread:$0]  (!%p9095_p6), %s10242_s6, 2048, %s416_s9, [#allocation9], %s10220_s26, %s10220_s26, %s10222_s13  }
  0x8a   : > { %s8766_s28 = scalar_lea.hbm %s10212_s10, 2048 }
  0x8b   : > { %p8767_p1 = scmp.ne.s32.totalorder %s10212_s10, %s8766_s28  ;;  %p8773_p0 = scmp.lt.u32.totalorder %s8766_s28, %s10212_s10 }
  0x8d   : > { %p8769_p3 = pnand %p8767_p1, %p9111_p8 }
  0x8f   : > { %p8770_p13 = pneg %p8769_p3 }
  0x91   : > { %p8775_p2 = pnand %p8773_p0, %p8770_p13 }
  0x93   : > { %8778 = shalt.err (!%p8775_p2)
}
  0x94   : > { %s8779_s18 = scalar_lea.vmem %s448_s27, 2048  ;;  %p8787_p4 = scmp.lt.s32.totalorder %s448_s27, %s448_s27 }
  0x95   : > { %p8780_p5 = scmp.ne.s32.totalorder %s448_s27, %s8779_s18  ;;  %p8788_p10 = scmp.lt.s32.totalorder %s8779_s18, %s8779_s18 }
  0x97   : > { %p8782_p7 = pnand %p8780_p5, %p9111_p8  ;;  %p8789_p11 = por %p8788_p10, %p8787_p4 }
  0x99   : > { %p8783_p9 = pneg %p8782_p7 }
  0x9b   : > { %p8790_p12 = pnand %p8789_p11, %p8783_p9 }
  0x9d   : > { %8793 = shalt.err (!%p8790_p12)
}
  0x9e   : > { %8456 = dma.hbm_to_vmem [thread:$0]  (!%p9095_p6), %s10212_s10, 2048, %s448_s27, [#allocation12], %s10220_s26, %s10220_s26, %s10222_s13  }
  0x9f   : > { %s8977_s2 = smov [#allocation14]   ;;  %s8794_s28 = scalar_lea.hbm %s10214_s12, 2048 }
  0xa0   : > { %s463_s5 = sshll.u32 %s8977_s2, 4  ;;  %p8795_p1 = scmp.ne.s32.totalorder %s10214_s12, %s8794_s28  ;;  %s464_s5 = int_to_ptr.vmem [resolvable:$true] %s463_s5 }
  0xa1   : > { %p8801_p0 = scmp.lt.u32.totalorder %s8794_s28, %s10214_s12 }
  0xa2   : > { %p8797_p3 = pnand %p8795_p1, %p9111_p8 }
  0xa4   : > { %p8798_p13 = pneg %p8797_p3 }
  0xa6   : > { %p8803_p2 = pnand %p8801_p0, %p8798_p13 }
  0xa8   : > { %8806 = shalt.err (!%p8803_p2)
}
  0xa9   : > { %s8807_s27 = scalar_lea.vmem %s464_s5, 2048  ;;  %p8815_p4 = scmp.lt.s32.totalorder %s464_s5, %s464_s5 }
  0xaa   : > { %p8808_p5 = scmp.ne.s32.totalorder %s464_s5, %s8807_s27  ;;  %p8816_p10 = scmp.lt.s32.totalorder %s8807_s27, %s8807_s27 }
  0xac   : > { %p8810_p7 = pnand %p8808_p5, %p9111_p8  ;;  %p8817_p11 = por %p8816_p10, %p8815_p4 }
  0xae   : > { %p8811_p9 = pneg %p8810_p7 }
  0xb0   : > { %p8818_p12 = pnand %p8817_p11, %p8811_p9 }
  0xb2   : > { %8821 = shalt.err (!%p8818_p12)
}
  0xb3   : > { %8459 = dma.hbm_to_vmem [thread:$0]  (!%p9095_p6), %s10214_s12, 2048, %s464_s5, [#allocation15], %s10220_s26, %s10220_s26, %s10222_s13  }
  0xb4   : > { %s5486_s23 = sadd.s32 4294967294, %s8968_s16   ;;  %s9252_s21 = sadd.s32 1, %s8968_s16  }
  0xb5   : > { %s40_s25 = ssub.s32 %s8968_s16, %s9252_s21  ;;  %s43_s2 = sadd.s32 1, %s8964_s15 }
  0xb6   : > { %p41_p8 = scmp.eq.s32.totalorder %s40_s25, 0  ;;  %p50_p1 = scmp.ne.s32.totalorder %s8964_s15, %s8960_s30 }
  0xb7   : > { %p51_p3 = scmp.eq.s32.totalorder %s8968_s16, 0  ;;  %p56_p13 = scmp.ne.s32.totalorder %s8960_s30, %s8956_s29 }
  0xb8   : > { %s9263_s7 = scalar_select %p41_p8, %s8964_s15, %s43_s2  }
  0xb9   : > { %p9265_p0 = por %p51_p3, %p50_p1  ;;  %p10244_p2 = scmp.eq.s32.totalorder %s9079_s19, 0 }
  0xba   : > { %p358_p5 = scmp.eq.s32.totalorder %s9079_s19, 1  ;;  %p364_p7 = scmp.eq.s32.totalorder %s5486_s23, 1 }
  0xbb   : > { %p9271_p6 = por %p10244_p2, %p56_p13  ;;  %p8477_p9 = scmp.lt.s32.totalorder %s8968_s16, 2 }
  0xbc   : > { %s480_s28 = sand.u32 1, %s8964_s15   ;;  %p9278_p4 = por %p358_p5, %p50_p1 }
  0xbd   : > { %p9282_p10 = por %p364_p7, %p56_p13  ;;  %s5495_s14 = sshll.u32 %s480_s28, 9 }
  0xbe   : > { %s10246_s17 = scalar_select %p9278_p4, 1, 0 }
  0xbf   : > { %s10247_s24 = scalar_select %p9282_p10, 1, 0 }
  0xc0   : > { %s5526_s22 = sshll.u32 %s8968_s16, 13  ;;  %s10248_s0 = sld [smem:[#allocation24_spill]] }
  0xc1   : > { %s484_s23 = scalar_lea.vmem [#allocation2], %s5495_s14  ;;  %p9296_p11 = pnand %p8477_p9, %p9265_p0 }
  0xc2   : > { %s492_s25 = sshll.u32 %s484_s23, 4  ;;  %s9303_s27 = scalar_lea.hbm %s10203_s1, %s5526_s22  ;;  %s9292_s25 = int_to_ptr.vmem [resolvable:$true] %s492_s25 }
  0xc3   : > { %s506_s18 = scalar_lea.vmem [#allocation5], %s5495_s14  ;;  %s9307_s6 = scalar_lea.sflag [#allocation3], %s480_s28 }
  0xc4   : > { %s9305_s4 = sshll.u32 %s506_s18, 4  ;;  %p8824_p8 = pneg %p9296_p11  ;;  %s9339_s4 = int_to_ptr.vmem [resolvable:$true] %s9305_s4 }
  0xc6   : > { %s9290_s9 = scalar_lea.hbm %s10248_s0, %s5526_s22  ;;  %s8827_s26 = scalar_lea.hbm %s10248_s0, 16384 }
  0xc7   : > { %s8822_s23 = scalar_lea.hbm %s9290_s9, 8192  ;;  %p8828_p13 = scmp.lt.u32.totalorder %s9290_s9, %s10248_s0 }
  0xc8   : > { %p8823_p12 = scmp.ne.s32.totalorder %s9290_s9, %s8822_s23  ;;  %p8829_p0 = scmp.lt.u32.totalorder %s8827_s26, %s8822_s23 }
  0xc9   : > { %p8831_p5 = scmp.lt.u32.totalorder %s8822_s23, %s9290_s9 }
  0xca   : > { %p8825_p1 = pnand %p8824_p8, %p8823_p12  ;;  %p8830_p2 = por %p8829_p0, %p8828_p13 }
  0xcc   : > { %p8826_p3 = pneg %p8825_p1  ;;  %p8832_p7 = por %p8831_p5, %p8830_p2 }
  0xce   : > { %p8833_p9 = pnand %p8832_p7, %p8826_p3 }
  0xd0   : > { %8836 = shalt.err (!%p8833_p9)
}
  0xd1   : > { %s8837_s28 = scalar_lea.vmem %s9292_s25, 8192  ;;  %s8978_s8 = smov [#allocation2]  }
  0xd2   : > { %p8838_p12 = scmp.ne.s32.totalorder %s9292_s25, %s8837_s28  ;;  %s8842_s14 = sshll.u32 %s8978_s8, 4  ;;  %s8843_s14 = int_to_ptr.vmem [resolvable:$false] %s8842_s14 }
  0xd3   : > { %s8844_s18 = scalar_lea.vmem %s8843_s14, 16384  ;;  %p8845_p4 = scmp.lt.s32.totalorder %s9292_s25, %s8843_s14 }
  0xd4   : > { %p8840_p1 = pnand %p8838_p12, %p8824_p8  ;;  %p8846_p13 = scmp.lt.s32.totalorder %s8844_s18, %s8837_s28 }
  0xd6   : > { %p8841_p10 = pneg %p8840_p1  ;;  %p8847_p0 = por %p8846_p13, %p8845_p4 }
  0xd8   : > { %p8848_p2 = pnand %p8847_p0, %p8841_p10 }
  0xda   : > { %8851 = shalt.err (!%p8848_p2)
}
  0xdb   : > { %s10250_s23 = smov 8   ;;  %s10251_s11 = smov 128  }
  0xdc   : > { %8463 = dma.hbm_to_vmem [thread:$0]  (!%p9296_p11), %s9290_s9, 8192, %s9292_s25, %s9307_s6, %s10251_s11, %s10251_s11, %s10250_s23  }
  0xdd   : > { %s502_s26 = sand.u32 1, %s8968_s16   ;;  %s8852_s22 = scalar_lea.hbm %s9303_s27, 8192 }
  0xde   : > { %s9342_s13 = scalar_lea.sflag [#allocation6], %s502_s26  ;;  %p8853_p4 = scmp.ne.s32.totalorder %s9303_s27, %s8852_s22 }
  0xdf   : > { %s8857_s14 = scalar_lea.hbm %s10203_s1, 16384  ;;  %p8858_p5 = scmp.lt.u32.totalorder %s9303_s27, %s10203_s1 }
  0xe0   : > { %p8855_p10 = pnand %p8853_p4, %p8824_p8  ;;  %p8859_p7 = scmp.lt.u32.totalorder %s8857_s14, %s8852_s22 }
  0xe1   : > { %p8861_p12 = scmp.lt.u32.totalorder %s8852_s22, %s9303_s27 }
  0xe2   : > { %p8856_p3 = pneg %p8855_p10  ;;  %p8860_p9 = por %p8859_p7, %p8858_p5 }
  0xe4   : > { %p8862_p1 = por %p8861_p12, %p8860_p9 }
  0xe6   : > { %p8863_p13 = pnand %p8862_p1, %p8856_p3 }
  0xe8   : > { %8866 = shalt.err (!%p8863_p13)
}
  0xe9   : > { %s8867_s6 = scalar_lea.vmem %s9339_s4, 8192  ;;  %s8979_s9 = smov [#allocation5]  }
  0xea   : > { %p8868_p0 = scmp.ne.s32.totalorder %s9339_s4, %s8867_s6  ;;  %s8872_s25 = sshll.u32 %s8979_s9, 4  ;;  %s8873_s25 = int_to_ptr.vmem [resolvable:$false] %s8872_s25 }
  0xeb   : > { %s8874_s0 = scalar_lea.vmem %s8873_s25, 16384  ;;  %p8875_p10 = scmp.lt.s32.totalorder %s9339_s4, %s8873_s25 }
  0xec   : > { %p8870_p2 = pnand %p8868_p0, %p8824_p8  ;;  %p8876_p5 = scmp.lt.s32.totalorder %s8874_s0, %s8867_s6 }
  0xee   : > { %p8871_p4 = pneg %p8870_p2  ;;  %p8877_p7 = por %p8876_p5, %p8875_p10 }
  0xf0   : > { %p8878_p9 = pnand %p8877_p7, %p8871_p4 }
  0xf2   : > { %8881 = shalt.err (!%p8878_p9)
}
  0xf3   : > { %8466 = dma.hbm_to_vmem [thread:$0]  (!%p9296_p11), %s9303_s27, 8192, %s9339_s4, %s9342_s13, %s10251_s11, %s10251_s11, %s10250_s23  }
  0xf4   : > { %p10252_p8 = scmp.ne.s32.totalorder %s10236_s20, 0 }
  0xf5   : > { %s9374_s26 = sand.u32 (!%p10252_p8), 1, %s8960_s30  }
  0xf6   : > { %526 = sbr.rel (%p10252_p8) target bundleno = 2457 (0x999), region = 76  ;;  %s9377_s22 = sshll.u32 (!%p10252_p8), %s9374_s26, 9 }
  0xf7   : > { %s529_s2 = scalar_lea.sflag (!%p10252_p8), [#allocation3], %s9374_s26  ;;  %s9381_s28 = scalar_lea.vmem (!%p10252_p8), [#allocation2], %s9377_s22 }
  0xfd   : > { %8927 = dma.done.wait (%p9271_p6), %s529_s2, 8192  }
  0xfe   : > { %8929 = vsyncadd (%p9271_p6), %s529_s2, 4294959104  ;;  %s537_s4 = sand.u32 1, %s9079_s19   ;;  %s9389_s27 = scalar_lea.vmem [#allocation5], %s9377_s22 }
  0xff   : > { %s538_s20 = scalar_lea.sflag [#allocation6], %s537_s4 }
 0x100   : > { %8931 = dma.done.wait (%p9271_p6), %s538_s20, 8192  }
 0x101   : > { %8933 = vsyncadd (%p9271_p6), %s538_s20, 4294959104  ;;  %p10253_p11 = scmp.eq.s32.totalorder %s9079_s19, 0 }
 0x103   : > { %8935 = dma.done.wait (%p10253_p11), [#allocation6], 2048   ;;  %p10254_p3 = pmov %p10253_p11 }
 0x105   : > { %8937 = vsyncadd (%p10254_p3), [#allocation6], 4294965248  ;;  %p10255_p12 = pmov %p10254_p3 }
 0x106   : > { %p10256_p1 = pmov %p10254_p3 }
 0x107   : > { %8939 = dma.done.wait (%p10255_p12), [#allocation9], 4096  }
 0x108   : > { %8941 = vsyncadd (%p10256_p1), [#allocation9], 4294963200  ;;  %p10257_p13 = pmov %p10256_p1 }
 0x109   : > { %p10258_p0 = pmov %p10256_p1 }
 0x10a   : > { %8943 = dma.done.wait (%p10257_p13), [#allocation12], 4096  }
 0x10b   : > { %8945 = vsyncadd (%p10258_p0), [#allocation12], 4294963200  ;;  %p10259_p6 = pmov %p10258_p0 }
 0x10c   : > { %p10260_p2 = pmov %p10258_p0 }
 0x10d   : > { %8947 = dma.done.wait (%p10259_p6), [#allocation15], 2048  }
 0x10e   : > { %8949 = vsyncadd (%p10260_p2), [#allocation15], 4294965248  ;;  %v682_v0 = vld [vmem:[%s9389_s27] sm:$0xff]  ;;  %v683_v1 = vld [vmem:[%s9389_s27 + $0x8] sm:$0xff]  ;;  %s10261_s8 = sld [smem:[#allocation27_spill]]  ;;  %s10262_s6 = sld [smem:[#allocation29_spill]] }
 0x10f   : > { %v684_v2 = vld [vmem:[%s9389_s27 + $0x10] sm:$0xff]  ;;  %v7835_v3 = vpack.c.bf16 %v683_v1, %v682_v0  ;;  %v685_v4 = vld [vmem:[%s9389_s27 + $0x18] sm:$0xff]  ;;  %v686_v6 = vld [vmem:[%s9389_s27 + $0x20] sm:$0xff]  ;;  %s10263_s0 = sld [smem:[#allocation31_spill]]  ;;  %s10264_s4 = sld [smem:[#allocation32_spill]] }
 0x110   : > { %v7839_v5 = vpack.c.bf16 %v685_v4, %v684_v2  ;;  %v687_v7 = vld [vmem:[%s9389_s27 + $0x28] sm:$0xff]  ;;  %v9418_v9 = vld [vmem:[%s9381_s28] sm:$0xff]  ;;  %v688_v11 = vld [vmem:[%s9389_s27 + $0x30] sm:$0xff]  ;;  %s10265_s5 = sld [smem:[#allocation33_spill]]  ;;  %s10023_s23 = scalar_lea.vmem [#allocation16], %s9377_s22 }
 0x111   : > { %7836 = vmatprep.subr.bf16.mxu0 %v7835_v3  ;;  %v7843_v8 = vpack.c.bf16 %v687_v7, %v686_v6  ;;  %v698_v10 = vld [vmem:[%s9389_s27 + $0x80] sm:$0xff]  ;;  %v689_v12 = vld [vmem:[%s9389_s27 + $0x38] sm:$0xff]  ;;  %6427 = vmatprep.mubr.f32.mxu0 %v9418_v9  ;;  %v699_v13 = vld [vmem:[%s9389_s27 + $0x88] sm:$0xff]  ;;  %s5530_s22 = sshll.u32 %s9079_s19, 13  ;;  %s5333_s11 = sshll.u32 %s10023_s23, 4  ;;  %s10155_s11 = int_to_ptr.vmem [resolvable:$true] %s5333_s11 }
 0x112   : > { %7838 = vmatpush3.bf16.msra.mxu0 %v7835_v3  ;;  %v7867_v14 = vpack.c.bf16 %v699_v13, %v698_v10  ;;  %v700_v15 = vld [vmem:[%s9389_s27 + $0x90] sm:$0xff]  ;;  %v701_v16 = vld [vmem:[%s9389_s27 + $0x98] sm:$0xff]  ;;  %v702_v18 = vld [vmem:[%s9389_s27 + $0xa0] sm:$0xff]  ;;  %v7847_v20 = vpack.c.bf16 %v689_v12, %v688_v11  ;;  %s10266_s14 = sld [smem:[#allocation34_spill]]  ;;  %s5319_s19 = scalar_lea.sflag [#allocation4], %s9374_s26 }
 0x113   : > { %7840 = vmatprep.subr.bf16.mxu0 %v7839_v5  ;;  %v7871_v17 = vpack.c.bf16 %v701_v16, %v700_v15  ;;  %v703_v19 = vld [vmem:[%s9389_s27 + $0xa8] sm:$0xff]  ;;  %v690_v21 = vld [vmem:[%s9389_s27 + $0x40] sm:$0xff]  ;;  %v704_v24 = vld [vmem:[%s9389_s27 + $0xb0] sm:$0xff]  ;;  %p10267_p10 = scmp.ne.s32.totalorder %s10246_s17, 0  ;;  %s8980_s9 = smov [#allocation16]  }
 0x114   : > { %7868 = vmatprep.subr.bf16.mxu1 %v7867_v14  ;;  %v691_v22 = vld [vmem:[%s9389_s27 + $0x48] sm:$0xff]  ;;  %v7875_v23 = vpack.c.bf16 %v703_v19, %v702_v18  ;;  %v705_v25 = vld [vmem:[%s9389_s27 + $0xb8] sm:$0xff]  ;;  %v692_v27 = vld [vmem:[%s9389_s27 + $0x50] sm:$0xff]  ;;  %s8886_s25 = sshll.u32 %s8980_s9, 4  ;;  %s8887_s25 = int_to_ptr.vmem [resolvable:$false] %s8886_s25 }
 0x115   : > { %7870 = vmatpush3.bf16.msra.mxu1 %v7867_v14  ;;  %v7851_v26 = vpack.c.bf16 %v691_v22, %v690_v21  ;;  %v693_v28 = vld [vmem:[%s9389_s27 + $0x58] sm:$0xff]  ;;  %v7879_v29 = vpack.c.bf16 %v705_v25, %v704_v24  ;;  %v706_v30 = vld [vmem:[%s9389_s27 + $0xc0] sm:$0xff]  ;;  %v707_v31 = vld [vmem:[%s9389_s27 + $0xc8] sm:$0xff]  ;;  %p8889_p9 = scmp.lt.s32.totalorder %s10155_s11, %s8887_s25 }
 0x116   : > { %7842 = vmatpush3.bf16.msra.mxu0 %v7839_v5  ;;  %7872 = vmatprep.subr.bf16.mxu1 %v7871_v17  ;;  %v634_v32 = vld [vmem:[%s9381_s28 + $0x80] sm:$0xff]  ;;  %v7855_v33 = vpack.c.bf16 %v693_v28, %v692_v27  ;;  %v695_v35 = vld [vmem:[%s9389_s27 + $0x68] sm:$0xff]  ;;  %v7883_v36 = vpack.c.bf16 %v707_v31, %v706_v30  ;;  %v708_v37 = vld [vmem:[%s9389_s27 + $0xd0] sm:$0xff] }
 0x117   : > { %7844 = vmatprep.subr.bf16.mxu0 %v7843_v8  ;;  %6483 = vmatprep.mubr.f32.mxu1 %v634_v32  ;;  %v694_v34 = vld [vmem:[%s9389_s27 + $0x60] sm:$0xff]  ;;  %v709_v38 = vld [vmem:[%s9389_s27 + $0xd8] sm:$0xff]  ;;  %v696_v40 = vld [vmem:[%s9389_s27 + $0x70] sm:$0xff] }
 0x118   : > { %v7859_v39 = vpack.c.bf16 %v695_v35, %v694_v34  ;;  %v697_v41 = vld [vmem:[%s9389_s27 + $0x78] sm:$0xff]  ;;  %v7887_v42 = vpack.c.bf16 %v709_v38, %v708_v37  ;;  %v710_v43 = vld [vmem:[%s9389_s27 + $0xe0] sm:$0xff]  ;;  %v711_v44 = vld [vmem:[%s9389_s27 + $0xe8] sm:$0xff]  ;;  %s10153_s18 = scalar_lea.hbm %s10266_s14, %s5530_s22 }
 0x119   : > { %7874 = vmatpush3.bf16.msra.mxu1 %v7871_v17  ;;  %v7863_v45 = vpack.c.bf16 %v697_v41, %v696_v40  ;;  %v714_v46 = vld [vmem:[%s9389_s27 + $0x100] sm:$0xff]  ;;  %v715_v47 = vld [vmem:[%s9389_s27 + $0x108] sm:$0xff]  ;;  %v7891_v48 = vpack.c.bf16 %v711_v44, %v710_v43  ;;  %v712_v49 = vld [vmem:[%s9389_s27 + $0xf0] sm:$0xff] }
 0x11a   : > { %7846 = vmatpush3.bf16.msra.mxu0 %v7843_v8  ;;  %7876 = vmatprep.subr.bf16.mxu1 %v7875_v23  ;;  %v713_v50 = vld [vmem:[%s9389_s27 + $0xf8] sm:$0xff]  ;;  %v7899_v51 = vpack.c.bf16 %v715_v47, %v714_v46  ;;  %v716_v52 = vld [vmem:[%s9389_s27 + $0x110] sm:$0xff]  ;;  %v619_v55 = vld [vmem:[%s9381_s28 + $0x8] sm:$0xff] }
 0x11b   : > { %7848 = vmatprep.subr.bf16.mxu0 %v7847_v20  ;;  %v717_v53 = vld [vmem:[%s9389_s27 + $0x118] sm:$0xff]  ;;  %v7895_v54 = vpack.c.bf16 %v713_v50, %v712_v49  ;;  %v730_v56 = vld [vmem:[%s9389_s27 + $0x180] sm:$0xff]  ;;  %v731_v57 = vld [vmem:[%s9389_s27 + $0x188] sm:$0xff] }
 0x11c   : > { %v620_v58 = vld [vmem:[%s9381_s28 + $0x10] sm:$0xff]  ;;  %v7903_v59 = vpack.c.bf16 %v717_v53, %v716_v52  ;;  %v718_v60 = vld [vmem:[%s9389_s27 + $0x120] sm:$0xff]  ;;  %v719_v61 = vld [vmem:[%s9389_s27 + $0x128] sm:$0xff]  ;;  %v7931_v62 = vpack.c.bf16 %v731_v57, %v730_v56 }
 0x11d   : > { %7878 = vmatpush3.bf16.msra.mxu1 %v7875_v23  ;;  %v621_v63 = vld [vmem:[%s9381_s28 + $0x18] sm:$0xff]  ;;  %v732_v0 = vld [vmem:[%s9389_s27 + $0x190] sm:$0xff]  ;;  %v622_v2 = vld [vmem:[%s9381_s28 + $0x20] sm:$0xff]  ;;  %v7907_v3 = vpack.c.bf16 %v719_v61, %v718_v60 }
 0x11e   : > { %7850 = vmatpush3.bf16.msra.mxu0 %v7847_v20  ;;  %7880 = vmatprep.subr.bf16.mxu1 %v7879_v29  ;;  %v733_v1 = vld [vmem:[%s9389_s27 + $0x198] sm:$0xff]  ;;  %v635_v4 = vld [vmem:[%s9381_s28 + $0x88] sm:$0xff]  ;;  %v720_v5 = vld [vmem:[%s9389_s27 + $0x130] sm:$0xff] }
 0x11f   : > { %7852 = vmatprep.subr.bf16.mxu0 %v7851_v26  ;;  %v721_v6 = vld [vmem:[%s9389_s27 + $0x138] sm:$0xff]  ;;  %v636_v7 = vld [vmem:[%s9381_s28 + $0x90] sm:$0xff]  ;;  %v7935_v8 = vpack.c.bf16 %v733_v1, %v732_v0  ;;  %v623_v10 = vld [vmem:[%s9381_s28 + $0x28] sm:$0xff] }
 0x120   : > { %v734_v11 = vld [vmem:[%s9389_s27 + $0x1a0] sm:$0xff]  ;;  %v735_v12 = vld [vmem:[%s9389_s27 + $0x1a8] sm:$0xff]  ;;  %v624_v13 = vld [vmem:[%s9381_s28 + $0x30] sm:$0xff]  ;;  %v7911_v14 = vpack.c.bf16 %v721_v6, %v720_v5 }
 0x121   : > { %7882 = vmatpush3.bf16.msra.mxu1 %v7879_v29  ;;  %v637_v15 = vld [vmem:[%s9381_s28 + $0x98] sm:$0xff]  ;;  %v722_v16 = vld [vmem:[%s9389_s27 + $0x140] sm:$0xff]  ;;  %v723_v17 = vld [vmem:[%s9389_s27 + $0x148] sm:$0xff]  ;;  %v7939_v19 = vpack.c.bf16 %v735_v12, %v734_v11 }
 0x122   : > { %7854 = vmatpush3.bf16.msra.mxu0 %v7851_v26  ;;  %7884 = vmatprep.subr.bf16.mxu1 %v7883_v36  ;;  %v638_v18 = vld [vmem:[%s9381_s28 + $0xa0] sm:$0xff]  ;;  %v625_v20 = vld [vmem:[%s9381_s28 + $0x38] sm:$0xff]  ;;  %v736_v21 = vld [vmem:[%s9389_s27 + $0x1b0] sm:$0xff]  ;;  %v7915_v24 = vpack.c.bf16 %v723_v17, %v722_v16 }
 0x123   : > { %7856 = vmatprep.subr.bf16.mxu0 %v7855_v33  ;;  %v737_v22 = vld [vmem:[%s9389_s27 + $0x1b8] sm:$0xff]  ;;  %v626_v23 = vld [vmem:[%s9381_s28 + $0x40] sm:$0xff]  ;;  %v639_v25 = vld [vmem:[%s9381_s28 + $0xa8] sm:$0xff] }
 0x124   : > { %v724_v26 = vld [vmem:[%s9389_s27 + $0x150] sm:$0xff]  ;;  %v725_v27 = vld [vmem:[%s9389_s27 + $0x158] sm:$0xff]  ;;  %v7943_v29 = vpack.c.bf16 %v737_v22, %v736_v21  ;;  %v627_v30 = vld [vmem:[%s9381_s28 + $0x48] sm:$0xff] }
 0x125   : > { %7886 = vmatpush3.bf16.msra.mxu1 %v7883_v36  ;;  %v640_v28 = vld [vmem:[%s9381_s28 + $0xb0] sm:$0xff]  ;;  %v738_v31 = vld [vmem:[%s9389_s27 + $0x1c0] sm:$0xff]  ;;  %v739_v32 = vld [vmem:[%s9389_s27 + $0x1c8] sm:$0xff]  ;;  %v7919_v34 = vpack.c.bf16 %v725_v27, %v724_v26 }
 0x126   : > { %7858 = vmatpush3.bf16.msra.mxu0 %v7855_v33  ;;  %7888 = vmatprep.subr.bf16.mxu1 %v7887_v42  ;;  %v628_v33 = vld [vmem:[%s9381_s28 + $0x50] sm:$0xff]  ;;  %v641_v35 = vld [vmem:[%s9381_s28 + $0xb8] sm:$0xff]  ;;  %v726_v36 = vld [vmem:[%s9389_s27 + $0x160] sm:$0xff] }
 0x127   : > { %7860 = vmatprep.subr.bf16.mxu0 %v7859_v39  ;;  %v727_v37 = vld [vmem:[%s9389_s27 + $0x168] sm:$0xff]  ;;  %v642_v38 = vld [vmem:[%s9381_s28 + $0xc0] sm:$0xff]  ;;  %v629_v40 = vld [vmem:[%s9381_s28 + $0x58] sm:$0xff] }
 0x128   : > { %v740_v41 = vld [vmem:[%s9389_s27 + $0x1d0] sm:$0xff]  ;;  %v630_v43 = vld [vmem:[%s9381_s28 + $0x60] sm:$0xff]  ;;  %v7923_v44 = vpack.c.bf16 %v727_v37, %v726_v36  ;;  %v729_v47 = vld [vmem:[%s9389_s27 + $0x178] sm:$0xff] }
 0x129   : > { %7890 = vmatpush3.bf16.msra.mxu1 %v7887_v42  ;;  %v741_v42 = vld [vmem:[%s9389_s27 + $0x1d8] sm:$0xff]  ;;  %v728_v46 = vld [vmem:[%s9389_s27 + $0x170] sm:$0xff]  ;;  %v631_v50 = vld [vmem:[%s9381_s28 + $0x68] sm:$0xff] }
 0x12a   : > { %7862 = vmatpush3.bf16.msra.mxu0 %v7859_v39  ;;  %7892 = vmatprep.subr.bf16.mxu1 %v7891_v48  ;;  %v7947_v39 = vpack.c.bf16 %v739_v32, %v738_v31  ;;  %v7951_v49 = vpack.c.bf16 %v741_v42, %v740_v41  ;;  %v743_v52 = vld [vmem:[%s9389_s27 + $0x1e8] sm:$0xff]  ;;  %v632_v53 = vld [vmem:[%s9381_s28 + $0x70] sm:$0xff]  ;;  %v1326_v56 = vld [vmem:[#allocation7] sm:$0xff] }
 0x12b   : > { %7864 = vmatprep.subr.bf16.mxu0 %v7863_v45  ;;  %v1327_v57 = vld [vmem:[#allocation7 + $0x8] sm:$0xff]  ;;  %v633_v60 = vld [vmem:[%s9381_s28 + $0x78] sm:$0xff]  ;;  %v744_v61 = vld [vmem:[%s9389_s27 + $0x1f0] sm:$0xff] }
 0x12c   : > { %v7963_v0 = vpack.c.bf16 %v1327_v57, %v1326_v56  ;;  %v647_v1 = vld [vmem:[%s9381_s28 + $0xe8] sm:$0xff]  ;;  %v1330_v11 = vld [vmem:[#allocation7 + $0x20] sm:$0xff]  ;;  %v656_v22 = vld [vmem:[%s9381_s28 + $0x130] sm:$0xff] }
 0x12d   : > { %7894 = vmatpush3.bf16.msra.mxu1 %v7891_v48  ;;  %v644_v48 = vld [vmem:[%s9381_s28 + $0xd0] sm:$0xff]  ;;  %v651_v6 = vld [vmem:[%s9381_s28 + $0x108] sm:$0xff]  ;;  %v670_v27 = vld [vmem:[%s9381_s28 + $0x1a0] sm:$0xff] }
 0x12e   : > { %7866 = vmatpush3.bf16.msra.mxu0 %v7863_v45  ;;  %7896 = vmatprep.subr.bf16.mxu1 %v7895_v54  ;;  %v643_v45 = vld [vmem:[%s9381_s28 + $0xc8] sm:$0xff]  ;;  %v1336_v32 = vld [vmem:[#allocation7 + $0x50] sm:$0xff]  ;;  %v674_v41 = vld [vmem:[%s9381_s28 + $0x1c0] sm:$0xff] }
 0x12f   : > { %7900 = vmatprep.subr.bf16.mxu0 %v7899_v51  ;;  %v1331_v12 = vld [vmem:[#allocation7 + $0x28] sm:$0xff]  ;;  %v660_v36 = vld [vmem:[%s9381_s28 + $0x150] sm:$0xff]  ;;  %v661_v42 = vld [vmem:[%s9381_s28 + $0x158] sm:$0xff] }
 0x130   : > { %v7971_v16 = vpack.c.bf16 %v1331_v12, %v1330_v11  ;;  %v667_v17 = vld [vmem:[%s9381_s28 + $0x188] sm:$0xff]  ;;  %v680_v56 = vld [vmem:[%s9381_s28 + $0x1f0] sm:$0xff]  ;;  %v681_v57 = vld [vmem:[%s9381_s28 + $0x1f8] sm:$0xff] }
 0x131   : > { %6428 = vmatmul.mubr.f32.vlgmr.msra.gmra.mrb[0].mxu0 %v619_v55  ;;  %7898 = vmatpush3.bf16.msra.mxu1 %v7895_v54  ;;  %v7927_v54 = vpack.c.bf16 %v729_v47, %v728_v46  ;;  %v645_v55 = vld [vmem:[%s9381_s28 + $0xd8] sm:$0xff]  ;;  %v655_v21 = vld [vmem:[%s9381_s28 + $0x128] sm:$0xff]  ;;  %v1340_v46 = vld [vmem:[#allocation7 + $0x70] sm:$0xff] }
 0x132   : > { %6430 = vmatprep.mubr.f32.mxu0 %v620_v58  ;;  %7902 = vmatpush3.bf16.msra.mxu0 %v7899_v51  ;;  %v742_v51 = vld [vmem:[%s9389_s27 + $0x1e0] sm:$0xff]  ;;  %v1335_v26 = vld [vmem:[#allocation7 + $0x48] sm:$0xff]  ;;  %v1341_v47 = vld [vmem:[#allocation7 + $0x78] sm:$0xff] }
 0x133   : > { %7904 = vmatprep.subr.bf16.mxu0 %v7903_v59  ;;  %7932 = vmatprep.subr.bf16.mxu1 %v7931_v62  ;;  %v646_v58 = vld [vmem:[%s9381_s28 + $0xe0] sm:$0xff]  ;;  %v671_v31 = vld [vmem:[%s9381_s28 + $0x1a8] sm:$0xff]  ;;  %v1809_v11 = vld [vmem:[#allocation8 + $0x58] sm:$0xff] }
 0x134   : > { %6484 = vmatmul.mubr.f32.vlgmr.msra.gmra.mrb[0].mxu1 %v635_v4  ;;  %v648_v4 = vld [vmem:[%s9381_s28 + $0xf0] sm:$0xff] }
 0x135   : > { %6431 = vmatmul.mubr.f32.gmra.mrb[2].mxu0 %v621_v63  ;;  %6486 = vmatprep.mubr.f32.mxu1 %v636_v7  ;;  %v650_v63 = vld [vmem:[%s9381_s28 + $0x100] sm:$0xff]  ;;  %v652_v7 = vld [vmem:[%s9381_s28 + $0x110] sm:$0xff] }
 0x136   : > { %6433 = vmatprep.mubr.f32.mxu0 %v622_v2  ;;  %7906 = vmatpush3.bf16.msra.mxu0 %v7903_v59  ;;  %v7955_v59 = vpack.c.bf16 %v743_v52, %v742_v51  ;;  %v1328_v2 = vld [vmem:[#allocation7 + $0x10] sm:$0xff]  ;;  %v7991_v51 = vpack.c.bf16 %v1341_v47, %v1340_v46  ;;  %v677_v52 = vld [vmem:[%s9381_s28 + $0x1d8] sm:$0xff] }
 0x137   : > { %7908 = vmatprep.subr.bf16.mxu0 %v7907_v3  ;;  %7934 = vmatpush3.bf16.msra.mxu1 %v7931_v62  ;;  %v745_v62 = vld [vmem:[%s9389_s27 + $0x1f8] sm:$0xff] }
 0x138   : > { %7936 = vmatprep.subr.bf16.mxu1 %v7935_v8  ;;  %6487 = vmatmul.mubr.f32.gmra.mrb[2].mxu1 %v637_v15  ;;  %v7959_v5 = vpack.c.bf16 %v745_v62, %v744_v61  ;;  %v654_v15 = vld [vmem:[%s9381_s28 + $0x120] sm:$0xff]  ;;  %v1800_v61 = vld [vmem:[#allocation8 + $0x10] sm:$0xff]  ;;  %v1801_v62 = vld [vmem:[#allocation8 + $0x18] sm:$0xff] }
 0x139   : > { %6434 = vmatmul.mubr.f32.gmra.mrb[4].mxu0 %v623_v10  ;;  %6489 = vmatprep.mubr.f32.mxu1 %v638_v18  ;;  %v649_v10 = vld [vmem:[%s9381_s28 + $0xf8] sm:$0xff]  ;;  %v1332_v18 = vld [vmem:[#allocation7 + $0x30] sm:$0xff] }
 0x13a   : > { %6436 = vmatprep.mubr.f32.mxu0 %v624_v13  ;;  %7910 = vmatpush3.bf16.msra.mxu0 %v7907_v3  ;;  %v1329_v3 = vld [vmem:[#allocation7 + $0x18] sm:$0xff]  ;;  %v666_v13 = vld [vmem:[%s9381_s28 + $0x180] sm:$0xff] }
 0x13b   : > { %7912 = vmatprep.subr.bf16.mxu0 %v7911_v14  ;;  %7938 = vmatpush3.bf16.msra.mxu1 %v7935_v8  ;;  %v7967_v8 = vpack.c.bf16 %v1329_v3, %v1328_v2  ;;  %v1804_v3 = vld [vmem:[#allocation8 + $0x30] sm:$0xff] }
 0x13c   : > { %7940 = vmatprep.subr.bf16.mxu1 %v7939_v19  ;;  %6490 = vmatmul.mubr.f32.gmra.mrb[4].mxu1 %v639_v25  ;;  %v1334_v25 = vld [vmem:[#allocation7 + $0x40] sm:$0xff] }
 0x13d   : > { %6437 = vmatmul.mubr.f32.gmra.mrb[6].mxu0 %v625_v20  ;;  %6492 = vmatprep.mubr.f32.mxu1 %v640_v28  ;;  %v668_v20 = vld [vmem:[%s9381_s28 + $0x190] sm:$0xff]  ;;  %v657_v28 = vld [vmem:[%s9381_s28 + $0x138] sm:$0xff] }
 0x13e   : > { %6439 = vmatprep.mubr.f32.mxu0 %v626_v23  ;;  %7914 = vmatpush3.bf16.msra.mxu0 %v7911_v14  ;;  %v653_v14 = vld [vmem:[%s9381_s28 + $0x118] sm:$0xff] }
 0x13f   : > { %7916 = vmatprep.subr.bf16.mxu0 %v7915_v24  ;;  %7942 = vmatpush3.bf16.msra.mxu1 %v7939_v19  ;;  %v1333_v19 = vld [vmem:[#allocation7 + $0x38] sm:$0xff] }
 0x140   : > { %7944 = vmatprep.subr.bf16.mxu1 %v7943_v29  ;;  %6493 = vmatmul.mubr.f32.gmra.mrb[6].mxu1 %v641_v35  ;;  %v7975_v23 = vpack.c.bf16 %v1333_v19, %v1332_v18  ;;  %v659_v35 = vld [vmem:[%s9381_s28 + $0x148] sm:$0xff] }
 0x141   : > { %6440 = vmatmul.mubr.f32.gmra.mrb[8].mxu0 %v627_v30  ;;  %6495 = vmatprep.mubr.f32.mxu1 %v642_v38  ;;  %v7979_v30 = vpack.c.bf16 %v1335_v26, %v1334_v25  ;;  %v673_v38 = vld [vmem:[%s9381_s28 + $0x1b8] sm:$0xff] }
 0x142   : > { %6442 = vmatprep.mubr.f32.mxu0 %v628_v33  ;;  %7918 = vmatpush3.bf16.msra.mxu0 %v7915_v24  ;;  %v669_v24 = vld [vmem:[%s9381_s28 + $0x198] sm:$0xff] }
 0x143   : > { %7920 = vmatprep.subr.bf16.mxu0 %v7919_v34  ;;  %7946 = vmatpush3.bf16.msra.mxu1 %v7943_v29  ;;  %v658_v29 = vld [vmem:[%s9381_s28 + $0x140] sm:$0xff]  ;;  %v1337_v33 = vld [vmem:[#allocation7 + $0x58] sm:$0xff] }
 0x144   : > { %7948 = vmatprep.subr.bf16.mxu1 %v7947_v39  ;;  %6496 = vmatmul.mubr.f32.gmra.mrb[8].mxu1 %v643_v45  ;;  %v7983_v37 = vpack.c.bf16 %v1337_v33, %v1336_v32  ;;  %v675_v45 = vld [vmem:[%s9381_s28 + $0x1c8] sm:$0xff] }
 0x145   : > { %6443 = vmatmul.mubr.f32.gmra.mrb[10].mxu0 %v629_v40  ;;  %6498 = vmatprep.mubr.f32.mxu1 %v644_v48  ;;  %v1339_v40 = vld [vmem:[#allocation7 + $0x68] sm:$0xff]  ;;  %v676_v48 = vld [vmem:[%s9381_s28 + $0x1d0] sm:$0xff] }
 0x146   : > { %6445 = vmatprep.mubr.f32.mxu0 %v630_v43  ;;  %7922 = vmatpush3.bf16.msra.mxu0 %v7919_v34  ;;  %v672_v34 = vld [vmem:[%s9381_s28 + $0x1b0] sm:$0xff]  ;;  %v662_v43 = vld [vmem:[%s9381_s28 + $0x160] sm:$0xff] }
 0x147   : > { %7924 = vmatprep.subr.bf16.mxu0 %v7923_v44  ;;  %7950 = vmatpush3.bf16.msra.mxu1 %v7947_v39  ;;  %v1338_v39 = vld [vmem:[#allocation7 + $0x60] sm:$0xff] }
 0x148   : > { %7952 = vmatprep.subr.bf16.mxu1 %v7951_v49  ;;  %6499 = vmatmul.mubr.f32.gmra.mrb[10].mxu1 %v645_v55  ;;  %v679_v55 = vld [vmem:[%s9381_s28 + $0x1e8] sm:$0xff] }
 0x149   : > { %6446 = vmatmul.mubr.f32.gmra.mrb[12].mxu0 %v631_v50  ;;  %6501 = vmatprep.mubr.f32.mxu1 %v646_v58  ;;  %v664_v50 = vld [vmem:[%s9381_s28 + $0x170] sm:$0xff]  ;;  %v1798_v58 = vld [vmem:[#allocation8] sm:$0xff] }
 0x14a   : > { %6448 = vmatprep.mubr.f32.mxu0 %v632_v53  ;;  %7926 = vmatpush3.bf16.msra.mxu0 %v7923_v44  ;;  %v7987_v44 = vpack.c.bf16 %v1339_v40, %v1338_v39  ;;  %v678_v53 = vld [vmem:[%s9381_s28 + $0x1e0] sm:$0xff] }
 0x14b   : > { %7928 = vmatprep.subr.bf16.mxu0 %v7927_v54  ;;  %7954 = vmatpush3.bf16.msra.mxu1 %v7951_v49  ;;  %v663_v49 = vld [vmem:[%s9381_s28 + $0x168] sm:$0xff] }
 0x14c   : > { %7956 = vmatprep.subr.bf16.mxu1 %v7955_v59  ;;  %6502 = vmatmul.mubr.f32.gmra.mrb[12].mxu1 %v647_v1  ;;  %v1803_v1 = vld [vmem:[#allocation8 + $0x28] sm:$0xff] }
 0x14d   : > { %6449 = vmatmul.mubr.f32.gmra.mrb[14].mxu0 %v633_v60  ;;  %6504 = vmatprep.mubr.f32.mxu1 %v648_v4  ;;  %v1805_v4 = vld [vmem:[#allocation8 + $0x38] sm:$0xff] }
 0x14e   : > { %7930 = vmatpush3.bf16.msra.mxu0 %v7927_v54  ;;  %6539 = vmatprep.mubr.f32.mxu0 %v650_v63  ;;  %v665_v54 = vld [vmem:[%s9381_s28 + $0x178] sm:$0xff]  ;;  %v7999_v63 = vpack.c.bf16 %v1801_v62, %v1800_v61 }
 0x14f   : > { %7964 = vmatprep.subr.bf16.mxu0 %v7963_v0  ;;  %7958 = vmatpush3.bf16.msra.mxu1 %v7955_v59  ;;  %v1799_v59 = vld [vmem:[#allocation8 + $0x8] sm:$0xff] }
 0x150   : > { %7960 = vmatprep.subr.bf16.mxu1 %v7959_v5  ;;  %6505 = vmatmul.mubr.f32.gmra.mrb[14].mxu1 %v649_v10  ;;  %v7995_v60 = vpack.c.bf16 %v1799_v59, %v1798_v58  ;;  %v1808_v10 = vld [vmem:[#allocation8 + $0x50] sm:$0xff] }
 0x151   : > { %6540 = vmatmul.mubr.f32.vlgmr.msra.gmra.mrb[16].mxu0 %v651_v6  ;;  %6595 = vmatprep.mubr.f32.mxu1 %v666_v13  ;;  %v1806_v6 = vld [vmem:[#allocation8 + $0x40] sm:$0xff]  ;;  %v8015_v12 = vpack.c.bf16 %v1809_v11, %v1808_v10 }
 0x152   : > { %6542 = vmatprep.mubr.f32.mxu0 %v652_v7  ;;  %7966 = vmatpush3.bf16.msra.mxu0 %v7963_v0  ;;  %v1802_v0 = vld [vmem:[#allocation8 + $0x20] sm:$0xff]  ;;  %v1807_v7 = vld [vmem:[#allocation8 + $0x48] sm:$0xff] }
 0x153   : > { %7968 = vmatprep.subr.bf16.mxu0 %v7967_v8  ;;  %7962 = vmatpush3.bf16.msra.mxu1 %v7959_v5  ;;  %v8003_v2 = vpack.c.bf16 %v1803_v1, %v1802_v0  ;;  %v8007_v5 = vpack.c.bf16 %v1805_v4, %v1804_v3  ;;  %v1810_v13 = vld [vmem:[#allocation8 + $0x60] sm:$0xff] }
 0x154   : > { %7996 = vmatprep.subr.bf16.mxu1 %v7995_v60 }
 0x155   : > { %6543 = vmatmul.mubr.f32.gmra.mrb[18].mxu0 %v653_v14  ;;  %v1811_v14 = vld [vmem:[#allocation8 + $0x68] sm:$0xff] }
 0x156   : > { %6545 = vmatprep.mubr.f32.mxu0 %v654_v15  ;;  %7970 = vmatpush3.bf16.msra.mxu0 %v7967_v8  ;;  %v8011_v8 = vpack.c.bf16 %v1807_v7, %v1806_v6  ;;  %v8019_v15 = vpack.c.bf16 %v1811_v14, %v1810_v13 }
 0x157   : > { %6596 = vmatmul.mubr.f32.vlgmr.msra.gmra.mrb[16].mxu1 %v667_v17  ;;  %7972 = vmatprep.subr.bf16.mxu0 %v7971_v16 }
 0x158   : > { %6598 = vmatprep.mubr.f32.mxu1 %v668_v20  ;;  %7998 = vmatpush3.bf16.msra.mxu1 %v7995_v60 }
 0x159   : > { %6546 = vmatmul.mubr.f32.gmra.mrb[20].mxu0 %v655_v21  ;;  %8000 = vmatprep.subr.bf16.mxu1 %v7999_v63 }
 0x15a   : > { %6548 = vmatprep.mubr.f32.mxu0 %v656_v22  ;;  %7974 = vmatpush3.bf16.msra.mxu0 %v7971_v16 }
 0x15b   : > { %6599 = vmatmul.mubr.f32.gmra.mrb[18].mxu1 %v669_v24  ;;  %7976 = vmatprep.subr.bf16.mxu0 %v7975_v23 }
 0x15c   : > { %6601 = vmatprep.mubr.f32.mxu1 %v670_v27  ;;  %8002 = vmatpush3.bf16.msra.mxu1 %v7999_v63 }
 0x15d   : > { %6549 = vmatmul.mubr.f32.gmra.mrb[22].mxu0 %v657_v28  ;;  %8004 = vmatprep.subr.bf16.mxu1 %v8003_v2 }
 0x15e   : > { %6551 = vmatprep.mubr.f32.mxu0 %v658_v29  ;;  %7978 = vmatpush3.bf16.msra.mxu0 %v7975_v23 }
 0x15f   : > { %6602 = vmatmul.mubr.f32.gmra.mrb[20].mxu1 %v671_v31  ;;  %7980 = vmatprep.subr.bf16.mxu0 %v7979_v30 }
 0x160   : > { %6604 = vmatprep.mubr.f32.mxu1 %v672_v34  ;;  %8006 = vmatpush3.bf16.msra.mxu1 %v8003_v2 }
 0x161   : > { %6552 = vmatmul.mubr.f32.gmra.mrb[24].mxu0 %v659_v35  ;;  %8008 = vmatprep.subr.bf16.mxu1 %v8007_v5 }
 0x162   : > { %6554 = vmatprep.mubr.f32.mxu0 %v660_v36  ;;  %7982 = vmatpush3.bf16.msra.mxu0 %v7979_v30 }
 0x163   : > { %6605 = vmatmul.mubr.f32.gmra.mrb[22].mxu1 %v673_v38  ;;  %7984 = vmatprep.subr.bf16.mxu0 %v7983_v37 }
 0x164   : > { %6607 = vmatprep.mubr.f32.mxu1 %v674_v41  ;;  %8010 = vmatpush3.bf16.msra.mxu1 %v8007_v5 }
 0x165   : > { %6555 = vmatmul.mubr.f32.gmra.mrb[26].mxu0 %v661_v42  ;;  %8012 = vmatprep.subr.bf16.mxu1 %v8011_v8 }
 0x166   : > { %6557 = vmatprep.mubr.f32.mxu0 %v662_v43  ;;  %7986 = vmatpush3.bf16.msra.mxu0 %v7983_v37 }
 0x167   : > { %6608 = vmatmul.mubr.f32.gmra.mrb[24].mxu1 %v675_v45  ;;  %7988 = vmatprep.subr.bf16.mxu0 %v7987_v44 }
 0x168   : > { %6610 = vmatprep.mubr.f32.mxu1 %v676_v48  ;;  %8014 = vmatpush3.bf16.msra.mxu1 %v8011_v8 }
 0x169   : > { %6558 = vmatmul.mubr.f32.gmra.mrb[28].mxu0 %v663_v49  ;;  %8016 = vmatprep.subr.bf16.mxu1 %v8015_v12 }
 0x16a   : > { %6560 = vmatprep.mubr.f32.mxu0 %v664_v50  ;;  %7990 = vmatpush3.bf16.msra.mxu0 %v7987_v44 }
 0x16b   : > { %6611 = vmatmul.mubr.f32.gmra.mrb[26].mxu1 %v677_v52  ;;  %7992 = vmatprep.subr.bf16.mxu0 %v7991_v51 }
 0x16c   : > { %6613 = vmatprep.mubr.f32.mxu1 %v678_v53  ;;  %8018 = vmatpush3.bf16.msra.mxu1 %v8015_v12 }
 0x16d   : > { %6561 = vmatmul.mubr.f32.gmra.mrb[30].mxu0 %v665_v54  ;;  %8020 = vmatprep.subr.bf16.mxu1 %v8019_v15 }
 0x16e   : > { %7994 = vmatpush3.bf16.msra.mxu0 %v7991_v51 }
 0x16f   : > { %6614 = vmatmul.mubr.f32.gmra.mrb[28].mxu1 %v679_v55 }
 0x170   : > { %6616 = vmatprep.mubr.f32.mxu1 %v680_v56  ;;  %8022 = vmatpush3.bf16.msra.mxu1 %v8019_v15 }
 0x173   : > { %6617 = vmatmul.mubr.f32.gmra.mrb[30].mxu1 %v681_v57 }
 0x204   : > { %v6429_v16 = vpop.f32.mrb[0].mxu0 }
 0x205   : > { %v812_v17 = vpop.f32.mrb[1].mxu0 }
 0x206   : > { %6651 = vmatprep.mubr.f32.mxu0 %v812_v17  ;;  %v1812_v17 = vld [vmem:[#allocation8 + $0x70] sm:$0xff] }
 0x207   : > { %6652 = vmatmul.mubr.f32.vlgmr.msra.gmra.mrb[32].mxu0 %v6429_v16  ;;  %v6485_v20 = vpop.f32.mrb[0].mxu1 }
 0x208   : > { %v6432_v18 = vpop.f32.mrb[2].mxu0  ;;  %v957_v21 = vpop.f32.mrb[1].mxu1 }
 0x209   : > { %v822_v19 = vpop.f32.mrb[3].mxu0 }
 0x20a   : > { %6654 = vmatprep.mubr.f32.mxu0 %v822_v19 }
 0x20b   : > { %6655 = vmatmul.mubr.f32.gmra.mrb[34].mxu0 %v6432_v18  ;;  %v6488_v24 = vpop.f32.mrb[2].mxu1  ;;  %v1813_v18 = vld [vmem:[#allocation8 + $0x78] sm:$0xff] }
 0x20c   : > { %v6435_v22 = vpop.f32.mrb[4].mxu0  ;;  %v967_v25 = vpop.f32.mrb[3].mxu1  ;;  %v8023_v19 = vpack.c.bf16 %v1813_v18, %v1812_v17 }
 0x20d   : > { %v832_v23 = vpop.f32.mrb[5].mxu0 }
 0x20e   : > { %6657 = vmatprep.mubr.f32.mxu0 %v832_v23  ;;  %8024 = vmatprep.subr.bf16.mxu1 %v8023_v19 }
 0x20f   : > { %6658 = vmatmul.mubr.f32.gmra.mrb[36].mxu0 %v6435_v22  ;;  %v6491_v28 = vpop.f32.mrb[4].mxu1  ;;  %8026 = vmatpush3.bf16.msra.mxu1 %v8023_v19 }
 0x210   : > { %v6438_v26 = vpop.f32.mrb[6].mxu0  ;;  %v977_v29 = vpop.f32.mrb[5].mxu1 }
 0x211   : > { %v842_v27 = vpop.f32.mrb[7].mxu0 }
 0x212   : > { %6660 = vmatprep.mubr.f32.mxu0 %v842_v27 }
 0x213   : > { %6661 = vmatmul.mubr.f32.gmra.mrb[38].mxu0 %v6438_v26  ;;  %v6494_v32 = vpop.f32.mrb[6].mxu1 }
 0x214   : > { %v6441_v30 = vpop.f32.mrb[8].mxu0  ;;  %v987_v33 = vpop.f32.mrb[7].mxu1 }
 0x215   : > { %v852_v31 = vpop.f32.mrb[9].mxu0 }
 0x216   : > { %6663 = vmatprep.mubr.f32.mxu0 %v852_v31 }
 0x217   : > { %6664 = vmatmul.mubr.f32.gmra.mrb[40].mxu0 %v6441_v30  ;;  %v6497_v36 = vpop.f32.mrb[8].mxu1 }
 0x218   : > { %v6444_v34 = vpop.f32.mrb[10].mxu0  ;;  %v997_v37 = vpop.f32.mrb[9].mxu1 }
 0x219   : > { %v862_v35 = vpop.f32.mrb[11].mxu0 }
 0x21a   : > { %6666 = vmatprep.mubr.f32.mxu0 %v862_v35 }
 0x21b   : > { %6667 = vmatmul.mubr.f32.gmra.mrb[42].mxu0 %v6444_v34  ;;  %v6500_v40 = vpop.f32.mrb[10].mxu1 }
 0x21c   : > { %v6447_v38 = vpop.f32.mrb[12].mxu0  ;;  %v1007_v41 = vpop.f32.mrb[11].mxu1 }
 0x21d   : > { %v872_v39 = vpop.f32.mrb[13].mxu0 }
 0x21e   : > { %6669 = vmatprep.mubr.f32.mxu0 %v872_v39 }
 0x21f   : > { %6670 = vmatmul.mubr.f32.gmra.mrb[44].mxu0 %v6447_v38  ;;  %v6503_v44 = vpop.f32.mrb[12].mxu1 }
 0x220   : > { %v6450_v42 = vpop.f32.mrb[14].mxu0  ;;  %v1017_v45 = vpop.f32.mrb[13].mxu1 }
 0x221   : > { %v882_v43 = vpop.f32.mrb[15].mxu0 }
 0x222   : > { %6672 = vmatprep.mubr.f32.mxu0 %v882_v43 }
 0x223   : > { %6673 = vmatmul.mubr.f32.gmra.mrb[46].mxu0 %v6450_v42  ;;  %v6506_v48 = vpop.f32.mrb[14].mxu1 }
 0x224   : > { %6675 = vmatprep.mubr.f32.mxu0 %v957_v21  ;;  %v6541_v46 = vpop.f32.mrb[16].mxu0  ;;  %v1027_v49 = vpop.f32.mrb[15].mxu1 }
 0x225   : > { %v1102_v47 = vpop.f32.mrb[17].mxu0 }
 0x227   : > { %6676 = vmatmul.mubr.f32.gmra.mrb[48].mxu0 %v6485_v20  ;;  %v9546_v20 = vld [vmem:[%s10205_s3] ss:$0 sm:$0xff] }
 0x228   : > { %6678 = vmatprep.mubr.f32.mxu0 %v967_v25  ;;  %v6544_v50 = vpop.f32.mrb[18].mxu0 }
 0x229   : > { %v1112_v51 = vpop.f32.mrb[19].mxu0 }
 0x22a   : > { %v6597_v52 = vpop.f32.mrb[16].mxu1 }
 0x22b   : > { %6679 = vmatmul.mubr.f32.gmra.mrb[50].mxu0 %v6488_v24  ;;  %v1247_v53 = vpop.f32.mrb[17].mxu1 }
 0x22c   : > { %6681 = vmatprep.mubr.f32.mxu0 %v977_v29  ;;  %v6547_v54 = vpop.f32.mrb[20].mxu0 }
 0x22d   : > { %v1122_v55 = vpop.f32.mrb[21].mxu0 }
 0x22e   : > { %v6600_v56 = vpop.f32.mrb[18].mxu1 }
 0x22f   : > { %6682 = vmatmul.mubr.f32.gmra.mrb[52].mxu0 %v6491_v28  ;;  %v1257_v57 = vpop.f32.mrb[19].mxu1 }
 0x230   : > { %6684 = vmatprep.mubr.f32.mxu0 %v987_v33  ;;  %v6550_v58 = vpop.f32.mrb[22].mxu0 }
 0x231   : > { %v1132_v59 = vpop.f32.mrb[23].mxu0 }
 0x232   : > { %v6603_v60 = vpop.f32.mrb[20].mxu1 }
 0x233   : > { %6685 = vmatmul.mubr.f32.gmra.mrb[54].mxu0 %v6494_v32  ;;  %v1267_v61 = vpop.f32.mrb[21].mxu1 }
 0x234   : > { %6687 = vmatprep.mubr.f32.mxu0 %v997_v37  ;;  %v6553_v62 = vpop.f32.mrb[24].mxu0 }
 0x235   : > { %v1142_v63 = vpop.f32.mrb[25].mxu0 }
 0x236   : > { %v6606_v0 = vpop.f32.mrb[22].mxu1 }
 0x237   : > { %6688 = vmatmul.mubr.f32.gmra.mrb[56].mxu0 %v6497_v36  ;;  %v1277_v1 = vpop.f32.mrb[23].mxu1 }
 0x238   : > { %6690 = vmatprep.mubr.f32.mxu0 %v1007_v41  ;;  %v6556_v2 = vpop.f32.mrb[26].mxu0 }
 0x239   : > { %v1152_v3 = vpop.f32.mrb[27].mxu0 }
 0x23a   : > { %v6609_v4 = vpop.f32.mrb[24].mxu1 }
 0x23b   : > { %6691 = vmatmul.mubr.f32.gmra.mrb[58].mxu0 %v6500_v40  ;;  %v1287_v5 = vpop.f32.mrb[25].mxu1 }
 0x23c   : > { %6693 = vmatprep.mubr.f32.mxu0 %v1017_v45  ;;  %v6559_v6 = vpop.f32.mrb[28].mxu0 }
 0x23d   : > { %v1162_v7 = vpop.f32.mrb[29].mxu0 }
 0x23e   : > { %v6612_v8 = vpop.f32.mrb[26].mxu1 }
 0x23f   : > { %6694 = vmatmul.mubr.f32.gmra.mrb[60].mxu0 %v6503_v44  ;;  %v1297_v10 = vpop.f32.mrb[27].mxu1 }
 0x240   : > { %6696 = vmatprep.mubr.f32.mxu0 %v1027_v49  ;;  %v6562_v11 = vpop.f32.mrb[30].mxu0 }
 0x241   : > { %v1172_v12 = vpop.f32.mrb[31].mxu0 }
 0x242   : > { %v6615_v13 = vpop.f32.mrb[28].mxu1 }
 0x243   : > { %6697 = vmatmul.mubr.f32.gmra.mrb[62].mxu0 %v6506_v48  ;;  %v1307_v14 = vpop.f32.mrb[29].mxu1 }
 0x244   : > { %6699 = vmatprep.mubr.f32.mxu0 %v1102_v47 }
 0x246   : > { %v6618_v15 = vpop.f32.mrb[30].mxu1 }
 0x247   : > { %6700 = vmatmul.mubr.f32.gmra.mrb[64].mxu0 %v6541_v46  ;;  %v1317_v16 = vpop.f32.mrb[31].mxu1 }
 0x248   : > { %6702 = vmatprep.mubr.f32.mxu0 %v1112_v51 }
 0x24b   : > { %6703 = vmatmul.mubr.f32.gmra.mrb[66].mxu0 %v6544_v50 }
 0x24c   : > { %6705 = vmatprep.mubr.f32.mxu0 %v1122_v55 }
 0x24f   : > { %6706 = vmatmul.mubr.f32.gmra.mrb[68].mxu0 %v6547_v54 }
 0x250   : > { %6708 = vmatprep.mubr.f32.mxu0 %v1132_v59 }
 0x253   : > { %6709 = vmatmul.mubr.f32.gmra.mrb[70].mxu0 %v6550_v58 }
 0x254   : > { %6711 = vmatprep.mubr.f32.mxu0 %v1142_v63 }
 0x257   : > { %6712 = vmatmul.mubr.f32.gmra.mrb[72].mxu0 %v6553_v62 }
 0x258   : > { %6714 = vmatprep.mubr.f32.mxu0 %v1152_v3 }
 0x25b   : > { %6715 = vmatmul.mubr.f32.gmra.mrb[74].mxu0 %v6556_v2 }
 0x25c   : > { %6717 = vmatprep.mubr.f32.mxu0 %v1162_v7 }
 0x25f   : > { %6718 = vmatmul.mubr.f32.gmra.mrb[76].mxu0 %v6559_v6 }
 0x260   : > { %6720 = vmatprep.mubr.f32.mxu0 %v1172_v12 }
 0x263   : > { %6721 = vmatmul.mubr.f32.gmra.mrb[78].mxu0 %v6562_v11 }
 0x264   : > { %6723 = vmatprep.mubr.f32.mxu0 %v1247_v53 }
 0x267   : > { %6724 = vmatmul.mubr.f32.gmra.mrb[80].mxu0 %v6597_v52 }
 0x268   : > { %6726 = vmatprep.mubr.f32.mxu0 %v1257_v57 }
 0x26b   : > { %6727 = vmatmul.mubr.f32.gmra.mrb[82].mxu0 %v6600_v56 }
 0x26c   : > { %6729 = vmatprep.mubr.f32.mxu0 %v1267_v61 }
 0x26f   : > { %6730 = vmatmul.mubr.f32.gmra.mrb[84].mxu0 %v6603_v60 }
 0x270   : > { %6732 = vmatprep.mubr.f32.mxu0 %v1277_v1 }
 0x273   : > { %6733 = vmatmul.mubr.f32.gmra.mrb[86].mxu0 %v6606_v0 }
 0x274   : > { %6735 = vmatprep.mubr.f32.mxu0 %v1287_v5 }
 0x277   : > { %6736 = vmatmul.mubr.f32.gmra.mrb[88].mxu0 %v6609_v4 }
 0x278   : > { %6738 = vmatprep.mubr.f32.mxu0 %v1297_v10 }
 0x27b   : > { %6739 = vmatmul.mubr.f32.gmra.mrb[90].mxu0 %v6612_v8 }
 0x27c   : > { %6741 = vmatprep.mubr.f32.mxu0 %v1307_v14 }
 0x27f   : > { %6742 = vmatmul.mubr.f32.gmra.mrb[92].mxu0 %v6615_v13 }
 0x280   : > { %6744 = vmatprep.mubr.f32.mxu0 %v1317_v16 }
 0x283   : > { %6745 = vmatmul.mubr.f32.gmra.mrb[94].mxu0 %v6618_v15 }
 0x284   : > { %6907 = vmatprep.mubr.f32.mxu0 %v9418_v9 }
 0x2da   : > { %v6653_v21 = vpop.f32.mrb[32].mxu0 }
 0x2db   : > { %v1421_v22 = vadd.f32 %v6653_v21, %v9546_v20  ;;  %v1415_v23 = vpop.f32.mrb[33].mxu0 }
 0x2dc   : > { %v1416_v24 = vadd.f32 %v9546_v20, %v1415_v23 }
 0x2dd   : > { %v1735_v27 = vmax.f32 %v1421_v22, 0.0 }
 0x2de   : > { %v1734_v25 = vmax.f32 %v1416_v24, 0.0  ;;  %v6656_v26 = vpop.f32.mrb[34].mxu0 }
 0x2df   : > { %v1431_v28 = vadd.f32 %v6656_v26, %v9546_v20  ;;  %v1425_v29 = vpop.f32.mrb[35].mxu0 }
 0x2e0   : > { %v1426_v30 = vadd.f32 %v9546_v20, %v1425_v29  ;;  %6779 = vmatprep.mubr.f32.mxu1 %v1734_v25 }
 0x2e1   : > { %6780 = vmatmul.mubr.f32.vlgmr.msra.gmra.mrb[32].mxu1 %v1735_v27  ;;  %v1737_v32 = vmax.f32 %v1431_v28, 0.0 }
 0x2e2   : > { %v1736_v9 = vmax.f32 %v1426_v30, 0.0  ;;  %v6659_v31 = vpop.f32.mrb[36].mxu0 }
 0x2e3   : > { %v1441_v33 = vadd.f32 %v6659_v31, %v9546_v20  ;;  %v1435_v34 = vpop.f32.mrb[37].mxu0 }
 0x2e4   : > { %v1436_v35 = vadd.f32 %v9546_v20, %v1435_v34  ;;  %6782 = vmatprep.mubr.f32.mxu1 %v1736_v9 }
 0x2e5   : > { %6783 = vmatmul.mubr.f32.gmra.mrb[34].mxu1 %v1737_v32  ;;  %v1739_v38 = vmax.f32 %v1441_v33, 0.0 }
 0x2e6   : > { %v1738_v36 = vmax.f32 %v1436_v35, 0.0  ;;  %v6662_v37 = vpop.f32.mrb[38].mxu0 }
 0x2e7   : > { %v1451_v39 = vadd.f32 %v6662_v37, %v9546_v20  ;;  %v1445_v40 = vpop.f32.mrb[39].mxu0 }
 0x2e8   : > { %v1446_v41 = vadd.f32 %v9546_v20, %v1445_v40  ;;  %6785 = vmatprep.mubr.f32.mxu1 %v1738_v36 }
 0x2e9   : > { %6786 = vmatmul.mubr.f32.gmra.mrb[36].mxu1 %v1739_v38  ;;  %v1741_v44 = vmax.f32 %v1451_v39, 0.0 }
 0x2ea   : > { %v1740_v42 = vmax.f32 %v1446_v41, 0.0  ;;  %v6665_v43 = vpop.f32.mrb[40].mxu0 }
 0x2eb   : > { %v1461_v45 = vadd.f32 %v6665_v43, %v9546_v20  ;;  %v1455_v46 = vpop.f32.mrb[41].mxu0 }
 0x2ec   : > { %v1456_v47 = vadd.f32 %v9546_v20, %v1455_v46  ;;  %6788 = vmatprep.mubr.f32.mxu1 %v1740_v42 }
 0x2ed   : > { %6789 = vmatmul.mubr.f32.gmra.mrb[38].mxu1 %v1741_v44  ;;  %v1743_v50 = vmax.f32 %v1461_v45, 0.0 }
 0x2ee   : > { %v1742_v48 = vmax.f32 %v1456_v47, 0.0  ;;  %v6668_v49 = vpop.f32.mrb[42].mxu0 }
 0x2ef   : > { %v1471_v51 = vadd.f32 %v6668_v49, %v9546_v20  ;;  %v1465_v52 = vpop.f32.mrb[43].mxu0 }
 0x2f0   : > { %v1466_v53 = vadd.f32 %v9546_v20, %v1465_v52  ;;  %6791 = vmatprep.mubr.f32.mxu1 %v1742_v48 }
 0x2f1   : > { %6792 = vmatmul.mubr.f32.gmra.mrb[40].mxu1 %v1743_v50  ;;  %v1745_v56 = vmax.f32 %v1471_v51, 0.0 }
 0x2f2   : > { %v1744_v54 = vmax.f32 %v1466_v53, 0.0  ;;  %v6671_v55 = vpop.f32.mrb[44].mxu0 }
 0x2f3   : > { %v1481_v57 = vadd.f32 %v6671_v55, %v9546_v20  ;;  %v1475_v58 = vpop.f32.mrb[45].mxu0 }
 0x2f4   : > { %v1476_v59 = vadd.f32 %v9546_v20, %v1475_v58  ;;  %6794 = vmatprep.mubr.f32.mxu1 %v1744_v54 }
 0x2f5   : > { %6795 = vmatmul.mubr.f32.gmra.mrb[42].mxu1 %v1745_v56  ;;  %v1747_v62 = vmax.f32 %v1481_v57, 0.0 }
 0x2f6   : > { %v1746_v60 = vmax.f32 %v1476_v59, 0.0  ;;  %v6674_v61 = vpop.f32.mrb[46].mxu0 }
 0x2f7   : > { %v1491_v63 = vadd.f32 %v6674_v61, %v9546_v20  ;;  %v1485_v0 = vpop.f32.mrb[47].mxu0 }
 0x2f8   : > { %v1486_v1 = vadd.f32 %v9546_v20, %v1485_v0  ;;  %6797 = vmatprep.mubr.f32.mxu1 %v1746_v60 }
 0x2f9   : > { %6798 = vmatmul.mubr.f32.gmra.mrb[44].mxu1 %v1747_v62  ;;  %v1749_v4 = vmax.f32 %v1491_v63, 0.0 }
 0x2fa   : > { %v1748_v2 = vmax.f32 %v1486_v1, 0.0  ;;  %v6677_v3 = vpop.f32.mrb[48].mxu0 }
 0x2fb   : > { %v1501_v5 = vadd.f32 %v6677_v3, %v9546_v20  ;;  %v1495_v6 = vpop.f32.mrb[49].mxu0 }
 0x2fc   : > { %v1496_v7 = vadd.f32 %v9546_v20, %v1495_v6  ;;  %6800 = vmatprep.mubr.f32.mxu1 %v1748_v2 }
 0x2fd   : > { %6801 = vmatmul.mubr.f32.gmra.mrb[46].mxu1 %v1749_v4  ;;  %v1751_v11 = vmax.f32 %v1501_v5, 0.0 }
 0x2fe   : > { %v1750_v8 = vmax.f32 %v1496_v7, 0.0  ;;  %v6680_v10 = vpop.f32.mrb[50].mxu0 }
 0x2ff   : > { %v1511_v12 = vadd.f32 %v6680_v10, %v9546_v20  ;;  %v1505_v13 = vpop.f32.mrb[51].mxu0 }
 0x300   : > { %v1506_v14 = vadd.f32 %v9546_v20, %v1505_v13  ;;  %6803 = vmatprep.mubr.f32.mxu1 %v1750_v8 }
 0x301   : > { %6804 = vmatmul.mubr.f32.gmra.mrb[48].mxu1 %v1751_v11  ;;  %v1753_v17 = vmax.f32 %v1511_v12, 0.0 }
 0x302   : > { %v1752_v15 = vmax.f32 %v1506_v14, 0.0  ;;  %v6683_v16 = vpop.f32.mrb[52].mxu0 }
 0x303   : > { %v1521_v18 = vadd.f32 %v6683_v16, %v9546_v20  ;;  %v1515_v19 = vpop.f32.mrb[53].mxu0 }
 0x304   : > { %v1516_v21 = vadd.f32 %v9546_v20, %v1515_v19  ;;  %6806 = vmatprep.mubr.f32.mxu1 %v1752_v15 }
 0x305   : > { %6807 = vmatmul.mubr.f32.gmra.mrb[50].mxu1 %v1753_v17  ;;  %v1755_v24 = vmax.f32 %v1521_v18, 0.0 }
 0x306   : > { %v1754_v22 = vmax.f32 %v1516_v21, 0.0  ;;  %v6686_v23 = vpop.f32.mrb[54].mxu0 }
 0x307   : > { %v1531_v25 = vadd.f32 %v6686_v23, %v9546_v20  ;;  %v1525_v26 = vpop.f32.mrb[55].mxu0 }
 0x308   : > { %v1526_v27 = vadd.f32 %v9546_v20, %v1525_v26  ;;  %6809 = vmatprep.mubr.f32.mxu1 %v1754_v22 }
 0x309   : > { %6810 = vmatmul.mubr.f32.gmra.mrb[52].mxu1 %v1755_v24  ;;  %v1757_v30 = vmax.f32 %v1531_v25, 0.0 }
 0x30a   : > { %v1756_v28 = vmax.f32 %v1526_v27, 0.0  ;;  %v6689_v29 = vpop.f32.mrb[56].mxu0 }
 0x30b   : > { %v1541_v9 = vadd.f32 %v6689_v29, %v9546_v20  ;;  %v1535_v31 = vpop.f32.mrb[57].mxu0 }
 0x30c   : > { %v1536_v32 = vadd.f32 %v9546_v20, %v1535_v31  ;;  %6812 = vmatprep.mubr.f32.mxu1 %v1756_v28 }
 0x30d   : > { %6813 = vmatmul.mubr.f32.gmra.mrb[54].mxu1 %v1757_v30  ;;  %v1759_v35 = vmax.f32 %v1541_v9, 0.0 }
 0x30e   : > { %v1758_v33 = vmax.f32 %v1536_v32, 0.0  ;;  %v6692_v34 = vpop.f32.mrb[58].mxu0 }
 0x30f   : > { %v1551_v36 = vadd.f32 %v6692_v34, %v9546_v20  ;;  %v1545_v37 = vpop.f32.mrb[59].mxu0 }
 0x310   : > { %v1546_v38 = vadd.f32 %v9546_v20, %v1545_v37  ;;  %6815 = vmatprep.mubr.f32.mxu1 %v1758_v33 }
 0x311   : > { %6816 = vmatmul.mubr.f32.gmra.mrb[56].mxu1 %v1759_v35  ;;  %v1761_v41 = vmax.f32 %v1551_v36, 0.0 }
 0x312   : > { %v1760_v39 = vmax.f32 %v1546_v38, 0.0  ;;  %v6695_v40 = vpop.f32.mrb[60].mxu0 }
 0x313   : > { %v1561_v42 = vadd.f32 %v6695_v40, %v9546_v20  ;;  %v1555_v43 = vpop.f32.mrb[61].mxu0 }
 0x314   : > { %v1556_v44 = vadd.f32 %v9546_v20, %v1555_v43  ;;  %6818 = vmatprep.mubr.f32.mxu1 %v1760_v39 }
 0x315   : > { %6819 = vmatmul.mubr.f32.gmra.mrb[58].mxu1 %v1761_v41  ;;  %v1763_v47 = vmax.f32 %v1561_v42, 0.0 }
 0x316   : > { %v1762_v45 = vmax.f32 %v1556_v44, 0.0  ;;  %v6698_v46 = vpop.f32.mrb[62].mxu0 }
 0x317   : > { %v1571_v48 = vadd.f32 %v6698_v46, %v9546_v20  ;;  %v1565_v49 = vpop.f32.mrb[63].mxu0 }
 0x318   : > { %v1566_v50 = vadd.f32 %v9546_v20, %v1565_v49  ;;  %6821 = vmatprep.mubr.f32.mxu1 %v1762_v45 }
 0x319   : > { %6822 = vmatmul.mubr.f32.gmra.mrb[60].mxu1 %v1763_v47  ;;  %v1765_v53 = vmax.f32 %v1571_v48, 0.0 }
 0x31a   : > { %v1764_v51 = vmax.f32 %v1566_v50, 0.0  ;;  %v6701_v52 = vpop.f32.mrb[64].mxu0 }
 0x31b   : > { %v1581_v54 = vadd.f32 %v6701_v52, %v9546_v20  ;;  %v1575_v55 = vpop.f32.mrb[65].mxu0 }
 0x31c   : > { %6824 = vmatprep.mubr.f32.mxu1 %v1764_v51  ;;  %v1576_v56 = vadd.f32 %v9546_v20, %v1575_v55 }
 0x31d   : > { %6825 = vmatmul.mubr.f32.gmra.mrb[62].mxu1 %v1765_v53  ;;  %v1767_v59 = vmax.f32 %v1581_v54, 0.0 }
 0x31e   : > { %v1766_v57 = vmax.f32 %v1576_v56, 0.0  ;;  %v6704_v58 = vpop.f32.mrb[66].mxu0 }
 0x31f   : > { %v1591_v60 = vadd.f32 %v6704_v58, %v9546_v20  ;;  %v1585_v61 = vpop.f32.mrb[67].mxu0 }
 0x320   : > { %v1586_v62 = vadd.f32 %v9546_v20, %v1585_v61  ;;  %6827 = vmatprep.mubr.f32.mxu1 %v1766_v57 }
 0x321   : > { %6828 = vmatmul.mubr.f32.gmra.mrb[64].mxu1 %v1767_v59  ;;  %v1769_v1 = vmax.f32 %v1591_v60, 0.0 }
 0x322   : > { %v1768_v63 = vmax.f32 %v1586_v62, 0.0  ;;  %v6707_v0 = vpop.f32.mrb[68].mxu0 }
 0x323   : > { %v1601_v2 = vadd.f32 %v6707_v0, %v9546_v20  ;;  %v1595_v3 = vpop.f32.mrb[69].mxu0 }
 0x324   : > { %v1596_v4 = vadd.f32 %v9546_v20, %v1595_v3  ;;  %6830 = vmatprep.mubr.f32.mxu1 %v1768_v63 }
 0x325   : > { %6831 = vmatmul.mubr.f32.gmra.mrb[66].mxu1 %v1769_v1  ;;  %v1771_v7 = vmax.f32 %v1601_v2, 0.0 }
 0x326   : > { %v1770_v5 = vmax.f32 %v1596_v4, 0.0  ;;  %v6710_v6 = vpop.f32.mrb[70].mxu0 }
 0x327   : > { %v1611_v8 = vadd.f32 %v6710_v6, %v9546_v20  ;;  %v1605_v10 = vpop.f32.mrb[71].mxu0 }
 0x328   : > { %v1606_v11 = vadd.f32 %v9546_v20, %v1605_v10  ;;  %6833 = vmatprep.mubr.f32.mxu1 %v1770_v5 }
 0x329   : > { %6834 = vmatmul.mubr.f32.gmra.mrb[68].mxu1 %v1771_v7  ;;  %v1773_v14 = vmax.f32 %v1611_v8, 0.0 }
 0x32a   : > { %v1772_v12 = vmax.f32 %v1606_v11, 0.0  ;;  %v6713_v13 = vpop.f32.mrb[72].mxu0 }
 0x32b   : > { %v1621_v15 = vadd.f32 %v6713_v13, %v9546_v20  ;;  %v1615_v16 = vpop.f32.mrb[73].mxu0 }
 0x32c   : > { %v1616_v17 = vadd.f32 %v9546_v20, %v1615_v16  ;;  %6836 = vmatprep.mubr.f32.mxu1 %v1772_v12 }
 0x32d   : > { %6837 = vmatmul.mubr.f32.gmra.mrb[70].mxu1 %v1773_v14  ;;  %v1775_v21 = vmax.f32 %v1621_v15, 0.0 }
 0x32e   : > { %v1774_v18 = vmax.f32 %v1616_v17, 0.0  ;;  %v6716_v19 = vpop.f32.mrb[74].mxu0 }
 0x32f   : > { %v1631_v22 = vadd.f32 %v6716_v19, %v9546_v20  ;;  %v1625_v23 = vpop.f32.mrb[75].mxu0 }
 0x330   : > { %v1626_v24 = vadd.f32 %v9546_v20, %v1625_v23  ;;  %6839 = vmatprep.mubr.f32.mxu1 %v1774_v18 }
 0x331   : > { %6840 = vmatmul.mubr.f32.gmra.mrb[72].mxu1 %v1775_v21  ;;  %v1777_v27 = vmax.f32 %v1631_v22, 0.0 }
 0x332   : > { %v1776_v25 = vmax.f32 %v1626_v24, 0.0  ;;  %v6719_v26 = vpop.f32.mrb[76].mxu0  ;;  %v8527_v24 = vld [vmem:[%s9381_s28 + $0x80] sm:$0xff] }
 0x333   : > { %v1641_v28 = vadd.f32 %v6719_v26, %v9546_v20  ;;  %v1635_v29 = vpop.f32.mrb[77].mxu0 }
 0x334   : > { %v1636_v30 = vadd.f32 %v9546_v20, %v1635_v29  ;;  %6842 = vmatprep.mubr.f32.mxu1 %v1776_v25  ;;  %v9616_v25 = vld [vmem:[%s10261_s8] ss:$0 sm:$0xff] }
 0x335   : > { %6843 = vmatmul.mubr.f32.gmra.mrb[74].mxu1 %v1777_v27  ;;  %v1779_v32 = vmax.f32 %v1641_v28, 0.0 }
 0x336   : > { %v1778_v9 = vmax.f32 %v1636_v30, 0.0  ;;  %v6722_v31 = vpop.f32.mrb[78].mxu0 }
 0x337   : > { %v1651_v33 = vadd.f32 %v6722_v31, %v9546_v20  ;;  %v1645_v34 = vpop.f32.mrb[79].mxu0 }
 0x338   : > { %v1646_v35 = vadd.f32 %v9546_v20, %v1645_v34  ;;  %6845 = vmatprep.mubr.f32.mxu1 %v1778_v9 }
 0x339   : > { %6846 = vmatmul.mubr.f32.gmra.mrb[76].mxu1 %v1779_v32  ;;  %v1781_v38 = vmax.f32 %v1651_v33, 0.0 }
 0x33a   : > { %v1780_v36 = vmax.f32 %v1646_v35, 0.0  ;;  %v6725_v37 = vpop.f32.mrb[80].mxu0 }
 0x33b   : > { %v1661_v39 = vadd.f32 %v6725_v37, %v9546_v20  ;;  %v1655_v40 = vpop.f32.mrb[81].mxu0 }
 0x33c   : > { %v1656_v41 = vadd.f32 %v9546_v20, %v1655_v40  ;;  %6848 = vmatprep.mubr.f32.mxu1 %v1780_v36 }
 0x33d   : > { %6849 = vmatmul.mubr.f32.gmra.mrb[78].mxu1 %v1781_v38  ;;  %v1783_v44 = vmax.f32 %v1661_v39, 0.0 }
 0x33e   : > { %v1782_v42 = vmax.f32 %v1656_v41, 0.0  ;;  %v6728_v43 = vpop.f32.mrb[82].mxu0 }
 0x33f   : > { %v1671_v45 = vadd.f32 %v6728_v43, %v9546_v20  ;;  %v1665_v46 = vpop.f32.mrb[83].mxu0 }
 0x340   : > { %v1666_v47 = vadd.f32 %v9546_v20, %v1665_v46  ;;  %6851 = vmatprep.mubr.f32.mxu1 %v1782_v42 }
 0x341   : > { %6852 = vmatmul.mubr.f32.gmra.mrb[80].mxu1 %v1783_v44  ;;  %v1785_v50 = vmax.f32 %v1671_v45, 0.0 }
 0x342   : > { %v1784_v48 = vmax.f32 %v1666_v47, 0.0  ;;  %v6731_v49 = vpop.f32.mrb[84].mxu0 }
 0x343   : > { %v1681_v51 = vadd.f32 %v6731_v49, %v9546_v20  ;;  %v1675_v52 = vpop.f32.mrb[85].mxu0 }
 0x344   : > { %v1676_v53 = vadd.f32 %v9546_v20, %v1675_v52  ;;  %6854 = vmatprep.mubr.f32.mxu1 %v1784_v48 }
 0x345   : > { %6855 = vmatmul.mubr.f32.gmra.mrb[82].mxu1 %v1785_v50  ;;  %v1787_v56 = vmax.f32 %v1681_v51, 0.0 }
 0x346   : > { %v1786_v54 = vmax.f32 %v1676_v53, 0.0  ;;  %v6734_v55 = vpop.f32.mrb[86].mxu0 }
 0x347   : > { %v1691_v57 = vadd.f32 %v6734_v55, %v9546_v20  ;;  %v1685_v58 = vpop.f32.mrb[87].mxu0 }
 0x348   : > { %v1686_v59 = vadd.f32 %v9546_v20, %v1685_v58  ;;  %6857 = vmatprep.mubr.f32.mxu1 %v1786_v54 }
 0x349   : > { %6858 = vmatmul.mubr.f32.gmra.mrb[84].mxu1 %v1787_v56  ;;  %v1789_v62 = vmax.f32 %v1691_v57, 0.0 }
 0x34a   : > { %v1788_v60 = vmax.f32 %v1686_v59, 0.0  ;;  %v6737_v61 = vpop.f32.mrb[88].mxu0 }
 0x34b   : > { %v1701_v63 = vadd.f32 %v6737_v61, %v9546_v20  ;;  %v1695_v0 = vpop.f32.mrb[89].mxu0 }
 0x34c   : > { %v1696_v1 = vadd.f32 %v9546_v20, %v1695_v0  ;;  %6860 = vmatprep.mubr.f32.mxu1 %v1788_v60 }
 0x34d   : > { %6861 = vmatmul.mubr.f32.gmra.mrb[86].mxu1 %v1789_v62  ;;  %v1791_v4 = vmax.f32 %v1701_v63, 0.0 }
 0x34e   : > { %v1790_v2 = vmax.f32 %v1696_v1, 0.0  ;;  %v6740_v3 = vpop.f32.mrb[90].mxu0 }
 0x34f   : > { %v1711_v5 = vadd.f32 %v6740_v3, %v9546_v20  ;;  %v1705_v6 = vpop.f32.mrb[91].mxu0 }
 0x350   : > { %v1706_v7 = vadd.f32 %v9546_v20, %v1705_v6  ;;  %6863 = vmatprep.mubr.f32.mxu1 %v1790_v2 }
 0x351   : > { %6864 = vmatmul.mubr.f32.gmra.mrb[88].mxu1 %v1791_v4  ;;  %v1793_v11 = vmax.f32 %v1711_v5, 0.0 }
 0x352   : > { %v1792_v8 = vmax.f32 %v1706_v7, 0.0  ;;  %v6743_v10 = vpop.f32.mrb[92].mxu0 }
 0x353   : > { %v1721_v12 = vadd.f32 %v6743_v10, %v9546_v20  ;;  %v1715_v13 = vpop.f32.mrb[93].mxu0 }
 0x354   : > { %v1716_v14 = vadd.f32 %v9546_v20, %v1715_v13  ;;  %6866 = vmatprep.mubr.f32.mxu1 %v1792_v8 }
 0x355   : > { %6867 = vmatmul.mubr.f32.gmra.mrb[90].mxu1 %v1793_v11  ;;  %v1795_v17 = vmax.f32 %v1721_v12, 0.0 }
 0x356   : > { %v1794_v15 = vmax.f32 %v1716_v14, 0.0  ;;  %v6746_v16 = vpop.f32.mrb[94].mxu0 }
 0x357   : > { %v1731_v18 = vadd.f32 %v6746_v16, %v9546_v20  ;;  %v1725_v19 = vpop.f32.mrb[95].mxu0 }
 0x358   : > { %v1726_v21 = vadd.f32 %v9546_v20, %v1725_v19  ;;  %6869 = vmatprep.mubr.f32.mxu1 %v1794_v15 }
 0x359   : > { %6870 = vmatmul.mubr.f32.gmra.mrb[92].mxu1 %v1795_v17  ;;  %v1797_v23 = vmax.f32 %v1731_v18, 0.0 }
 0x35a   : > { %v1796_v22 = vmax.f32 %v1726_v21, 0.0 }
 0x35c   : > { %6872 = vmatprep.mubr.f32.mxu1 %v1796_v22 }
 0x35d   : > { %6873 = vmatmul.mubr.f32.gmra.mrb[94].mxu1 %v1797_v23 }
 0x35e   : > { %6963 = vmatprep.mubr.f32.mxu1 %v8527_v24 }
 0x3b4   : > { %v6781_v26 = vpop.f32.mrb[32].mxu1 }
 0x3b5   : > { %v1893_v27 = vadd.f32 %v6781_v26, %v9616_v25  ;;  %v1887_v28 = vpop.f32.mrb[33].mxu1 }
 0x3b6   : > { %v1888_v29 = vadd.f32 %v9616_v25, %v1887_v28 }
 0x3b7   : > { %v2207_v20 = vmax.f32 %v1893_v27, 0.0 }
 0x3b8   : > { %v2206_v30 = vmax.f32 %v1888_v29, 0.0  ;;  %v6784_v9 = vpop.f32.mrb[34].mxu1 }
 0x3b9   : > { %v1903_v31 = vadd.f32 %v6784_v9, %v9616_v25  ;;  %v1897_v32 = vpop.f32.mrb[35].mxu1 }
 0x3ba   : > { %v8027_v33 = vpack.c.bf16 %v2207_v20, %v2206_v30  ;;  %v1898_v34 = vadd.f32 %v9616_v25, %v1897_v32 }
 0x3bb   : > { %v2209_v35 = vmax.f32 %v1903_v31, 0.0  ;;  %v8528_v31 = vld [vmem:[%s9381_s28 + $0x8] sm:$0xff] }
 0x3bc   : > { %v2208_v36 = vmax.f32 %v1898_v34, 0.0  ;;  %v6787_v37 = vpop.f32.mrb[36].mxu1  ;;  %8028 = vmatprep.subr.bf16.mxu0 %v8027_v33  ;;  %v8529_v34 = vld [vmem:[%s9381_s28 + $0x10] sm:$0xff] }
 0x3bd   : > { %v1913_v38 = vadd.f32 %v6787_v37, %v9616_v25  ;;  %v1907_v39 = vpop.f32.mrb[37].mxu1  ;;  %8030 = vmatpush3.bf16.msra.mxu0 %v8027_v33 }
 0x3be   : > { %v8031_v40 = vpack.c.bf16 %v2209_v35, %v2208_v36  ;;  %v1908_v41 = vadd.f32 %v9616_v25, %v1907_v39 }
 0x3bf   : > { %v2211_v42 = vmax.f32 %v1913_v38, 0.0 }
 0x3c0   : > { %v2210_v43 = vmax.f32 %v1908_v41, 0.0  ;;  %v6790_v44 = vpop.f32.mrb[38].mxu1  ;;  %8032 = vmatprep.subr.bf16.mxu0 %v8031_v40 }
 0x3c1   : > { %v1923_v45 = vadd.f32 %v6790_v44, %v9616_v25  ;;  %v1917_v46 = vpop.f32.mrb[39].mxu1  ;;  %8034 = vmatpush3.bf16.msra.mxu0 %v8031_v40  ;;  %v8530_v40 = vld [vmem:[%s9381_s28 + $0x18] sm:$0xff] }
 0x3c2   : > { %v8035_v47 = vpack.c.bf16 %v2211_v42, %v2210_v43  ;;  %v1918_v48 = vadd.f32 %v9616_v25, %v1917_v46  ;;  %v8531_v43 = vld [vmem:[%s9381_s28 + $0x20] sm:$0xff] }
 0x3c3   : > { %v2213_v49 = vmax.f32 %v1923_v45, 0.0 }
 0x3c4   : > { %v2212_v50 = vmax.f32 %v1918_v48, 0.0  ;;  %v6793_v51 = vpop.f32.mrb[40].mxu1  ;;  %8036 = vmatprep.subr.bf16.mxu0 %v8035_v47 }
 0x3c5   : > { %v1933_v52 = vadd.f32 %v6793_v51, %v9616_v25  ;;  %v1927_v53 = vpop.f32.mrb[41].mxu1  ;;  %8038 = vmatpush3.bf16.msra.mxu0 %v8035_v47 }
 0x3c6   : > { %v8039_v54 = vpack.c.bf16 %v2213_v49, %v2212_v50  ;;  %v1928_v55 = vadd.f32 %v9616_v25, %v1927_v53  ;;  %v8532_v49 = vld [vmem:[%s9381_s28 + $0x28] sm:$0xff] }
 0x3c7   : > { %v2215_v56 = vmax.f32 %v1933_v52, 0.0  ;;  %v8533_v52 = vld [vmem:[%s9381_s28 + $0x30] sm:$0xff] }
 0x3c8   : > { %v2214_v57 = vmax.f32 %v1928_v55, 0.0  ;;  %v6796_v58 = vpop.f32.mrb[42].mxu1  ;;  %8040 = vmatprep.subr.bf16.mxu0 %v8039_v54 }
 0x3c9   : > { %v1943_v59 = vadd.f32 %v6796_v58, %v9616_v25  ;;  %v1937_v60 = vpop.f32.mrb[43].mxu1  ;;  %8042 = vmatpush3.bf16.msra.mxu0 %v8039_v54  ;;  %v8534_v58 = vld [vmem:[%s9381_s28 + $0x38] sm:$0xff] }
 0x3ca   : > { %v8043_v61 = vpack.c.bf16 %v2215_v56, %v2214_v57  ;;  %v1938_v62 = vadd.f32 %v9616_v25, %v1937_v60 }
 0x3cb   : > { %v2217_v63 = vmax.f32 %v1943_v59, 0.0 }
 0x3cc   : > { %v2216_v0 = vmax.f32 %v1938_v62, 0.0  ;;  %v6799_v1 = vpop.f32.mrb[44].mxu1  ;;  %8044 = vmatprep.subr.bf16.mxu0 %v8043_v61 }
 0x3cd   : > { %v1953_v2 = vadd.f32 %v6799_v1, %v9616_v25  ;;  %v1947_v3 = vpop.f32.mrb[45].mxu1  ;;  %8046 = vmatpush3.bf16.msra.mxu0 %v8043_v61  ;;  %v8535_v61 = vld [vmem:[%s9381_s28 + $0x40] sm:$0xff] }
 0x3ce   : > { %v8047_v4 = vpack.c.bf16 %v2217_v63, %v2216_v0  ;;  %v1948_v5 = vadd.f32 %v9616_v25, %v1947_v3  ;;  %v8536_v3 = vld [vmem:[%s9381_s28 + $0x48] sm:$0xff] }
 0x3cf   : > { %v2219_v6 = vmax.f32 %v1953_v2, 0.0 }
 0x3d0   : > { %v2218_v7 = vmax.f32 %v1948_v5, 0.0  ;;  %v6802_v8 = vpop.f32.mrb[46].mxu1  ;;  %8048 = vmatprep.subr.bf16.mxu0 %v8047_v4 }
 0x3d1   : > { %v1963_v10 = vadd.f32 %v6802_v8, %v9616_v25  ;;  %v1957_v11 = vpop.f32.mrb[47].mxu1  ;;  %8050 = vmatpush3.bf16.msra.mxu0 %v8047_v4 }
 0x3d2   : > { %v8051_v12 = vpack.c.bf16 %v2219_v6, %v2218_v7  ;;  %v1958_v13 = vadd.f32 %v9616_v25, %v1957_v11  ;;  %v8537_v6 = vld [vmem:[%s9381_s28 + $0x50] sm:$0xff] }
 0x3d3   : > { %v2221_v14 = vmax.f32 %v1963_v10, 0.0 }
 0x3d4   : > { %v2220_v15 = vmax.f32 %v1958_v13, 0.0  ;;  %v6805_v16 = vpop.f32.mrb[48].mxu1  ;;  %8052 = vmatprep.subr.bf16.mxu0 %v8051_v12  ;;  %v8538_v13 = vld [vmem:[%s9381_s28 + $0x58] sm:$0xff] }
 0x3d5   : > { %v1973_v17 = vadd.f32 %v6805_v16, %v9616_v25  ;;  %v1967_v18 = vpop.f32.mrb[49].mxu1  ;;  %8054 = vmatpush3.bf16.msra.mxu0 %v8051_v12  ;;  %v8539_v16 = vld [vmem:[%s9381_s28 + $0x60] sm:$0xff] }
 0x3d6   : > { %v8055_v19 = vpack.c.bf16 %v2221_v14, %v2220_v15  ;;  %v1968_v21 = vadd.f32 %v9616_v25, %v1967_v18 }
 0x3d7   : > { %v2223_v22 = vmax.f32 %v1973_v17, 0.0 }
 0x3d8   : > { %v2222_v23 = vmax.f32 %v1968_v21, 0.0  ;;  %v6808_v24 = vpop.f32.mrb[50].mxu1  ;;  %8056 = vmatprep.subr.bf16.mxu0 %v8055_v19 }
 0x3d9   : > { %v1983_v26 = vadd.f32 %v6808_v24, %v9616_v25  ;;  %v1977_v27 = vpop.f32.mrb[51].mxu1  ;;  %8058 = vmatpush3.bf16.msra.mxu0 %v8055_v19  ;;  %v8541_v24 = vld [vmem:[%s9381_s28 + $0x70] sm:$0xff] }
 0x3da   : > { %v8059_v28 = vpack.c.bf16 %v2223_v22, %v2222_v23  ;;  %v1978_v29 = vadd.f32 %v9616_v25, %v1977_v27  ;;  %v8540_v22 = vld [vmem:[%s9381_s28 + $0x68] sm:$0xff] }
 0x3db   : > { %v2225_v20 = vmax.f32 %v1983_v26, 0.0 }
 0x3dc   : > { %v2224_v30 = vmax.f32 %v1978_v29, 0.0  ;;  %v6811_v9 = vpop.f32.mrb[52].mxu1  ;;  %6908 = vmatmul.mubr.f32.vlgmr.msra.gmra.mrb[96].mxu0 %v8528_v31  ;;  %8060 = vmatprep.subr.bf16.mxu1 %v8059_v28 }
 0x3dd   : > { %v1993_v32 = vadd.f32 %v6811_v9, %v9616_v25  ;;  %v1987_v33 = vpop.f32.mrb[53].mxu1  ;;  %8062 = vmatpush3.bf16.msra.mxu1 %v8059_v28  ;;  %6910 = vmatprep.mubr.f32.mxu0 %v8529_v34  ;;  %v8543_v34 = vld [vmem:[%s9381_s28 + $0x100] sm:$0xff] }
 0x3de   : > { %v8063_v35 = vpack.c.bf16 %v2225_v20, %v2224_v30  ;;  %v1988_v36 = vadd.f32 %v9616_v25, %v1987_v33  ;;  %v8542_v30 = vld [vmem:[%s9381_s28 + $0x78] sm:$0xff] }
 0x3df   : > { %v2227_v37 = vmax.f32 %v1993_v32, 0.0 }
 0x3e0   : > { %v2226_v38 = vmax.f32 %v1988_v36, 0.0  ;;  %v6814_v39 = vpop.f32.mrb[54].mxu1  ;;  %6911 = vmatmul.mubr.f32.gmra.mrb[98].mxu0 %v8530_v40  ;;  %8064 = vmatprep.subr.bf16.mxu1 %v8063_v35 }
 0x3e1   : > { %v2003_v41 = vadd.f32 %v6814_v39, %v9616_v25  ;;  %v1997_v42 = vpop.f32.mrb[55].mxu1  ;;  %8066 = vmatpush3.bf16.msra.mxu1 %v8063_v35  ;;  %6913 = vmatprep.mubr.f32.mxu0 %v8531_v43 }
 0x3e2   : > { %v8067_v44 = vpack.c.bf16 %v2227_v37, %v2226_v38  ;;  %v1998_v45 = vadd.f32 %v9616_v25, %v1997_v42  ;;  %v8544_v38 = vld [vmem:[%s9381_s28 + $0x88] sm:$0xff] }
 0x3e3   : > { %v2229_v46 = vmax.f32 %v2003_v41, 0.0  ;;  %v8545_v41 = vld [vmem:[%s9381_s28 + $0x90] sm:$0xff] }
 0x3e4   : > { %v2228_v47 = vmax.f32 %v1998_v45, 0.0  ;;  %v6817_v48 = vpop.f32.mrb[56].mxu1  ;;  %6914 = vmatmul.mubr.f32.gmra.mrb[100].mxu0 %v8532_v49  ;;  %8068 = vmatprep.subr.bf16.mxu1 %v8067_v44 }
 0x3e5   : > { %v2013_v50 = vadd.f32 %v6817_v48, %v9616_v25  ;;  %v2007_v51 = vpop.f32.mrb[57].mxu1  ;;  %8070 = vmatpush3.bf16.msra.mxu1 %v8067_v44  ;;  %6916 = vmatprep.mubr.f32.mxu0 %v8533_v52 }
 0x3e6   : > { %v8071_v53 = vpack.c.bf16 %v2229_v46, %v2228_v47  ;;  %v2008_v54 = vadd.f32 %v9616_v25, %v2007_v51  ;;  %v8546_v47 = vld [vmem:[%s9381_s28 + $0x98] sm:$0xff] }
 0x3e7   : > { %v2231_v55 = vmax.f32 %v2013_v50, 0.0  ;;  %v8547_v50 = vld [vmem:[%s9381_s28 + $0xa0] sm:$0xff] }
 0x3e8   : > { %v2230_v56 = vmax.f32 %v2008_v54, 0.0  ;;  %v6820_v57 = vpop.f32.mrb[58].mxu1  ;;  %6917 = vmatmul.mubr.f32.gmra.mrb[102].mxu0 %v8534_v58  ;;  %8072 = vmatprep.subr.bf16.mxu1 %v8071_v53 }
 0x3e9   : > { %v2023_v59 = vadd.f32 %v6820_v57, %v9616_v25  ;;  %v2017_v60 = vpop.f32.mrb[59].mxu1  ;;  %8074 = vmatpush3.bf16.msra.mxu1 %v8071_v53  ;;  %6919 = vmatprep.mubr.f32.mxu0 %v8535_v61 }
 0x3ea   : > { %v8075_v62 = vpack.c.bf16 %v2231_v55, %v2230_v56  ;;  %v2018_v63 = vadd.f32 %v9616_v25, %v2017_v60  ;;  %v8548_v56 = vld [vmem:[%s9381_s28 + $0xa8] sm:$0xff] }
 0x3eb   : > { %v2233_v0 = vmax.f32 %v2023_v59, 0.0  ;;  %v8549_v59 = vld [vmem:[%s9381_s28 + $0xb0] sm:$0xff] }
 0x3ec   : > { %v2232_v1 = vmax.f32 %v2018_v63, 0.0  ;;  %v6823_v2 = vpop.f32.mrb[60].mxu1  ;;  %6920 = vmatmul.mubr.f32.gmra.mrb[104].mxu0 %v8536_v3  ;;  %8076 = vmatprep.subr.bf16.mxu1 %v8075_v62 }
 0x3ed   : > { %v2033_v4 = vadd.f32 %v6823_v2, %v9616_v25  ;;  %v2027_v5 = vpop.f32.mrb[61].mxu1  ;;  %8078 = vmatpush3.bf16.msra.mxu1 %v8075_v62  ;;  %6922 = vmatprep.mubr.f32.mxu0 %v8537_v6 }
 0x3ee   : > { %v8079_v7 = vpack.c.bf16 %v2233_v0, %v2232_v1  ;;  %v2028_v8 = vadd.f32 %v9616_v25, %v2027_v5  ;;  %v8550_v1 = vld [vmem:[%s9381_s28 + $0xb8] sm:$0xff] }
 0x3ef   : > { %v2235_v10 = vmax.f32 %v2033_v4, 0.0  ;;  %v8551_v4 = vld [vmem:[%s9381_s28 + $0xc0] sm:$0xff] }
 0x3f0   : > { %v2234_v11 = vmax.f32 %v2028_v8, 0.0  ;;  %v6826_v12 = vpop.f32.mrb[62].mxu1  ;;  %6923 = vmatmul.mubr.f32.gmra.mrb[106].mxu0 %v8538_v13  ;;  %8080 = vmatprep.subr.bf16.mxu1 %v8079_v7 }
 0x3f1   : > { %v2043_v14 = vadd.f32 %v6826_v12, %v9616_v25  ;;  %v2037_v15 = vpop.f32.mrb[63].mxu1  ;;  %8082 = vmatpush3.bf16.msra.mxu1 %v8079_v7  ;;  %6925 = vmatprep.mubr.f32.mxu0 %v8539_v16 }
 0x3f2   : > { %v8083_v17 = vpack.c.bf16 %v2235_v10, %v2234_v11  ;;  %v2038_v18 = vadd.f32 %v9616_v25, %v2037_v15  ;;  %v8552_v11 = vld [vmem:[%s9381_s28 + $0xc8] sm:$0xff] }
 0x3f3   : > { %v2237_v19 = vmax.f32 %v2043_v14, 0.0  ;;  %v8553_v14 = vld [vmem:[%s9381_s28 + $0xd0] sm:$0xff] }
 0x3f4   : > { %v2236_v21 = vmax.f32 %v2038_v18, 0.0  ;;  %6926 = vmatmul.mubr.f32.gmra.mrb[108].mxu0 %v8540_v22  ;;  %8084 = vmatprep.subr.bf16.mxu1 %v8083_v17  ;;  %v6829_v23 = vpop.f32.mrb[64].mxu1 }
 0x3f5   : > { %8086 = vmatpush3.bf16.msra.mxu1 %v8083_v17  ;;  %6928 = vmatprep.mubr.f32.mxu0 %v8541_v24  ;;  %v2053_v26 = vadd.f32 %v6829_v23, %v9616_v25  ;;  %v2047_v27 = vpop.f32.mrb[65].mxu1  ;;  %v8555_v24 = vld [vmem:[%s9381_s28 + $0xe0] sm:$0xff] }
 0x3f6   : > { %v8087_v28 = vpack.c.bf16 %v2237_v19, %v2236_v21  ;;  %v2048_v29 = vadd.f32 %v9616_v25, %v2047_v27  ;;  %v8554_v21 = vld [vmem:[%s9381_s28 + $0xd8] sm:$0xff] }
 0x3f7   : > { %v2239_v20 = vmax.f32 %v2053_v26, 0.0 }
 0x3f8   : > { %6929 = vmatmul.mubr.f32.gmra.mrb[110].mxu0 %v8542_v30  ;;  %8088 = vmatprep.subr.bf16.mxu1 %v8087_v28  ;;  %v2238_v9 = vmax.f32 %v2048_v29, 0.0  ;;  %v6832_v31 = vpop.f32.mrb[66].mxu1  ;;  %v2850_v30 = vld [vmem:[#allocation10] sm:$0xff] }
 0x3f9   : > { %8090 = vmatpush3.bf16.msra.mxu1 %v8087_v28  ;;  %v2063_v32 = vadd.f32 %v6832_v31, %v9616_v25  ;;  %v2057_v33 = vpop.f32.mrb[67].mxu1  ;;  %7019 = vmatprep.mubr.f32.mxu0 %v8543_v34  ;;  %v8556_v31 = vld [vmem:[%s9381_s28 + $0xe8] sm:$0xff]  ;;  %v8557_v34 = vld [vmem:[%s9381_s28 + $0xf0] sm:$0xff] }
 0x3fa   : > { %v8091_v35 = vpack.c.bf16 %v2239_v20, %v2238_v9  ;;  %v2058_v36 = vadd.f32 %v9616_v25, %v2057_v33  ;;  %v2851_v9 = vld [vmem:[#allocation10 + $0x8] sm:$0xff] }
 0x3fb   : > { %v2241_v37 = vmax.f32 %v2063_v32, 0.0 }
 0x3fc   : > { %6964 = vmatmul.mubr.f32.vlgmr.msra.gmra.mrb[96].mxu1 %v8544_v38  ;;  %v2240_v39 = vmax.f32 %v2058_v36, 0.0  ;;  %v6835_v40 = vpop.f32.mrb[68].mxu1  ;;  %8092 = vmatprep.subr.bf16.mxu0 %v8091_v35 }
 0x3fd   : > { %6966 = vmatprep.mubr.f32.mxu1 %v8545_v41  ;;  %v2073_v42 = vadd.f32 %v6835_v40, %v9616_v25  ;;  %v2067_v43 = vpop.f32.mrb[69].mxu1  ;;  %8094 = vmatpush3.bf16.msra.mxu0 %v8091_v35  ;;  %v8558_v41 = vld [vmem:[%s9381_s28 + $0xf8] sm:$0xff] }
 0x3fe   : > { %v8095_v44 = vpack.c.bf16 %v2241_v37, %v2240_v39  ;;  %v2068_v45 = vadd.f32 %v9616_v25, %v2067_v43  ;;  %v8155_v39 = vpack.c.bf16 %v2851_v9, %v2850_v30  ;;  %v2860_v30 = vld [vmem:[#allocation10 + $0x50] sm:$0xff]  ;;  %v2861_v9 = vld [vmem:[#allocation10 + $0x58] sm:$0xff] }
 0x3ff   : > { %v2243_v46 = vmax.f32 %v2073_v42, 0.0 }
 0x400   : > { %6967 = vmatmul.mubr.f32.gmra.mrb[98].mxu1 %v8546_v47  ;;  %v2242_v48 = vmax.f32 %v2068_v45, 0.0  ;;  %v6838_v49 = vpop.f32.mrb[70].mxu1  ;;  %8096 = vmatprep.subr.bf16.mxu0 %v8095_v44  ;;  %v2853_v45 = vld [vmem:[#allocation10 + $0x18] sm:$0xff] }
 0x401   : > { %6969 = vmatprep.mubr.f32.mxu1 %v8547_v50  ;;  %v2083_v51 = vadd.f32 %v6838_v49, %v9616_v25  ;;  %v2077_v52 = vpop.f32.mrb[71].mxu1  ;;  %8098 = vmatpush3.bf16.msra.mxu0 %v8095_v44  ;;  %v2852_v44 = vld [vmem:[#allocation10 + $0x10] sm:$0xff] }
 0x402   : > { %v8099_v53 = vpack.c.bf16 %v2243_v46, %v2242_v48  ;;  %v2078_v54 = vadd.f32 %v9616_v25, %v2077_v52  ;;  %v8559_v48 = vld [vmem:[%s9381_s28 + $0x180] sm:$0xff]  ;;  %v8159_v52 = vpack.c.bf16 %v2853_v45, %v2852_v44  ;;  %v8569_v45 = vld [vmem:[%s9381_s28 + $0x150] sm:$0xff] }
 0x403   : > { %v2245_v55 = vmax.f32 %v2083_v51, 0.0 }
 0x404   : > { %6970 = vmatmul.mubr.f32.gmra.mrb[100].mxu1 %v8548_v56  ;;  %v2244_v57 = vmax.f32 %v2078_v54, 0.0  ;;  %v6841_v58 = vpop.f32.mrb[72].mxu1  ;;  %8100 = vmatprep.subr.bf16.mxu0 %v8099_v53  ;;  %v2854_v56 = vld [vmem:[#allocation10 + $0x20] sm:$0xff] }
 0x405   : > { %6972 = vmatprep.mubr.f32.mxu1 %v8549_v59  ;;  %v2093_v60 = vadd.f32 %v6841_v58, %v9616_v25  ;;  %v2087_v61 = vpop.f32.mrb[73].mxu1  ;;  %8102 = vmatpush3.bf16.msra.mxu0 %v8099_v53 }
 0x406   : > { %v8103_v62 = vpack.c.bf16 %v2245_v55, %v2244_v57  ;;  %v2088_v63 = vadd.f32 %v9616_v25, %v2087_v61  ;;  %v8560_v55 = vld [vmem:[%s9381_s28 + $0x108] sm:$0xff] }
 0x407   : > { %v2247_v0 = vmax.f32 %v2093_v60, 0.0  ;;  %v2855_v57 = vld [vmem:[#allocation10 + $0x28] sm:$0xff]  ;;  %v8561_v60 = vld [vmem:[%s9381_s28 + $0x110] sm:$0xff] }
 0x408   : > { %6973 = vmatmul.mubr.f32.gmra.mrb[102].mxu1 %v8550_v1  ;;  %v2246_v2 = vmax.f32 %v2088_v63, 0.0  ;;  %v6844_v3 = vpop.f32.mrb[74].mxu1  ;;  %8104 = vmatprep.subr.bf16.mxu0 %v8103_v62 }
 0x409   : > { %6975 = vmatprep.mubr.f32.mxu1 %v8551_v4  ;;  %v2103_v5 = vadd.f32 %v6844_v3, %v9616_v25  ;;  %v2097_v6 = vpop.f32.mrb[75].mxu1  ;;  %8106 = vmatpush3.bf16.msra.mxu0 %v8103_v62  ;;  %v8562_v3 = vld [vmem:[%s9381_s28 + $0x118] sm:$0xff]  ;;  %v2856_v4 = vld [vmem:[#allocation10 + $0x30] sm:$0xff] }
 0x40a   : > { %v8107_v7 = vpack.c.bf16 %v2247_v0, %v2246_v2  ;;  %v2098_v8 = vadd.f32 %v9616_v25, %v2097_v6  ;;  %v8163_v0 = vpack.c.bf16 %v2855_v57, %v2854_v56  ;;  %v8571_v57 = vld [vmem:[%s9381_s28 + $0x160] sm:$0xff] }
 0x40b   : > { %v2249_v10 = vmax.f32 %v2103_v5, 0.0  ;;  %v2857_v5 = vld [vmem:[#allocation10 + $0x38] sm:$0xff] }
 0x40c   : > { %6976 = vmatmul.mubr.f32.gmra.mrb[104].mxu1 %v8552_v11  ;;  %v2248_v12 = vmax.f32 %v2098_v8, 0.0  ;;  %v6847_v13 = vpop.f32.mrb[76].mxu1  ;;  %8108 = vmatprep.subr.bf16.mxu0 %v8107_v7  ;;  %v8563_v8 = vld [vmem:[%s9381_s28 + $0x120] sm:$0xff] }
 0x40d   : > { %6978 = vmatprep.mubr.f32.mxu1 %v8553_v14  ;;  %v2113_v15 = vadd.f32 %v6847_v13, %v9616_v25  ;;  %v2107_v16 = vpop.f32.mrb[77].mxu1  ;;  %8110 = vmatpush3.bf16.msra.mxu0 %v8107_v7  ;;  %v8167_v13 = vpack.c.bf16 %v2857_v5, %v2856_v4  ;;  %v8577_v4 = vld [vmem:[%s9381_s28 + $0x198] sm:$0xff]  ;;  %v8578_v5 = vld [vmem:[%s9381_s28 + $0x1a0] sm:$0xff] }
 0x40e   : > { %v8111_v17 = vpack.c.bf16 %v2249_v10, %v2248_v12  ;;  %v2108_v18 = vadd.f32 %v9616_v25, %v2107_v16  ;;  %v8564_v16 = vld [vmem:[%s9381_s28 + $0x128] sm:$0xff] }
 0x40f   : > { %v2251_v19 = vmax.f32 %v2113_v15, 0.0 }
 0x410   : > { %6979 = vmatmul.mubr.f32.gmra.mrb[106].mxu1 %v8554_v21  ;;  %v2250_v22 = vmax.f32 %v2108_v18, 0.0  ;;  %v6850_v23 = vpop.f32.mrb[78].mxu1  ;;  %8112 = vmatprep.subr.bf16.mxu0 %v8111_v17  ;;  %v2859_v18 = vld [vmem:[#allocation10 + $0x48] sm:$0xff] }
 0x411   : > { %6981 = vmatprep.mubr.f32.mxu1 %v8555_v24  ;;  %v2123_v26 = vadd.f32 %v6850_v23, %v9616_v25  ;;  %v2117_v27 = vpop.f32.mrb[79].mxu1  ;;  %8114 = vmatpush3.bf16.msra.mxu0 %v8111_v17  ;;  %v2858_v17 = vld [vmem:[#allocation10 + $0x40] sm:$0xff] }
 0x412   : > { %v8115_v28 = vpack.c.bf16 %v2251_v19, %v2250_v22  ;;  %v2118_v29 = vadd.f32 %v9616_v25, %v2117_v27  ;;  %v8565_v22 = vld [vmem:[%s9381_s28 + $0x130] sm:$0xff]  ;;  %v8171_v27 = vpack.c.bf16 %v2859_v18, %v2858_v17  ;;  %v8589_v17 = vld [vmem:[%s9381_s28 + $0x1f8] sm:$0xff]  ;;  %v3322_v18 = vld [vmem:[#allocation11] sm:$0xff] }
 0x413   : > { %v2253_v20 = vmax.f32 %v2123_v26, 0.0 }
 0x414   : > { %6982 = vmatmul.mubr.f32.gmra.mrb[108].mxu1 %v8556_v31  ;;  %v2252_v32 = vmax.f32 %v2118_v29, 0.0  ;;  %v6853_v33 = vpop.f32.mrb[80].mxu1  ;;  %8116 = vmatprep.subr.bf16.mxu0 %v8115_v28 }
 0x415   : > { %6984 = vmatprep.mubr.f32.mxu1 %v8557_v34  ;;  %v2133_v35 = vadd.f32 %v6853_v33, %v9616_v25  ;;  %v2127_v36 = vpop.f32.mrb[81].mxu1  ;;  %8118 = vmatpush3.bf16.msra.mxu0 %v8115_v28  ;;  %v8567_v33 = vld [vmem:[%s9381_s28 + $0x140] sm:$0xff] }
 0x416   : > { %v8119_v37 = vpack.c.bf16 %v2253_v20, %v2252_v32  ;;  %v2128_v38 = vadd.f32 %v9616_v25, %v2127_v36  ;;  %v8566_v20 = vld [vmem:[%s9381_s28 + $0x138] sm:$0xff] }
 0x417   : > { %v2255_v40 = vmax.f32 %v2133_v35, 0.0 }
 0x418   : > { %6985 = vmatmul.mubr.f32.gmra.mrb[110].mxu1 %v8558_v41  ;;  %v2254_v42 = vmax.f32 %v2128_v38, 0.0  ;;  %v6856_v43 = vpop.f32.mrb[82].mxu1  ;;  %8120 = vmatprep.subr.bf16.mxu0 %v8119_v37  ;;  %v2862_v41 = vld [vmem:[#allocation10 + $0x60] sm:$0xff] }
 0x419   : > { %v2143_v46 = vadd.f32 %v6856_v43, %v9616_v25  ;;  %v2137_v47 = vpop.f32.mrb[83].mxu1  ;;  %8122 = vmatpush3.bf16.msra.mxu0 %v8119_v37  ;;  %7075 = vmatprep.mubr.f32.mxu1 %v8559_v48  ;;  %v8175_v37 = vpack.c.bf16 %v2861_v9, %v2860_v30  ;;  %v3330_v9 = vld [vmem:[#allocation11 + $0x40] sm:$0xff] }
 0x41a   : > { %v8123_v49 = vpack.c.bf16 %v2255_v40, %v2254_v42  ;;  %v2138_v50 = vadd.f32 %v9616_v25, %v2137_v47  ;;  %8156 = vmatprep.subr.bf16.mxu0 %v8155_v39  ;;  %v8568_v40 = vld [vmem:[%s9381_s28 + $0x148] sm:$0xff] }
 0x41b   : > { %v2257_v51 = vmax.f32 %v2143_v46, 0.0  ;;  %v2863_v42 = vld [vmem:[#allocation10 + $0x68] sm:$0xff] }
 0x41c   : > { %v2256_v53 = vmax.f32 %v2138_v50, 0.0  ;;  %v6859_v54 = vpop.f32.mrb[84].mxu1  ;;  %7020 = vmatmul.mubr.f32.vlgmr.msra.gmra.mrb[112].mxu0 %v8560_v55  ;;  %8124 = vmatprep.subr.bf16.mxu1 %v8123_v49 }
 0x41d   : > { %v2153_v58 = vadd.f32 %v6859_v54, %v9616_v25  ;;  %v2147_v59 = vpop.f32.mrb[85].mxu1  ;;  %8126 = vmatpush3.bf16.msra.mxu1 %v8123_v49  ;;  %7022 = vmatprep.mubr.f32.mxu0 %v8561_v60  ;;  %v8179_v49 = vpack.c.bf16 %v2863_v42, %v2862_v41  ;;  %v2865_v54 = vld [vmem:[#allocation10 + $0x78] sm:$0xff] }
 0x41e   : > { %v8127_v61 = vpack.c.bf16 %v2257_v51, %v2256_v53  ;;  %v2148_v62 = vadd.f32 %v9616_v25, %v2147_v59  ;;  %8158 = vmatpush3.bf16.msra.mxu0 %v8155_v39  ;;  %v2864_v53 = vld [vmem:[#allocation10 + $0x70] sm:$0xff] }
 0x41f   : > { %v2259_v63 = vmax.f32 %v2153_v58, 0.0  ;;  %8160 = vmatprep.subr.bf16.mxu0 %v8159_v52 }
 0x420   : > { %v2258_v1 = vmax.f32 %v2148_v62, 0.0  ;;  %v6862_v2 = vpop.f32.mrb[86].mxu1  ;;  %7023 = vmatmul.mubr.f32.gmra.mrb[114].mxu0 %v8562_v3  ;;  %8128 = vmatprep.subr.bf16.mxu1 %v8127_v61  ;;  %v8576_v3 = vld [vmem:[%s9381_s28 + $0x190] sm:$0xff] }
 0x421   : > { %v2163_v6 = vadd.f32 %v6862_v2, %v9616_v25  ;;  %v2157_v7 = vpop.f32.mrb[87].mxu1  ;;  %8130 = vmatpush3.bf16.msra.mxu1 %v8127_v61  ;;  %7025 = vmatprep.mubr.f32.mxu0 %v8563_v8  ;;  %v8183_v61 = vpack.c.bf16 %v2865_v54, %v2864_v53  ;;  %v8575_v2 = vld [vmem:[%s9381_s28 + $0x188] sm:$0xff]  ;;  %v8581_v8 = vld [vmem:[%s9381_s28 + $0x1b8] sm:$0xff] }
 0x422   : > { %v8131_v10 = vpack.c.bf16 %v2259_v63, %v2258_v1  ;;  %v2158_v11 = vadd.f32 %v9616_v25, %v2157_v7  ;;  %8162 = vmatpush3.bf16.msra.mxu0 %v8159_v52  ;;  %v8570_v52 = vld [vmem:[%s9381_s28 + $0x158] sm:$0xff]  ;;  %v8572_v63 = vld [vmem:[%s9381_s28 + $0x168] sm:$0xff]  ;;  %v8580_v7 = vld [vmem:[%s9381_s28 + $0x1b0] sm:$0xff] }
 0x423   : > { %v2261_v12 = vmax.f32 %v2163_v6, 0.0  ;;  %8164 = vmatprep.subr.bf16.mxu0 %v8163_v0  ;;  %v8579_v6 = vld [vmem:[%s9381_s28 + $0x1a8] sm:$0xff] }
 0x424   : > { %v2260_v14 = vmax.f32 %v2158_v11, 0.0  ;;  %v6865_v15 = vpop.f32.mrb[88].mxu1  ;;  %7026 = vmatmul.mubr.f32.gmra.mrb[116].mxu0 %v8564_v16  ;;  %8132 = vmatprep.subr.bf16.mxu1 %v8131_v10  ;;  %v8583_v11 = vld [vmem:[%s9381_s28 + $0x1c8] sm:$0xff]  ;;  %v8588_v16 = vld [vmem:[%s9381_s28 + $0x1f0] sm:$0xff] }
 0x425   : > { %v2173_v19 = vadd.f32 %v6865_v15, %v9616_v25  ;;  %v2167_v21 = vpop.f32.mrb[89].mxu1  ;;  %8134 = vmatpush3.bf16.msra.mxu1 %v8131_v10  ;;  %7028 = vmatprep.mubr.f32.mxu0 %v8565_v22  ;;  %v8582_v10 = vld [vmem:[%s9381_s28 + $0x1c0] sm:$0xff]  ;;  %v8587_v15 = vld [vmem:[%s9381_s28 + $0x1e8] sm:$0xff]  ;;  %v3324_v22 = vld [vmem:[#allocation11 + $0x10] sm:$0xff] }
 0x426   : > { %v8135_v23 = vpack.c.bf16 %v2261_v12, %v2260_v14  ;;  %v2168_v24 = vadd.f32 %v9616_v25, %v2167_v21  ;;  %8166 = vmatpush3.bf16.msra.mxu0 %v8163_v0  ;;  %v8573_v0 = vld [vmem:[%s9381_s28 + $0x170] sm:$0xff]  ;;  %v8586_v14 = vld [vmem:[%s9381_s28 + $0x1e0] sm:$0xff] }
 0x427   : > { %v2263_v26 = vmax.f32 %v2173_v19, 0.0  ;;  %8168 = vmatprep.subr.bf16.mxu0 %v8167_v13  ;;  %v8584_v12 = vld [vmem:[%s9381_s28 + $0x1d0] sm:$0xff]  ;;  %v3323_v19 = vld [vmem:[#allocation11 + $0x8] sm:$0xff] }
 0x428   : > { %v2262_v28 = vmax.f32 %v2168_v24, 0.0  ;;  %v6868_v29 = vpop.f32.mrb[90].mxu1  ;;  %7029 = vmatmul.mubr.f32.gmra.mrb[118].mxu0 %v8566_v20  ;;  %8136 = vmatprep.subr.bf16.mxu1 %v8135_v23  ;;  %v8187_v21 = vpack.c.bf16 %v3323_v19, %v3322_v18  ;;  %v3329_v20 = vld [vmem:[#allocation11 + $0x38] sm:$0xff]  ;;  %v3336_v19 = vld [vmem:[#allocation11 + $0x70] sm:$0xff] }
 0x429   : > { %v2183_v31 = vadd.f32 %v6868_v29, %v9616_v25  ;;  %v2177_v32 = vpop.f32.mrb[91].mxu1  ;;  %8138 = vmatpush3.bf16.msra.mxu1 %v8135_v23  ;;  %7031 = vmatprep.mubr.f32.mxu0 %v8567_v33  ;;  %v3325_v23 = vld [vmem:[#allocation11 + $0x18] sm:$0xff]  ;;  %v3328_v29 = vld [vmem:[#allocation11 + $0x30] sm:$0xff] }
 0x42a   : > { %v8139_v34 = vpack.c.bf16 %v2263_v26, %v2262_v28  ;;  %v2178_v35 = vadd.f32 %v9616_v25, %v2177_v32  ;;  %8170 = vmatpush3.bf16.msra.mxu0 %v8167_v13  ;;  %v8585_v13 = vld [vmem:[%s9381_s28 + $0x1d8] sm:$0xff]  ;;  %v8191_v24 = vpack.c.bf16 %v3325_v23, %v3324_v22  ;;  %v3326_v26 = vld [vmem:[#allocation11 + $0x20] sm:$0xff]  ;;  %v8199_v30 = vpack.c.bf16 %v3329_v20, %v3328_v29  ;;  %v3332_v33 = vld [vmem:[#allocation11 + $0x50] sm:$0xff] }
 0x42b   : > { %v2265_v36 = vmax.f32 %v2183_v31, 0.0  ;;  %8172 = vmatprep.subr.bf16.mxu0 %v8171_v27  ;;  %v3331_v31 = vld [vmem:[#allocation11 + $0x48] sm:$0xff] }
 0x42c   : > { %v2264_v38 = vmax.f32 %v2178_v35, 0.0  ;;  %v6871_v39 = vpop.f32.mrb[92].mxu1  ;;  %7032 = vmatmul.mubr.f32.gmra.mrb[120].mxu0 %v8568_v40  ;;  %8140 = vmatprep.subr.bf16.mxu1 %v8139_v34  ;;  %v8203_v32 = vpack.c.bf16 %v3331_v31, %v3330_v9 }
 0x42d   : > { %v2193_v43 = vadd.f32 %v6871_v39, %v9616_v25  ;;  %v2187_v44 = vpop.f32.mrb[93].mxu1  ;;  %8142 = vmatpush3.bf16.msra.mxu1 %v8139_v34  ;;  %7034 = vmatprep.mubr.f32.mxu0 %v8569_v45  ;;  %v3333_v34 = vld [vmem:[#allocation11 + $0x58] sm:$0xff] }
 0x42e   : > { %v8143_v46 = vpack.c.bf16 %v2265_v36, %v2264_v38  ;;  %v2188_v47 = vadd.f32 %v9616_v25, %v2187_v44  ;;  %8174 = vmatpush3.bf16.msra.mxu0 %v8171_v27  ;;  %v3327_v27 = vld [vmem:[#allocation11 + $0x28] sm:$0xff]  ;;  %v8207_v35 = vpack.c.bf16 %v3333_v34, %v3332_v33  ;;  %v3334_v36 = vld [vmem:[#allocation11 + $0x60] sm:$0xff] }
 0x42f   : > { %v2267_v48 = vmax.f32 %v2193_v43, 0.0  ;;  %8176 = vmatprep.subr.bf16.mxu0 %v8175_v37  ;;  %v8195_v28 = vpack.c.bf16 %v3327_v27, %v3326_v26 }
 0x430   : > { %v2266_v50 = vmax.f32 %v2188_v47, 0.0  ;;  %v6874_v51 = vpop.f32.mrb[94].mxu1  ;;  %7035 = vmatmul.mubr.f32.gmra.mrb[122].mxu0 %v8570_v52  ;;  %8144 = vmatprep.subr.bf16.mxu1 %v8143_v46 }
 0x431   : > { %v2203_v55 = vadd.f32 %v6874_v51, %v9616_v25  ;;  %v2197_v56 = vpop.f32.mrb[95].mxu1  ;;  %8146 = vmatpush3.bf16.msra.mxu1 %v8143_v46  ;;  %7037 = vmatprep.mubr.f32.mxu0 %v8571_v57 }
 0x432   : > { %v8147_v58 = vpack.c.bf16 %v2267_v48, %v2266_v50  ;;  %v2198_v59 = vadd.f32 %v9616_v25, %v2197_v56  ;;  %8178 = vmatpush3.bf16.msra.mxu0 %v8175_v37  ;;  %v8574_v25 = vld [vmem:[%s9381_s28 + $0x178] sm:$0xff]  ;;  %v3335_v37 = vld [vmem:[#allocation11 + $0x68] sm:$0xff] }
 0x433   : > { %v2269_v60 = vmax.f32 %v2203_v55, 0.0  ;;  %8180 = vmatprep.subr.bf16.mxu0 %v8179_v49  ;;  %v8211_v38 = vpack.c.bf16 %v3335_v37, %v3334_v36 }
 0x434   : > { %v2268_v62 = vmax.f32 %v2198_v59, 0.0  ;;  %7038 = vmatmul.mubr.f32.gmra.mrb[124].mxu0 %v8572_v63  ;;  %8148 = vmatprep.subr.bf16.mxu1 %v8147_v58 }
 0x435   : > { %8150 = vmatpush3.bf16.msra.mxu1 %v8147_v58  ;;  %7040 = vmatprep.mubr.f32.mxu0 %v8573_v0 }
 0x436   : > { %v8151_v1 = vpack.c.bf16 %v2269_v60, %v2268_v62  ;;  %8182 = vmatpush3.bf16.msra.mxu0 %v8179_v49 }
 0x437   : > { %8184 = vmatprep.subr.bf16.mxu0 %v8183_v61 }
 0x438   : > { %7041 = vmatmul.mubr.f32.gmra.mrb[126].mxu0 %v8574_v25  ;;  %8152 = vmatprep.subr.bf16.mxu1 %v8151_v1 }
 0x439   : > { %8154 = vmatpush3.bf16.msra.mxu1 %v8151_v1 }
 0x43a   : > { %8186 = vmatpush3.bf16.msra.mxu0 %v8183_v61  ;;  %8188 = vmatprep.subr.bf16.mxu1 %v8187_v21 }
 0x43c   : > { %7076 = vmatmul.mubr.f32.vlgmr.msra.gmra.mrb[112].mxu1 %v8575_v2 }
 0x43d   : > { %7078 = vmatprep.mubr.f32.mxu1 %v8576_v3  ;;  %8190 = vmatpush3.bf16.msra.mxu1 %v8187_v21  ;;  %v3337_v21 = vld [vmem:[#allocation11 + $0x78] sm:$0xff] }
 0x43e   : > { %8192 = vmatprep.subr.bf16.mxu1 %v8191_v24  ;;  %v8215_v22 = vpack.c.bf16 %v3337_v21, %v3336_v19 }
 0x440   : > { %7079 = vmatmul.mubr.f32.gmra.mrb[114].mxu1 %v8577_v4 }
 0x441   : > { %7081 = vmatprep.mubr.f32.mxu1 %v8578_v5  ;;  %8194 = vmatpush3.bf16.msra.mxu1 %v8191_v24 }
 0x442   : > { %8196 = vmatprep.subr.bf16.mxu1 %v8195_v28 }
 0x444   : > { %7082 = vmatmul.mubr.f32.gmra.mrb[116].mxu1 %v8579_v6 }
 0x445   : > { %7084 = vmatprep.mubr.f32.mxu1 %v8580_v7  ;;  %8198 = vmatpush3.bf16.msra.mxu1 %v8195_v28 }
 0x446   : > { %8200 = vmatprep.subr.bf16.mxu1 %v8199_v30 }
 0x448   : > { %7085 = vmatmul.mubr.f32.gmra.mrb[118].mxu1 %v8581_v8 }
 0x449   : > { %7087 = vmatprep.mubr.f32.mxu1 %v8582_v10  ;;  %8202 = vmatpush3.bf16.msra.mxu1 %v8199_v30 }
 0x44a   : > { %8204 = vmatprep.subr.bf16.mxu1 %v8203_v32 }
 0x44c   : > { %7088 = vmatmul.mubr.f32.gmra.mrb[120].mxu1 %v8583_v11 }
 0x44d   : > { %7090 = vmatprep.mubr.f32.mxu1 %v8584_v12  ;;  %8206 = vmatpush3.bf16.msra.mxu1 %v8203_v32 }
 0x44e   : > { %8208 = vmatprep.subr.bf16.mxu1 %v8207_v35 }
 0x450   : > { %7091 = vmatmul.mubr.f32.gmra.mrb[122].mxu1 %v8585_v13 }
 0x451   : > { %7093 = vmatprep.mubr.f32.mxu1 %v8586_v14  ;;  %8210 = vmatpush3.bf16.msra.mxu1 %v8207_v35 }
 0x452   : > { %8212 = vmatprep.subr.bf16.mxu1 %v8211_v38 }
 0x454   : > { %7094 = vmatmul.mubr.f32.gmra.mrb[124].mxu1 %v8587_v15 }
 0x455   : > { %7096 = vmatprep.mubr.f32.mxu1 %v8588_v16  ;;  %8214 = vmatpush3.bf16.msra.mxu1 %v8211_v38 }
 0x456   : > { %8216 = vmatprep.subr.bf16.mxu1 %v8215_v22 }
 0x458   : > { %7097 = vmatmul.mubr.f32.gmra.mrb[126].mxu1 %v8589_v17 }
 0x459   : > { %8218 = vmatpush3.bf16.msra.mxu1 %v8215_v22 }
 0x4af   : > { %v6909_v39 = vpop.f32.mrb[96].mxu0 }
 0x4b0   : > { %v2336_v40 = vpop.f32.mrb[97].mxu0 }
 0x4b1   : > { %7131 = vmatprep.mubr.f32.mxu0 %v2336_v40 }
 0x4b2   : > { %7132 = vmatmul.mubr.f32.vlgmr.msra.gmra.mrb[128].mxu0 %v6909_v39 }
 0x4b3   : > { %v6912_v41 = vpop.f32.mrb[98].mxu0 }
 0x4b4   : > { %v2346_v42 = vpop.f32.mrb[99].mxu0 }
 0x4b5   : > { %7134 = vmatprep.mubr.f32.mxu0 %v2346_v42  ;;  %v8590_v42 = vld [vmem:[%s9381_s28] sm:$0xff] }
 0x4b6   : > { %7135 = vmatmul.mubr.f32.gmra.mrb[130].mxu0 %v6912_v41 }
 0x4b7   : > { %v6915_v43 = vpop.f32.mrb[100].mxu0 }
 0x4b8   : > { %v2356_v44 = vpop.f32.mrb[101].mxu0 }
 0x4b9   : > { %7137 = vmatprep.mubr.f32.mxu0 %v2356_v44 }
 0x4ba   : > { %7138 = vmatmul.mubr.f32.gmra.mrb[132].mxu0 %v6915_v43  ;;  %v9748_v43 = vld [vmem:[%s10262_s6] ss:$0 sm:$0xff]  ;;  %s8882_s6 = scalar_lea.vmem %s10155_s11, 8192 }
 0x4bb   : > { %v6918_v45 = vpop.f32.mrb[102].mxu0  ;;  %p8883_p4 = scmp.ne.s32.totalorder %s10155_s11, %s8882_s6 }
 0x4bc   : > { %v2366_v46 = vpop.f32.mrb[103].mxu0 }
 0x4bd   : > { %7140 = vmatprep.mubr.f32.mxu0 %v2366_v46  ;;  %p8884_p5 = pnand %p8883_p4, %p10267_p10 }
 0x4be   : > { %7141 = vmatmul.mubr.f32.gmra.mrb[134].mxu0 %v6918_v45 }
 0x4bf   : > { %v6921_v47 = vpop.f32.mrb[104].mxu0  ;;  %p8885_p7 = pneg %p8884_p5 }
 0x4c0   : > { %v2376_v48 = vpop.f32.mrb[105].mxu0 }
 0x4c1   : > { %7143 = vmatprep.mubr.f32.mxu0 %v2376_v48 }
 0x4c2   : > { %7144 = vmatmul.mubr.f32.gmra.mrb[136].mxu0 %v6921_v47 }
 0x4c3   : > { %v6924_v49 = vpop.f32.mrb[106].mxu0 }
 0x4c4   : > { %v2386_v50 = vpop.f32.mrb[107].mxu0 }
 0x4c5   : > { %7146 = vmatprep.mubr.f32.mxu0 %v2386_v50 }
 0x4c6   : > { %7147 = vmatmul.mubr.f32.gmra.mrb[138].mxu0 %v6924_v49 }
 0x4c7   : > { %v6927_v51 = vpop.f32.mrb[108].mxu0 }
 0x4c8   : > { %v2396_v52 = vpop.f32.mrb[109].mxu0 }
 0x4c9   : > { %7149 = vmatprep.mubr.f32.mxu0 %v2396_v52 }
 0x4ca   : > { %7150 = vmatmul.mubr.f32.gmra.mrb[140].mxu0 %v6927_v51 }
 0x4cb   : > { %v6930_v53 = vpop.f32.mrb[110].mxu0 }
 0x4cc   : > { %v2406_v54 = vpop.f32.mrb[111].mxu0 }
 0x4cd   : > { %7152 = vmatprep.mubr.f32.mxu0 %v2406_v54 }
 0x4ce   : > { %7153 = vmatmul.mubr.f32.gmra.mrb[142].mxu0 %v6930_v53 }
 0x4cf   : > { %v6965_v55 = vpop.f32.mrb[96].mxu1 }
 0x4d0   : > { %v2481_v56 = vpop.f32.mrb[97].mxu1 }
 0x4d1   : > { %7155 = vmatprep.mubr.f32.mxu0 %v2481_v56 }
 0x4d2   : > { %7156 = vmatmul.mubr.f32.gmra.mrb[144].mxu0 %v6965_v55 }
 0x4d3   : > { %v6968_v57 = vpop.f32.mrb[98].mxu1 }
 0x4d4   : > { %v2491_v58 = vpop.f32.mrb[99].mxu1 }
 0x4d5   : > { %7158 = vmatprep.mubr.f32.mxu0 %v2491_v58 }
 0x4d6   : > { %7159 = vmatmul.mubr.f32.gmra.mrb[146].mxu0 %v6968_v57 }
 0x4d7   : > { %v6971_v59 = vpop.f32.mrb[100].mxu1 }
 0x4d8   : > { %v2501_v60 = vpop.f32.mrb[101].mxu1 }
 0x4d9   : > { %7161 = vmatprep.mubr.f32.mxu0 %v2501_v60 }
 0x4da   : > { %7162 = vmatmul.mubr.f32.gmra.mrb[148].mxu0 %v6971_v59 }
 0x4db   : > { %v6974_v61 = vpop.f32.mrb[102].mxu1 }
 0x4dc   : > { %v2511_v62 = vpop.f32.mrb[103].mxu1 }
 0x4dd   : > { %7164 = vmatprep.mubr.f32.mxu0 %v2511_v62 }
 0x4de   : > { %7165 = vmatmul.mubr.f32.gmra.mrb[150].mxu0 %v6974_v61 }
 0x4df   : > { %v6977_v63 = vpop.f32.mrb[104].mxu1 }
 0x4e0   : > { %v2521_v0 = vpop.f32.mrb[105].mxu1 }
 0x4e1   : > { %7167 = vmatprep.mubr.f32.mxu0 %v2521_v0 }
 0x4e2   : > { %7168 = vmatmul.mubr.f32.gmra.mrb[152].mxu0 %v6977_v63 }
 0x4e3   : > { %v6980_v1 = vpop.f32.mrb[106].mxu1 }
 0x4e4   : > { %v2531_v25 = vpop.f32.mrb[107].mxu1 }
 0x4e5   : > { %7170 = vmatprep.mubr.f32.mxu0 %v2531_v25 }
 0x4e6   : > { %7171 = vmatmul.mubr.f32.gmra.mrb[154].mxu0 %v6980_v1 }
 0x4e7   : > { %v6983_v2 = vpop.f32.mrb[108].mxu1 }
 0x4e8   : > { %v2541_v3 = vpop.f32.mrb[109].mxu1 }
 0x4e9   : > { %7173 = vmatprep.mubr.f32.mxu0 %v2541_v3 }
 0x4ea   : > { %7174 = vmatmul.mubr.f32.gmra.mrb[156].mxu0 %v6983_v2 }
 0x4eb   : > { %v6986_v4 = vpop.f32.mrb[110].mxu1 }
 0x4ec   : > { %v2551_v5 = vpop.f32.mrb[111].mxu1 }
 0x4ed   : > { %7176 = vmatprep.mubr.f32.mxu0 %v2551_v5 }
 0x4ee   : > { %7177 = vmatmul.mubr.f32.gmra.mrb[158].mxu0 %v6986_v4 }
 0x4ef   : > { %v7021_v6 = vpop.f32.mrb[112].mxu0 }
 0x4f0   : > { %v2626_v7 = vpop.f32.mrb[113].mxu0 }
 0x4f1   : > { %7179 = vmatprep.mubr.f32.mxu0 %v2626_v7 }
 0x4f2   : > { %7180 = vmatmul.mubr.f32.gmra.mrb[160].mxu0 %v7021_v6 }
 0x4f3   : > { %v7024_v8 = vpop.f32.mrb[114].mxu0 }
 0x4f4   : > { %v2636_v10 = vpop.f32.mrb[115].mxu0 }
 0x4f5   : > { %7182 = vmatprep.mubr.f32.mxu0 %v2636_v10 }
 0x4f6   : > { %7183 = vmatmul.mubr.f32.gmra.mrb[162].mxu0 %v7024_v8 }
 0x4f7   : > { %v7027_v11 = vpop.f32.mrb[116].mxu0 }
 0x4f8   : > { %v2646_v12 = vpop.f32.mrb[117].mxu0 }
 0x4f9   : > { %7185 = vmatprep.mubr.f32.mxu0 %v2646_v12 }
 0x4fa   : > { %7186 = vmatmul.mubr.f32.gmra.mrb[164].mxu0 %v7027_v11 }
 0x4fb   : > { %v7030_v13 = vpop.f32.mrb[118].mxu0 }
 0x4fc   : > { %v2656_v14 = vpop.f32.mrb[119].mxu0 }
 0x4fd   : > { %7188 = vmatprep.mubr.f32.mxu0 %v2656_v14 }
 0x4fe   : > { %7189 = vmatmul.mubr.f32.gmra.mrb[166].mxu0 %v7030_v13 }
 0x4ff   : > { %v7033_v15 = vpop.f32.mrb[120].mxu0 }
 0x500   : > { %v2666_v16 = vpop.f32.mrb[121].mxu0 }
 0x501   : > { %7191 = vmatprep.mubr.f32.mxu0 %v2666_v16 }
 0x502   : > { %7192 = vmatmul.mubr.f32.gmra.mrb[168].mxu0 %v7033_v15 }
 0x503   : > { %v7036_v17 = vpop.f32.mrb[122].mxu0 }
 0x504   : > { %v2676_v18 = vpop.f32.mrb[123].mxu0 }
 0x505   : > { %7194 = vmatprep.mubr.f32.mxu0 %v2676_v18 }
 0x506   : > { %7195 = vmatmul.mubr.f32.gmra.mrb[170].mxu0 %v7036_v17 }
 0x507   : > { %v7039_v23 = vpop.f32.mrb[124].mxu0 }
 0x508   : > { %v2686_v24 = vpop.f32.mrb[125].mxu0 }
 0x509   : > { %7197 = vmatprep.mubr.f32.mxu0 %v2686_v24 }
 0x50a   : > { %7198 = vmatmul.mubr.f32.gmra.mrb[172].mxu0 %v7039_v23 }
 0x50b   : > { %v7042_v26 = vpop.f32.mrb[126].mxu0 }
 0x50c   : > { %v2696_v27 = vpop.f32.mrb[127].mxu0 }
 0x50d   : > { %7200 = vmatprep.mubr.f32.mxu0 %v2696_v27 }
 0x50e   : > { %7201 = vmatmul.mubr.f32.gmra.mrb[174].mxu0 %v7042_v26 }
 0x50f   : > { %v7077_v28 = vpop.f32.mrb[112].mxu1 }
 0x510   : > { %v2771_v29 = vpop.f32.mrb[113].mxu1 }
 0x511   : > { %7203 = vmatprep.mubr.f32.mxu0 %v2771_v29 }
 0x512   : > { %7204 = vmatmul.mubr.f32.gmra.mrb[176].mxu0 %v7077_v28 }
 0x513   : > { %v7080_v20 = vpop.f32.mrb[114].mxu1 }
 0x514   : > { %v2781_v30 = vpop.f32.mrb[115].mxu1 }
 0x515   : > { %7206 = vmatprep.mubr.f32.mxu0 %v2781_v30 }
 0x516   : > { %7207 = vmatmul.mubr.f32.gmra.mrb[178].mxu0 %v7080_v20 }
 0x517   : > { %v7083_v9 = vpop.f32.mrb[116].mxu1 }
 0x518   : > { %v2791_v31 = vpop.f32.mrb[117].mxu1 }
 0x519   : > { %7209 = vmatprep.mubr.f32.mxu0 %v2791_v31 }
 0x51a   : > { %7210 = vmatmul.mubr.f32.gmra.mrb[180].mxu0 %v7083_v9 }
 0x51b   : > { %v7086_v32 = vpop.f32.mrb[118].mxu1 }
 0x51c   : > { %v2801_v33 = vpop.f32.mrb[119].mxu1 }
 0x51d   : > { %7212 = vmatprep.mubr.f32.mxu0 %v2801_v33 }
 0x51e   : > { %7213 = vmatmul.mubr.f32.gmra.mrb[182].mxu0 %v7086_v32 }
 0x51f   : > { %v7089_v34 = vpop.f32.mrb[120].mxu1 }
 0x520   : > { %v2811_v35 = vpop.f32.mrb[121].mxu1 }
 0x521   : > { %7215 = vmatprep.mubr.f32.mxu0 %v2811_v35 }
 0x522   : > { %7216 = vmatmul.mubr.f32.gmra.mrb[184].mxu0 %v7089_v34 }
 0x523   : > { %v7092_v36 = vpop.f32.mrb[122].mxu1 }
 0x524   : > { %v2821_v37 = vpop.f32.mrb[123].mxu1 }
 0x525   : > { %7218 = vmatprep.mubr.f32.mxu0 %v2821_v37 }
 0x526   : > { %7219 = vmatmul.mubr.f32.gmra.mrb[186].mxu0 %v7092_v36 }
 0x527   : > { %v7095_v38 = vpop.f32.mrb[124].mxu1 }
 0x528   : > { %v2831_v39 = vpop.f32.mrb[125].mxu1 }
 0x529   : > { %7221 = vmatprep.mubr.f32.mxu0 %v2831_v39 }
 0x52a   : > { %7222 = vmatmul.mubr.f32.gmra.mrb[188].mxu0 %v7095_v38 }
 0x52b   : > { %v7098_v40 = vpop.f32.mrb[126].mxu1 }
 0x52c   : > { %v2841_v41 = vpop.f32.mrb[127].mxu1 }
 0x52d   : > { %7224 = vmatprep.mubr.f32.mxu0 %v2841_v41 }
 0x52e   : > { %7225 = vmatmul.mubr.f32.gmra.mrb[190].mxu0 %v7098_v40 }
 0x52f   : > { %7387 = vmatprep.mubr.f32.mxu0 %v8590_v42 }
 0x585   : > { %v7133_v44 = vpop.f32.mrb[128].mxu0 }
 0x586   : > { %v2945_v45 = vadd.f32 %v7133_v44, %v9748_v43  ;;  %v2939_v46 = vpop.f32.mrb[129].mxu0 }
 0x587   : > { %v2940_v47 = vadd.f32 %v9748_v43, %v2939_v46 }
 0x588   : > { %v3259_v50 = vmax.f32 %v2945_v45, 0.0 }
 0x589   : > { %v3258_v48 = vmax.f32 %v2940_v47, 0.0  ;;  %v7136_v49 = vpop.f32.mrb[130].mxu0 }
 0x58a   : > { %v2955_v51 = vadd.f32 %v7136_v49, %v9748_v43  ;;  %v2949_v52 = vpop.f32.mrb[131].mxu0 }
 0x58b   : > { %v2950_v53 = vadd.f32 %v9748_v43, %v2949_v52  ;;  %7259 = vmatprep.mubr.f32.mxu1 %v3258_v48 }
 0x58c   : > { %7260 = vmatmul.mubr.f32.vlgmr.msra.gmra.mrb[128].mxu1 %v3259_v50  ;;  %v3261_v56 = vmax.f32 %v2955_v51, 0.0 }
 0x58d   : > { %v3260_v54 = vmax.f32 %v2950_v53, 0.0  ;;  %v7139_v55 = vpop.f32.mrb[132].mxu0 }
 0x58e   : > { %v2965_v57 = vadd.f32 %v7139_v55, %v9748_v43  ;;  %v2959_v58 = vpop.f32.mrb[133].mxu0 }
 0x58f   : > { %v2960_v59 = vadd.f32 %v9748_v43, %v2959_v58  ;;  %7262 = vmatprep.mubr.f32.mxu1 %v3260_v54 }
 0x590   : > { %7263 = vmatmul.mubr.f32.gmra.mrb[130].mxu1 %v3261_v56  ;;  %v3263_v62 = vmax.f32 %v2965_v57, 0.0 }
 0x591   : > { %v3262_v60 = vmax.f32 %v2960_v59, 0.0  ;;  %v7142_v61 = vpop.f32.mrb[134].mxu0 }
 0x592   : > { %v2975_v63 = vadd.f32 %v7142_v61, %v9748_v43  ;;  %v2969_v0 = vpop.f32.mrb[135].mxu0 }
 0x593   : > { %v2970_v1 = vadd.f32 %v9748_v43, %v2969_v0  ;;  %7265 = vmatprep.mubr.f32.mxu1 %v3262_v60 }
 0x594   : > { %7266 = vmatmul.mubr.f32.gmra.mrb[132].mxu1 %v3263_v62  ;;  %v3265_v3 = vmax.f32 %v2975_v63, 0.0 }
 0x595   : > { %v3264_v25 = vmax.f32 %v2970_v1, 0.0  ;;  %v7145_v2 = vpop.f32.mrb[136].mxu0 }
 0x596   : > { %v2985_v4 = vadd.f32 %v7145_v2, %v9748_v43  ;;  %v2979_v5 = vpop.f32.mrb[137].mxu0 }
 0x597   : > { %v2980_v6 = vadd.f32 %v9748_v43, %v2979_v5  ;;  %7268 = vmatprep.mubr.f32.mxu1 %v3264_v25 }
 0x598   : > { %7269 = vmatmul.mubr.f32.gmra.mrb[134].mxu1 %v3265_v3  ;;  %v3267_v10 = vmax.f32 %v2985_v4, 0.0 }
 0x599   : > { %v3266_v7 = vmax.f32 %v2980_v6, 0.0  ;;  %v7148_v8 = vpop.f32.mrb[138].mxu0 }
 0x59a   : > { %v2995_v11 = vadd.f32 %v7148_v8, %v9748_v43  ;;  %v2989_v12 = vpop.f32.mrb[139].mxu0 }
 0x59b   : > { %v2990_v13 = vadd.f32 %v9748_v43, %v2989_v12  ;;  %7271 = vmatprep.mubr.f32.mxu1 %v3266_v7 }
 0x59c   : > { %7272 = vmatmul.mubr.f32.gmra.mrb[136].mxu1 %v3267_v10  ;;  %v3269_v16 = vmax.f32 %v2995_v11, 0.0 }
 0x59d   : > { %v3268_v14 = vmax.f32 %v2990_v13, 0.0  ;;  %v7151_v15 = vpop.f32.mrb[140].mxu0 }
 0x59e   : > { %v3005_v17 = vadd.f32 %v7151_v15, %v9748_v43  ;;  %v2999_v18 = vpop.f32.mrb[141].mxu0 }
 0x59f   : > { %v3000_v19 = vadd.f32 %v9748_v43, %v2999_v18  ;;  %7274 = vmatprep.mubr.f32.mxu1 %v3268_v14 }
 0x5a0   : > { %7275 = vmatmul.mubr.f32.gmra.mrb[138].mxu1 %v3269_v16  ;;  %v3271_v23 = vmax.f32 %v3005_v17, 0.0 }
 0x5a1   : > { %v3270_v21 = vmax.f32 %v3000_v19, 0.0  ;;  %v7154_v22 = vpop.f32.mrb[142].mxu0 }
 0x5a2   : > { %v3015_v24 = vadd.f32 %v7154_v22, %v9748_v43  ;;  %v3009_v26 = vpop.f32.mrb[143].mxu0 }
 0x5a3   : > { %v3010_v27 = vadd.f32 %v9748_v43, %v3009_v26  ;;  %7277 = vmatprep.mubr.f32.mxu1 %v3270_v21 }
 0x5a4   : > { %7278 = vmatmul.mubr.f32.gmra.mrb[140].mxu1 %v3271_v23  ;;  %v3273_v20 = vmax.f32 %v3015_v24, 0.0 }
 0x5a5   : > { %v3272_v28 = vmax.f32 %v3010_v27, 0.0  ;;  %v7157_v29 = vpop.f32.mrb[144].mxu0 }
 0x5a6   : > { %v3025_v30 = vadd.f32 %v7157_v29, %v9748_v43  ;;  %v3019_v9 = vpop.f32.mrb[145].mxu0 }
 0x5a7   : > { %v3020_v31 = vadd.f32 %v9748_v43, %v3019_v9  ;;  %7280 = vmatprep.mubr.f32.mxu1 %v3272_v28 }
 0x5a8   : > { %7281 = vmatmul.mubr.f32.gmra.mrb[142].mxu1 %v3273_v20  ;;  %v3275_v34 = vmax.f32 %v3025_v30, 0.0 }
 0x5a9   : > { %v3274_v32 = vmax.f32 %v3020_v31, 0.0  ;;  %v7160_v33 = vpop.f32.mrb[146].mxu0 }
 0x5aa   : > { %v3035_v35 = vadd.f32 %v7160_v33, %v9748_v43  ;;  %v3029_v36 = vpop.f32.mrb[147].mxu0 }
 0x5ab   : > { %7283 = vmatprep.mubr.f32.mxu1 %v3274_v32  ;;  %v3030_v37 = vadd.f32 %v9748_v43, %v3029_v36 }
 0x5ac   : > { %7284 = vmatmul.mubr.f32.gmra.mrb[144].mxu1 %v3275_v34  ;;  %v3277_v40 = vmax.f32 %v3035_v35, 0.0 }
 0x5ad   : > { %v3276_v38 = vmax.f32 %v3030_v37, 0.0  ;;  %v7163_v39 = vpop.f32.mrb[148].mxu0 }
 0x5ae   : > { %v3045_v41 = vadd.f32 %v7163_v39, %v9748_v43  ;;  %v3039_v42 = vpop.f32.mrb[149].mxu0 }
 0x5af   : > { %7286 = vmatprep.mubr.f32.mxu1 %v3276_v38  ;;  %v3040_v44 = vadd.f32 %v9748_v43, %v3039_v42 }
 0x5b0   : > { %7287 = vmatmul.mubr.f32.gmra.mrb[146].mxu1 %v3277_v40  ;;  %v3279_v47 = vmax.f32 %v3045_v41, 0.0 }
 0x5b1   : > { %v3278_v45 = vmax.f32 %v3040_v44, 0.0  ;;  %v7166_v46 = vpop.f32.mrb[150].mxu0 }
 0x5b2   : > { %v3055_v48 = vadd.f32 %v7166_v46, %v9748_v43  ;;  %v3049_v49 = vpop.f32.mrb[151].mxu0 }
 0x5b3   : > { %7289 = vmatprep.mubr.f32.mxu1 %v3278_v45  ;;  %v3050_v50 = vadd.f32 %v9748_v43, %v3049_v49 }
 0x5b4   : > { %7290 = vmatmul.mubr.f32.gmra.mrb[148].mxu1 %v3279_v47  ;;  %v3281_v53 = vmax.f32 %v3055_v48, 0.0 }
 0x5b5   : > { %v3280_v51 = vmax.f32 %v3050_v50, 0.0  ;;  %v7169_v52 = vpop.f32.mrb[152].mxu0 }
 0x5b6   : > { %v3065_v54 = vadd.f32 %v7169_v52, %v9748_v43  ;;  %v3059_v55 = vpop.f32.mrb[153].mxu0 }
 0x5b7   : > { %7292 = vmatprep.mubr.f32.mxu1 %v3280_v51  ;;  %v3060_v56 = vadd.f32 %v9748_v43, %v3059_v55 }
 0x5b8   : > { %7293 = vmatmul.mubr.f32.gmra.mrb[150].mxu1 %v3281_v53  ;;  %v3283_v59 = vmax.f32 %v3065_v54, 0.0 }
 0x5b9   : > { %v3282_v57 = vmax.f32 %v3060_v56, 0.0  ;;  %v7172_v58 = vpop.f32.mrb[154].mxu0 }
 0x5ba   : > { %v3075_v60 = vadd.f32 %v7172_v58, %v9748_v43  ;;  %v3069_v61 = vpop.f32.mrb[155].mxu0 }
 0x5bb   : > { %7295 = vmatprep.mubr.f32.mxu1 %v3282_v57  ;;  %v3070_v62 = vadd.f32 %v9748_v43, %v3069_v61 }
 0x5bc   : > { %7296 = vmatmul.mubr.f32.gmra.mrb[152].mxu1 %v3283_v59  ;;  %v3285_v1 = vmax.f32 %v3075_v60, 0.0 }
 0x5bd   : > { %v3284_v63 = vmax.f32 %v3070_v62, 0.0  ;;  %v7175_v0 = vpop.f32.mrb[156].mxu0 }
 0x5be   : > { %v3085_v25 = vadd.f32 %v7175_v0, %v9748_v43  ;;  %v3079_v2 = vpop.f32.mrb[157].mxu0 }
 0x5bf   : > { %7298 = vmatprep.mubr.f32.mxu1 %v3284_v63  ;;  %v3080_v3 = vadd.f32 %v9748_v43, %v3079_v2 }
 0x5c0   : > { %7299 = vmatmul.mubr.f32.gmra.mrb[154].mxu1 %v3285_v1  ;;  %v3287_v6 = vmax.f32 %v3085_v25, 0.0 }
 0x5c1   : > { %v3286_v4 = vmax.f32 %v3080_v3, 0.0  ;;  %v7178_v5 = vpop.f32.mrb[158].mxu0 }
 0x5c2   : > { %v3095_v7 = vadd.f32 %v7178_v5, %v9748_v43  ;;  %v3089_v8 = vpop.f32.mrb[159].mxu0 }
 0x5c3   : > { %7301 = vmatprep.mubr.f32.mxu1 %v3286_v4  ;;  %v3090_v10 = vadd.f32 %v9748_v43, %v3089_v8 }
 0x5c4   : > { %7302 = vmatmul.mubr.f32.gmra.mrb[156].mxu1 %v3287_v6  ;;  %v3289_v13 = vmax.f32 %v3095_v7, 0.0 }
 0x5c5   : > { %v3288_v11 = vmax.f32 %v3090_v10, 0.0  ;;  %v7181_v12 = vpop.f32.mrb[160].mxu0 }
 0x5c6   : > { %v3105_v14 = vadd.f32 %v7181_v12, %v9748_v43  ;;  %v3099_v15 = vpop.f32.mrb[161].mxu0 }
 0x5c7   : > { %7304 = vmatprep.mubr.f32.mxu1 %v3288_v11  ;;  %v3100_v16 = vadd.f32 %v9748_v43, %v3099_v15 }
 0x5c8   : > { %7305 = vmatmul.mubr.f32.gmra.mrb[158].mxu1 %v3289_v13  ;;  %v3291_v19 = vmax.f32 %v3105_v14, 0.0 }
 0x5c9   : > { %v3290_v17 = vmax.f32 %v3100_v16, 0.0  ;;  %v7184_v18 = vpop.f32.mrb[162].mxu0 }
 0x5ca   : > { %v3115_v21 = vadd.f32 %v7184_v18, %v9748_v43  ;;  %v3109_v22 = vpop.f32.mrb[163].mxu0 }
 0x5cb   : > { %v3110_v23 = vadd.f32 %v9748_v43, %v3109_v22  ;;  %7307 = vmatprep.mubr.f32.mxu1 %v3290_v17 }
 0x5cc   : > { %7308 = vmatmul.mubr.f32.gmra.mrb[160].mxu1 %v3291_v19  ;;  %v3293_v27 = vmax.f32 %v3115_v21, 0.0 }
 0x5cd   : > { %v3292_v24 = vmax.f32 %v3110_v23, 0.0  ;;  %v7187_v26 = vpop.f32.mrb[164].mxu0 }
 0x5ce   : > { %v3125_v28 = vadd.f32 %v7187_v26, %v9748_v43  ;;  %v3119_v29 = vpop.f32.mrb[165].mxu0 }
 0x5cf   : > { %v3120_v20 = vadd.f32 %v9748_v43, %v3119_v29  ;;  %7310 = vmatprep.mubr.f32.mxu1 %v3292_v24 }
 0x5d0   : > { %7311 = vmatmul.mubr.f32.gmra.mrb[162].mxu1 %v3293_v27  ;;  %v3295_v31 = vmax.f32 %v3125_v28, 0.0 }
 0x5d1   : > { %v3294_v30 = vmax.f32 %v3120_v20, 0.0  ;;  %v7190_v9 = vpop.f32.mrb[166].mxu0 }
 0x5d2   : > { %v3135_v32 = vadd.f32 %v7190_v9, %v9748_v43  ;;  %v3129_v33 = vpop.f32.mrb[167].mxu0 }
 0x5d3   : > { %v3130_v34 = vadd.f32 %v9748_v43, %v3129_v33  ;;  %7313 = vmatprep.mubr.f32.mxu1 %v3294_v30 }
 0x5d4   : > { %7314 = vmatmul.mubr.f32.gmra.mrb[164].mxu1 %v3295_v31  ;;  %v3297_v37 = vmax.f32 %v3135_v32, 0.0 }
 0x5d5   : > { %v3296_v35 = vmax.f32 %v3130_v34, 0.0  ;;  %v7193_v36 = vpop.f32.mrb[168].mxu0 }
 0x5d6   : > { %v3145_v38 = vadd.f32 %v7193_v36, %v9748_v43  ;;  %v3139_v39 = vpop.f32.mrb[169].mxu0 }
 0x5d7   : > { %v3140_v40 = vadd.f32 %v9748_v43, %v3139_v39  ;;  %7316 = vmatprep.mubr.f32.mxu1 %v3296_v35 }
 0x5d8   : > { %7317 = vmatmul.mubr.f32.gmra.mrb[166].mxu1 %v3297_v37  ;;  %v3299_v44 = vmax.f32 %v3145_v38, 0.0 }
 0x5d9   : > { %v3298_v41 = vmax.f32 %v3140_v40, 0.0  ;;  %v7196_v42 = vpop.f32.mrb[170].mxu0 }
 0x5da   : > { %v3155_v45 = vadd.f32 %v7196_v42, %v9748_v43  ;;  %v3149_v46 = vpop.f32.mrb[171].mxu0 }
 0x5db   : > { %v3150_v47 = vadd.f32 %v9748_v43, %v3149_v46  ;;  %7319 = vmatprep.mubr.f32.mxu1 %v3298_v41 }
 0x5dc   : > { %7320 = vmatmul.mubr.f32.gmra.mrb[168].mxu1 %v3299_v44  ;;  %v3301_v50 = vmax.f32 %v3155_v45, 0.0 }
 0x5dd   : > { %v3300_v48 = vmax.f32 %v3150_v47, 0.0  ;;  %v7199_v49 = vpop.f32.mrb[172].mxu0  ;;  %v8591_v47 = vld [vmem:[%s9381_s28 + $0x80] sm:$0xff] }
 0x5de   : > { %v3165_v51 = vadd.f32 %v7199_v49, %v9748_v43  ;;  %v3159_v52 = vpop.f32.mrb[173].mxu0 }
 0x5df   : > { %v3160_v53 = vadd.f32 %v9748_v43, %v3159_v52  ;;  %7322 = vmatprep.mubr.f32.mxu1 %v3300_v48  ;;  %v9818_v48 = vld [vmem:[%s10263_s0] ss:$0 sm:$0xff]  ;;  %s8888_s0 = scalar_lea.vmem %s8887_s25, 16384 }
 0x5e0   : > { %7323 = vmatmul.mubr.f32.gmra.mrb[170].mxu1 %v3301_v50  ;;  %v3303_v56 = vmax.f32 %v3165_v51, 0.0  ;;  %p8890_p8 = scmp.lt.s32.totalorder %s8888_s0, %s8882_s6 }
 0x5e1   : > { %v3302_v54 = vmax.f32 %v3160_v53, 0.0  ;;  %v7202_v55 = vpop.f32.mrb[174].mxu0 }
 0x5e2   : > { %v3175_v57 = vadd.f32 %v7202_v55, %v9748_v43  ;;  %v3169_v58 = vpop.f32.mrb[175].mxu0  ;;  %p8891_p11 = por %p8890_p8, %p8889_p9 }
 0x5e3   : > { %v3170_v59 = vadd.f32 %v9748_v43, %v3169_v58  ;;  %7325 = vmatprep.mubr.f32.mxu1 %v3302_v54 }
 0x5e4   : > { %7326 = vmatmul.mubr.f32.gmra.mrb[172].mxu1 %v3303_v56  ;;  %v3305_v62 = vmax.f32 %v3175_v57, 0.0  ;;  %p8892_p3 = pnand %p8891_p11, %p8885_p7 }
 0x5e5   : > { %v3304_v60 = vmax.f32 %v3170_v59, 0.0  ;;  %v7205_v61 = vpop.f32.mrb[176].mxu0 }
 0x5e6   : > { %v3185_v63 = vadd.f32 %v7205_v61, %v9748_v43  ;;  %v3179_v0 = vpop.f32.mrb[177].mxu0 }
 0x5e7   : > { %v3180_v1 = vadd.f32 %v9748_v43, %v3179_v0  ;;  %7328 = vmatprep.mubr.f32.mxu1 %v3304_v60 }
 0x5e8   : > { %7329 = vmatmul.mubr.f32.gmra.mrb[174].mxu1 %v3305_v62  ;;  %v3307_v3 = vmax.f32 %v3185_v63, 0.0 }
 0x5e9   : > { %v3306_v25 = vmax.f32 %v3180_v1, 0.0  ;;  %v7208_v2 = vpop.f32.mrb[178].mxu0 }
 0x5ea   : > { %v3195_v4 = vadd.f32 %v7208_v2, %v9748_v43  ;;  %v3189_v5 = vpop.f32.mrb[179].mxu0 }
 0x5eb   : > { %v3190_v6 = vadd.f32 %v9748_v43, %v3189_v5  ;;  %7331 = vmatprep.mubr.f32.mxu1 %v3306_v25 }
 0x5ec   : > { %7332 = vmatmul.mubr.f32.gmra.mrb[176].mxu1 %v3307_v3  ;;  %v3309_v10 = vmax.f32 %v3195_v4, 0.0 }
 0x5ed   : > { %v3308_v7 = vmax.f32 %v3190_v6, 0.0  ;;  %v7211_v8 = vpop.f32.mrb[180].mxu0 }
 0x5ee   : > { %v3205_v11 = vadd.f32 %v7211_v8, %v9748_v43  ;;  %v3199_v12 = vpop.f32.mrb[181].mxu0 }
 0x5ef   : > { %v3200_v13 = vadd.f32 %v9748_v43, %v3199_v12  ;;  %7334 = vmatprep.mubr.f32.mxu1 %v3308_v7 }
 0x5f0   : > { %7335 = vmatmul.mubr.f32.gmra.mrb[178].mxu1 %v3309_v10  ;;  %v3311_v16 = vmax.f32 %v3205_v11, 0.0 }
 0x5f1   : > { %v3310_v14 = vmax.f32 %v3200_v13, 0.0  ;;  %v7214_v15 = vpop.f32.mrb[182].mxu0 }
 0x5f2   : > { %v3215_v17 = vadd.f32 %v7214_v15, %v9748_v43  ;;  %v3209_v18 = vpop.f32.mrb[183].mxu0 }
 0x5f3   : > { %v3210_v19 = vadd.f32 %v9748_v43, %v3209_v18  ;;  %7337 = vmatprep.mubr.f32.mxu1 %v3310_v14 }
 0x5f4   : > { %7338 = vmatmul.mubr.f32.gmra.mrb[180].mxu1 %v3311_v16  ;;  %v3313_v23 = vmax.f32 %v3215_v17, 0.0 }
 0x5f5   : > { %v3312_v21 = vmax.f32 %v3210_v19, 0.0  ;;  %v7217_v22 = vpop.f32.mrb[184].mxu0 }
 0x5f6   : > { %v3225_v24 = vadd.f32 %v7217_v22, %v9748_v43  ;;  %v3219_v26 = vpop.f32.mrb[185].mxu0 }
 0x5f7   : > { %v3220_v27 = vadd.f32 %v9748_v43, %v3219_v26  ;;  %7340 = vmatprep.mubr.f32.mxu1 %v3312_v21 }
 0x5f8   : > { %7341 = vmatmul.mubr.f32.gmra.mrb[182].mxu1 %v3313_v23  ;;  %v3315_v20 = vmax.f32 %v3225_v24, 0.0 }
 0x5f9   : > { %v3314_v28 = vmax.f32 %v3220_v27, 0.0  ;;  %v7220_v29 = vpop.f32.mrb[186].mxu0 }
 0x5fa   : > { %v3235_v30 = vadd.f32 %v7220_v29, %v9748_v43  ;;  %v3229_v9 = vpop.f32.mrb[187].mxu0 }
 0x5fb   : > { %v3230_v31 = vadd.f32 %v9748_v43, %v3229_v9  ;;  %7343 = vmatprep.mubr.f32.mxu1 %v3314_v28 }
 0x5fc   : > { %7344 = vmatmul.mubr.f32.gmra.mrb[184].mxu1 %v3315_v20  ;;  %v3317_v34 = vmax.f32 %v3235_v30, 0.0 }
 0x5fd   : > { %v3316_v32 = vmax.f32 %v3230_v31, 0.0  ;;  %v7223_v33 = vpop.f32.mrb[188].mxu0 }
 0x5fe   : > { %v3245_v35 = vadd.f32 %v7223_v33, %v9748_v43  ;;  %v3239_v36 = vpop.f32.mrb[189].mxu0 }
 0x5ff   : > { %v3240_v37 = vadd.f32 %v9748_v43, %v3239_v36  ;;  %7346 = vmatprep.mubr.f32.mxu1 %v3316_v32 }
 0x600   : > { %7347 = vmatmul.mubr.f32.gmra.mrb[186].mxu1 %v3317_v34  ;;  %v3319_v40 = vmax.f32 %v3245_v35, 0.0 }
 0x601   : > { %v3318_v38 = vmax.f32 %v3240_v37, 0.0  ;;  %v7226_v39 = vpop.f32.mrb[190].mxu0 }
 0x602   : > { %v3255_v41 = vadd.f32 %v7226_v39, %v9748_v43  ;;  %v3249_v42 = vpop.f32.mrb[191].mxu0 }
 0x603   : > { %v3250_v44 = vadd.f32 %v9748_v43, %v3249_v42  ;;  %7349 = vmatprep.mubr.f32.mxu1 %v3318_v38 }
 0x604   : > { %7350 = vmatmul.mubr.f32.gmra.mrb[188].mxu1 %v3319_v40  ;;  %v3321_v46 = vmax.f32 %v3255_v41, 0.0 }
 0x605   : > { %v3320_v45 = vmax.f32 %v3250_v44, 0.0 }
 0x607   : > { %7352 = vmatprep.mubr.f32.mxu1 %v3320_v45 }
 0x608   : > { %7353 = vmatmul.mubr.f32.gmra.mrb[190].mxu1 %v3321_v46 }
 0x609   : > { %7443 = vmatprep.mubr.f32.mxu1 %v8591_v47 }
 0x65f   : > { %v7261_v49 = vpop.f32.mrb[128].mxu1 }
 0x660   : > { %v3417_v50 = vadd.f32 %v7261_v49, %v9818_v48  ;;  %v3411_v51 = vpop.f32.mrb[129].mxu1 }
 0x661   : > { %v3412_v52 = vadd.f32 %v9818_v48, %v3411_v51 }
 0x662   : > { %v3731_v43 = vmax.f32 %v3417_v50, 0.0 }
 0x663   : > { %v3730_v53 = vmax.f32 %v3412_v52, 0.0  ;;  %v7264_v54 = vpop.f32.mrb[130].mxu1 }
 0x664   : > { %v3427_v55 = vadd.f32 %v7264_v54, %v9818_v48  ;;  %v3421_v56 = vpop.f32.mrb[131].mxu1 }
 0x665   : > { %v8219_v57 = vpack.c.bf16 %v3731_v43, %v3730_v53  ;;  %v3422_v58 = vadd.f32 %v9818_v48, %v3421_v56 }
 0x666   : > { %v3733_v59 = vmax.f32 %v3427_v55, 0.0  ;;  %v8592_v55 = vld [vmem:[%s9381_s28 + $0x8] sm:$0xff] }
 0x667   : > { %v3732_v60 = vmax.f32 %v3422_v58, 0.0  ;;  %v7267_v61 = vpop.f32.mrb[132].mxu1  ;;  %8220 = vmatprep.subr.bf16.mxu0 %v8219_v57  ;;  %v8593_v58 = vld [vmem:[%s9381_s28 + $0x10] sm:$0xff] }
 0x668   : > { %v3437_v62 = vadd.f32 %v7267_v61, %v9818_v48  ;;  %v3431_v63 = vpop.f32.mrb[133].mxu1  ;;  %8222 = vmatpush3.bf16.msra.mxu0 %v8219_v57 }
 0x669   : > { %v8223_v0 = vpack.c.bf16 %v3733_v59, %v3732_v60  ;;  %v3432_v1 = vadd.f32 %v9818_v48, %v3431_v63 }
 0x66a   : > { %v3735_v25 = vmax.f32 %v3437_v62, 0.0 }
 0x66b   : > { %v3734_v2 = vmax.f32 %v3432_v1, 0.0  ;;  %v7270_v3 = vpop.f32.mrb[134].mxu1  ;;  %8224 = vmatprep.subr.bf16.mxu0 %v8223_v0 }
 0x66c   : > { %v3447_v4 = vadd.f32 %v7270_v3, %v9818_v48  ;;  %v3441_v5 = vpop.f32.mrb[135].mxu1  ;;  %8226 = vmatpush3.bf16.msra.mxu0 %v8223_v0  ;;  %v8594_v0 = vld [vmem:[%s9381_s28 + $0x18] sm:$0xff] }
 0x66d   : > { %v8227_v6 = vpack.c.bf16 %v3735_v25, %v3734_v2  ;;  %v3442_v7 = vadd.f32 %v9818_v48, %v3441_v5  ;;  %v8595_v2 = vld [vmem:[%s9381_s28 + $0x20] sm:$0xff] }
 0x66e   : > { %v3737_v8 = vmax.f32 %v3447_v4, 0.0 }
 0x66f   : > { %v3736_v10 = vmax.f32 %v3442_v7, 0.0  ;;  %v7273_v11 = vpop.f32.mrb[136].mxu1  ;;  %8228 = vmatprep.subr.bf16.mxu0 %v8227_v6 }
 0x670   : > { %v3457_v12 = vadd.f32 %v7273_v11, %v9818_v48  ;;  %v3451_v13 = vpop.f32.mrb[137].mxu1  ;;  %8230 = vmatpush3.bf16.msra.mxu0 %v8227_v6 }
 0x671   : > { %v8231_v14 = vpack.c.bf16 %v3737_v8, %v3736_v10  ;;  %v3452_v15 = vadd.f32 %v9818_v48, %v3451_v13  ;;  %v8596_v8 = vld [vmem:[%s9381_s28 + $0x28] sm:$0xff] }
 0x672   : > { %v3739_v16 = vmax.f32 %v3457_v12, 0.0  ;;  %v8597_v12 = vld [vmem:[%s9381_s28 + $0x30] sm:$0xff] }
 0x673   : > { %v3738_v17 = vmax.f32 %v3452_v15, 0.0  ;;  %v7276_v18 = vpop.f32.mrb[138].mxu1  ;;  %8232 = vmatprep.subr.bf16.mxu0 %v8231_v14 }
 0x674   : > { %v3467_v19 = vadd.f32 %v7276_v18, %v9818_v48  ;;  %v3461_v21 = vpop.f32.mrb[139].mxu1  ;;  %8234 = vmatpush3.bf16.msra.mxu0 %v8231_v14  ;;  %v8598_v18 = vld [vmem:[%s9381_s28 + $0x38] sm:$0xff] }
 0x675   : > { %v8235_v22 = vpack.c.bf16 %v3739_v16, %v3738_v17  ;;  %v3462_v23 = vadd.f32 %v9818_v48, %v3461_v21 }
 0x676   : > { %v3741_v24 = vmax.f32 %v3467_v19, 0.0 }
 0x677   : > { %v3740_v26 = vmax.f32 %v3462_v23, 0.0  ;;  %v7279_v27 = vpop.f32.mrb[140].mxu1  ;;  %8236 = vmatprep.subr.bf16.mxu0 %v8235_v22 }
 0x678   : > { %v3477_v28 = vadd.f32 %v7279_v27, %v9818_v48  ;;  %v3471_v29 = vpop.f32.mrb[141].mxu1  ;;  %8238 = vmatpush3.bf16.msra.mxu0 %v8235_v22  ;;  %v8599_v22 = vld [vmem:[%s9381_s28 + $0x40] sm:$0xff] }
 0x679   : > { %v8239_v20 = vpack.c.bf16 %v3741_v24, %v3740_v26  ;;  %v3472_v30 = vadd.f32 %v9818_v48, %v3471_v29  ;;  %v8600_v29 = vld [vmem:[%s9381_s28 + $0x48] sm:$0xff] }
 0x67a   : > { %v3743_v9 = vmax.f32 %v3477_v28, 0.0 }
 0x67b   : > { %v3742_v31 = vmax.f32 %v3472_v30, 0.0  ;;  %v7282_v32 = vpop.f32.mrb[142].mxu1  ;;  %8240 = vmatprep.subr.bf16.mxu0 %v8239_v20 }
 0x67c   : > { %v3487_v33 = vadd.f32 %v7282_v32, %v9818_v48  ;;  %v3481_v34 = vpop.f32.mrb[143].mxu1  ;;  %8242 = vmatpush3.bf16.msra.mxu0 %v8239_v20 }
 0x67d   : > { %v8243_v35 = vpack.c.bf16 %v3743_v9, %v3742_v31  ;;  %v3482_v36 = vadd.f32 %v9818_v48, %v3481_v34  ;;  %v8601_v9 = vld [vmem:[%s9381_s28 + $0x50] sm:$0xff] }
 0x67e   : > { %v3745_v37 = vmax.f32 %v3487_v33, 0.0 }
 0x67f   : > { %v3744_v38 = vmax.f32 %v3482_v36, 0.0  ;;  %v7285_v39 = vpop.f32.mrb[144].mxu1  ;;  %8244 = vmatprep.subr.bf16.mxu0 %v8243_v35  ;;  %v8602_v36 = vld [vmem:[%s9381_s28 + $0x58] sm:$0xff] }
 0x680   : > { %v3497_v40 = vadd.f32 %v7285_v39, %v9818_v48  ;;  %v3491_v41 = vpop.f32.mrb[145].mxu1  ;;  %8246 = vmatpush3.bf16.msra.mxu0 %v8243_v35  ;;  %v8603_v39 = vld [vmem:[%s9381_s28 + $0x60] sm:$0xff] }
 0x681   : > { %v8247_v42 = vpack.c.bf16 %v3745_v37, %v3744_v38  ;;  %v3492_v44 = vadd.f32 %v9818_v48, %v3491_v41 }
 0x682   : > { %v3747_v45 = vmax.f32 %v3497_v40, 0.0 }
 0x683   : > { %v3746_v46 = vmax.f32 %v3492_v44, 0.0  ;;  %8248 = vmatprep.subr.bf16.mxu0 %v8247_v42  ;;  %v7288_v47 = vpop.f32.mrb[146].mxu1 }
 0x684   : > { %8250 = vmatpush3.bf16.msra.mxu0 %v8247_v42  ;;  %v3507_v49 = vadd.f32 %v7288_v47, %v9818_v48  ;;  %v3501_v50 = vpop.f32.mrb[147].mxu1 }
 0x685   : > { %v8251_v51 = vpack.c.bf16 %v3747_v45, %v3746_v46  ;;  %v3502_v52 = vadd.f32 %v9818_v48, %v3501_v50  ;;  %v8604_v46 = vld [vmem:[%s9381_s28 + $0x68] sm:$0xff]  ;;  %v8605_v50 = vld [vmem:[%s9381_s28 + $0x70] sm:$0xff] }
 0x686   : > { %v3749_v43 = vmax.f32 %v3507_v49, 0.0 }
 0x687   : > { %8252 = vmatprep.subr.bf16.mxu1 %v8251_v51  ;;  %v3748_v53 = vmax.f32 %v3502_v52, 0.0  ;;  %v7291_v54 = vpop.f32.mrb[148].mxu1  ;;  %7388 = vmatmul.mubr.f32.vlgmr.msra.gmra.mrb[192].mxu0 %v8592_v55  ;;  %v8606_v55 = vld [vmem:[%s9381_s28 + $0x78] sm:$0xff] }
 0x688   : > { %8254 = vmatpush3.bf16.msra.mxu1 %v8251_v51  ;;  %v3517_v56 = vadd.f32 %v7291_v54, %v9818_v48  ;;  %v3511_v57 = vpop.f32.mrb[149].mxu1  ;;  %7390 = vmatprep.mubr.f32.mxu0 %v8593_v58  ;;  %v8607_v58 = vld [vmem:[%s9381_s28 + $0x100] sm:$0xff] }
 0x689   : > { %v8255_v59 = vpack.c.bf16 %v3749_v43, %v3748_v53  ;;  %v3512_v60 = vadd.f32 %v9818_v48, %v3511_v57 }
 0x68a   : > { %v3751_v61 = vmax.f32 %v3517_v56, 0.0 }
 0x68b   : > { %8256 = vmatprep.subr.bf16.mxu1 %v8255_v59  ;;  %v3750_v62 = vmax.f32 %v3512_v60, 0.0  ;;  %v7294_v63 = vpop.f32.mrb[150].mxu1  ;;  %7391 = vmatmul.mubr.f32.gmra.mrb[194].mxu0 %v8594_v0  ;;  %v8608_v0 = vld [vmem:[%s9381_s28 + $0x88] sm:$0xff] }
 0x68c   : > { %8258 = vmatpush3.bf16.msra.mxu1 %v8255_v59  ;;  %v3527_v1 = vadd.f32 %v7294_v63, %v9818_v48  ;;  %v3521_v25 = vpop.f32.mrb[151].mxu1  ;;  %7393 = vmatprep.mubr.f32.mxu0 %v8595_v2  ;;  %v8609_v2 = vld [vmem:[%s9381_s28 + $0x90] sm:$0xff] }
 0x68d   : > { %v8259_v3 = vpack.c.bf16 %v3751_v61, %v3750_v62  ;;  %v3522_v4 = vadd.f32 %v9818_v48, %v3521_v25 }
 0x68e   : > { %v3753_v5 = vmax.f32 %v3527_v1, 0.0 }
 0x68f   : > { %8260 = vmatprep.subr.bf16.mxu1 %v8259_v3  ;;  %v3752_v6 = vmax.f32 %v3522_v4, 0.0  ;;  %v7297_v7 = vpop.f32.mrb[152].mxu1  ;;  %7394 = vmatmul.mubr.f32.gmra.mrb[196].mxu0 %v8596_v8  ;;  %v8610_v8 = vld [vmem:[%s9381_s28 + $0x98] sm:$0xff] }
 0x690   : > { %8262 = vmatpush3.bf16.msra.mxu1 %v8259_v3  ;;  %v3537_v10 = vadd.f32 %v7297_v7, %v9818_v48  ;;  %v3531_v11 = vpop.f32.mrb[153].mxu1  ;;  %7396 = vmatprep.mubr.f32.mxu0 %v8597_v12  ;;  %v8611_v12 = vld [vmem:[%s9381_s28 + $0xa0] sm:$0xff] }
 0x691   : > { %v8263_v13 = vpack.c.bf16 %v3753_v5, %v3752_v6  ;;  %v3532_v14 = vadd.f32 %v9818_v48, %v3531_v11 }
 0x692   : > { %v3755_v15 = vmax.f32 %v3537_v10, 0.0 }
 0x693   : > { %8264 = vmatprep.subr.bf16.mxu1 %v8263_v13  ;;  %v3754_v16 = vmax.f32 %v3532_v14, 0.0  ;;  %v7300_v17 = vpop.f32.mrb[154].mxu1  ;;  %7397 = vmatmul.mubr.f32.gmra.mrb[198].mxu0 %v8598_v18  ;;  %v8612_v18 = vld [vmem:[%s9381_s28 + $0xa8] sm:$0xff] }
 0x694   : > { %8266 = vmatpush3.bf16.msra.mxu1 %v8263_v13  ;;  %v3547_v19 = vadd.f32 %v7300_v17, %v9818_v48  ;;  %v3541_v21 = vpop.f32.mrb[155].mxu1  ;;  %7399 = vmatprep.mubr.f32.mxu0 %v8599_v22  ;;  %v8613_v22 = vld [vmem:[%s9381_s28 + $0xb0] sm:$0xff] }
 0x695   : > { %v8267_v23 = vpack.c.bf16 %v3755_v15, %v3754_v16  ;;  %v3542_v24 = vadd.f32 %v9818_v48, %v3541_v21 }
 0x696   : > { %v3757_v26 = vmax.f32 %v3547_v19, 0.0 }
 0x697   : > { %8268 = vmatprep.subr.bf16.mxu1 %v8267_v23  ;;  %v3756_v27 = vmax.f32 %v3542_v24, 0.0  ;;  %v7303_v28 = vpop.f32.mrb[156].mxu1  ;;  %7400 = vmatmul.mubr.f32.gmra.mrb[200].mxu0 %v8600_v29  ;;  %v8614_v29 = vld [vmem:[%s9381_s28 + $0xb8] sm:$0xff] }
 0x698   : > { %8270 = vmatpush3.bf16.msra.mxu1 %v8267_v23  ;;  %v3557_v20 = vadd.f32 %v7303_v28, %v9818_v48  ;;  %v3551_v30 = vpop.f32.mrb[157].mxu1  ;;  %7402 = vmatprep.mubr.f32.mxu0 %v8601_v9  ;;  %v8615_v9 = vld [vmem:[%s9381_s28 + $0xc0] sm:$0xff] }
 0x699   : > { %v8271_v31 = vpack.c.bf16 %v3757_v26, %v3756_v27  ;;  %v3552_v32 = vadd.f32 %v9818_v48, %v3551_v30 }
 0x69a   : > { %v3759_v33 = vmax.f32 %v3557_v20, 0.0 }
 0x69b   : > { %8272 = vmatprep.subr.bf16.mxu1 %v8271_v31  ;;  %v3758_v34 = vmax.f32 %v3552_v32, 0.0  ;;  %v7306_v35 = vpop.f32.mrb[158].mxu1  ;;  %7403 = vmatmul.mubr.f32.gmra.mrb[202].mxu0 %v8602_v36  ;;  %v8616_v36 = vld [vmem:[%s9381_s28 + $0xc8] sm:$0xff] }
 0x69c   : > { %8274 = vmatpush3.bf16.msra.mxu1 %v8271_v31  ;;  %v3567_v37 = vadd.f32 %v7306_v35, %v9818_v48  ;;  %v3561_v38 = vpop.f32.mrb[159].mxu1  ;;  %7405 = vmatprep.mubr.f32.mxu0 %v8603_v39  ;;  %v8617_v39 = vld [vmem:[%s9381_s28 + $0xd0] sm:$0xff] }
 0x69d   : > { %v8275_v40 = vpack.c.bf16 %v3759_v33, %v3758_v34  ;;  %v3562_v41 = vadd.f32 %v9818_v48, %v3561_v38 }
 0x69e   : > { %v3761_v42 = vmax.f32 %v3567_v37, 0.0 }
 0x69f   : > { %8276 = vmatprep.subr.bf16.mxu1 %v8275_v40  ;;  %v3760_v44 = vmax.f32 %v3562_v41, 0.0  ;;  %v7309_v45 = vpop.f32.mrb[160].mxu1  ;;  %7406 = vmatmul.mubr.f32.gmra.mrb[204].mxu0 %v8604_v46  ;;  %v8618_v46 = vld [vmem:[%s9381_s28 + $0xd8] sm:$0xff] }
 0x6a0   : > { %8278 = vmatpush3.bf16.msra.mxu1 %v8275_v40  ;;  %v3577_v47 = vadd.f32 %v7309_v45, %v9818_v48  ;;  %v3571_v49 = vpop.f32.mrb[161].mxu1  ;;  %7408 = vmatprep.mubr.f32.mxu0 %v8605_v50  ;;  %v8619_v50 = vld [vmem:[%s9381_s28 + $0xe0] sm:$0xff] }
 0x6a1   : > { %v8279_v51 = vpack.c.bf16 %v3761_v42, %v3760_v44  ;;  %v3572_v52 = vadd.f32 %v9818_v48, %v3571_v49 }
 0x6a2   : > { %v3763_v43 = vmax.f32 %v3577_v47, 0.0 }
 0x6a3   : > { %8280 = vmatprep.subr.bf16.mxu1 %v8279_v51  ;;  %v3762_v53 = vmax.f32 %v3572_v52, 0.0  ;;  %v7312_v54 = vpop.f32.mrb[162].mxu1  ;;  %7409 = vmatmul.mubr.f32.gmra.mrb[206].mxu0 %v8606_v55 }
 0x6a4   : > { %8282 = vmatpush3.bf16.msra.mxu1 %v8279_v51  ;;  %v3587_v56 = vadd.f32 %v7312_v54, %v9818_v48  ;;  %v3581_v57 = vpop.f32.mrb[163].mxu1  ;;  %7499 = vmatprep.mubr.f32.mxu0 %v8607_v58  ;;  %v4375_v54 = vld [vmem:[#allocation13 + $0x8] sm:$0xff] }
 0x6a5   : > { %v8283_v59 = vpack.c.bf16 %v3763_v43, %v3762_v53  ;;  %v3582_v60 = vadd.f32 %v9818_v48, %v3581_v57  ;;  %v4374_v53 = vld [vmem:[#allocation13] sm:$0xff]  ;;  %v8620_v57 = vld [vmem:[%s9381_s28 + $0xe8] sm:$0xff] }
 0x6a6   : > { %v3765_v61 = vmax.f32 %v3587_v56, 0.0 }
 0x6a7   : > { %v3764_v62 = vmax.f32 %v3582_v60, 0.0  ;;  %v7315_v63 = vpop.f32.mrb[164].mxu1  ;;  %8284 = vmatprep.subr.bf16.mxu0 %v8283_v59  ;;  %7444 = vmatmul.mubr.f32.vlgmr.msra.gmra.mrb[192].mxu1 %v8608_v0  ;;  %v8621_v60 = vld [vmem:[%s9381_s28 + $0xf0] sm:$0xff] }
 0x6a8   : > { %v3597_v1 = vadd.f32 %v7315_v63, %v9818_v48  ;;  %v3591_v25 = vpop.f32.mrb[165].mxu1  ;;  %8286 = vmatpush3.bf16.msra.mxu0 %v8283_v59  ;;  %7446 = vmatprep.mubr.f32.mxu1 %v8609_v2  ;;  %v8347_v63 = vpack.c.bf16 %v4375_v54, %v4374_v53  ;;  %v8622_v2 = vld [vmem:[%s9381_s28 + $0xf8] sm:$0xff]  ;;  %v4384_v53 = vld [vmem:[#allocation13 + $0x50] sm:$0xff] }
 0x6a9   : > { %v8287_v3 = vpack.c.bf16 %v3765_v61, %v3764_v62  ;;  %v3592_v4 = vadd.f32 %v9818_v48, %v3591_v25  ;;  %v4385_v54 = vld [vmem:[#allocation13 + $0x58] sm:$0xff] }
 0x6aa   : > { %v3767_v5 = vmax.f32 %v3597_v1, 0.0 }
 0x6ab   : > { %v3766_v6 = vmax.f32 %v3592_v4, 0.0  ;;  %v7318_v7 = vpop.f32.mrb[166].mxu1  ;;  %8288 = vmatprep.subr.bf16.mxu0 %v8287_v3  ;;  %7447 = vmatmul.mubr.f32.gmra.mrb[194].mxu1 %v8610_v8  ;;  %v4377_v4 = vld [vmem:[#allocation13 + $0x18] sm:$0xff] }
 0x6ac   : > { %v3607_v10 = vadd.f32 %v7318_v7, %v9818_v48  ;;  %v3601_v11 = vpop.f32.mrb[167].mxu1  ;;  %8290 = vmatpush3.bf16.msra.mxu0 %v8287_v3  ;;  %7449 = vmatprep.mubr.f32.mxu1 %v8611_v12  ;;  %v4376_v3 = vld [vmem:[#allocation13 + $0x10] sm:$0xff]  ;;  %v8623_v7 = vld [vmem:[%s9381_s28 + $0x180] sm:$0xff] }
 0x6ad   : > { %v8291_v13 = vpack.c.bf16 %v3767_v5, %v3766_v6  ;;  %v3602_v14 = vadd.f32 %v9818_v48, %v3601_v11  ;;  %v8351_v12 = vpack.c.bf16 %v4377_v4, %v4376_v3  ;;  %v8633_v4 = vld [vmem:[%s9381_s28 + $0x150] sm:$0xff] }
 0x6ae   : > { %v3769_v15 = vmax.f32 %v3607_v10, 0.0 }
 0x6af   : > { %v3768_v16 = vmax.f32 %v3602_v14, 0.0  ;;  %v7321_v17 = vpop.f32.mrb[168].mxu1  ;;  %8292 = vmatprep.subr.bf16.mxu0 %v8291_v13  ;;  %7450 = vmatmul.mubr.f32.gmra.mrb[196].mxu1 %v8612_v18 }
 0x6b0   : > { %v3617_v19 = vadd.f32 %v7321_v17, %v9818_v48  ;;  %v3611_v21 = vpop.f32.mrb[169].mxu1  ;;  %8294 = vmatpush3.bf16.msra.mxu0 %v8291_v13  ;;  %7452 = vmatprep.mubr.f32.mxu1 %v8613_v22  ;;  %v4379_v17 = vld [vmem:[#allocation13 + $0x28] sm:$0xff] }
 0x6b1   : > { %v8295_v23 = vpack.c.bf16 %v3769_v15, %v3768_v16  ;;  %v3612_v24 = vadd.f32 %v9818_v48, %v3611_v21  ;;  %v8624_v15 = vld [vmem:[%s9381_s28 + $0x108] sm:$0xff]  ;;  %v4378_v16 = vld [vmem:[#allocation13 + $0x20] sm:$0xff]  ;;  %v8625_v21 = vld [vmem:[%s9381_s28 + $0x110] sm:$0xff] }
 0x6b2   : > { %v3771_v26 = vmax.f32 %v3617_v19, 0.0 }
 0x6b3   : > { %v3770_v27 = vmax.f32 %v3612_v24, 0.0  ;;  %v7324_v28 = vpop.f32.mrb[170].mxu1  ;;  %8296 = vmatprep.subr.bf16.mxu0 %v8295_v23  ;;  %7453 = vmatmul.mubr.f32.gmra.mrb[198].mxu1 %v8614_v29  ;;  %v8626_v29 = vld [vmem:[%s9381_s28 + $0x118] sm:$0xff] }
 0x6b4   : > { %v3627_v20 = vadd.f32 %v7324_v28, %v9818_v48  ;;  %v3621_v30 = vpop.f32.mrb[171].mxu1  ;;  %8298 = vmatpush3.bf16.msra.mxu0 %v8295_v23  ;;  %7455 = vmatprep.mubr.f32.mxu1 %v8615_v9 }
 0x6b5   : > { %v8299_v31 = vpack.c.bf16 %v3771_v26, %v3770_v27  ;;  %v3622_v32 = vadd.f32 %v9818_v48, %v3621_v30  ;;  %v8355_v26 = vpack.c.bf16 %v4379_v17, %v4378_v16  ;;  %v4381_v30 = vld [vmem:[#allocation13 + $0x38] sm:$0xff]  ;;  %v8635_v17 = vld [vmem:[%s9381_s28 + $0x160] sm:$0xff] }
 0x6b6   : > { %v3773_v33 = vmax.f32 %v3627_v20, 0.0  ;;  %v4380_v20 = vld [vmem:[#allocation13 + $0x30] sm:$0xff] }
 0x6b7   : > { %v3772_v34 = vmax.f32 %v3622_v32, 0.0  ;;  %v7327_v35 = vpop.f32.mrb[172].mxu1  ;;  %8300 = vmatprep.subr.bf16.mxu0 %v8299_v31  ;;  %7456 = vmatmul.mubr.f32.gmra.mrb[200].mxu1 %v8616_v36  ;;  %v8627_v32 = vld [vmem:[%s9381_s28 + $0x120] sm:$0xff]  ;;  %v8359_v36 = vpack.c.bf16 %v4381_v30, %v4380_v20  ;;  %v8641_v20 = vld [vmem:[%s9381_s28 + $0x198] sm:$0xff] }
 0x6b8   : > { %v3637_v37 = vadd.f32 %v7327_v35, %v9818_v48  ;;  %v3631_v38 = vpop.f32.mrb[173].mxu1  ;;  %8302 = vmatpush3.bf16.msra.mxu0 %v8299_v31  ;;  %7458 = vmatprep.mubr.f32.mxu1 %v8617_v39  ;;  %v8628_v39 = vld [vmem:[%s9381_s28 + $0x128] sm:$0xff]  ;;  %v8642_v30 = vld [vmem:[%s9381_s28 + $0x1a0] sm:$0xff] }
 0x6b9   : > { %v8303_v40 = vpack.c.bf16 %v3773_v33, %v3772_v34  ;;  %v3632_v41 = vadd.f32 %v9818_v48, %v3631_v38 }
 0x6ba   : > { %v3775_v42 = vmax.f32 %v3637_v37, 0.0 }
 0x6bb   : > { %v3774_v44 = vmax.f32 %v3632_v41, 0.0  ;;  %v7330_v45 = vpop.f32.mrb[174].mxu1  ;;  %8304 = vmatprep.subr.bf16.mxu0 %v8303_v40  ;;  %7459 = vmatmul.mubr.f32.gmra.mrb[202].mxu1 %v8618_v46  ;;  %v4383_v41 = vld [vmem:[#allocation13 + $0x48] sm:$0xff] }
 0x6bc   : > { %v3647_v47 = vadd.f32 %v7330_v45, %v9818_v48  ;;  %v3641_v49 = vpop.f32.mrb[175].mxu1  ;;  %8306 = vmatpush3.bf16.msra.mxu0 %v8303_v40  ;;  %7461 = vmatprep.mubr.f32.mxu1 %v8619_v50  ;;  %v4382_v40 = vld [vmem:[#allocation13 + $0x40] sm:$0xff]  ;;  %v8629_v45 = vld [vmem:[%s9381_s28 + $0x130] sm:$0xff] }
 0x6bd   : > { %v8307_v51 = vpack.c.bf16 %v3775_v42, %v3774_v44  ;;  %v3642_v52 = vadd.f32 %v9818_v48, %v3641_v49  ;;  %v8363_v50 = vpack.c.bf16 %v4383_v41, %v4382_v40  ;;  %v8653_v40 = vld [vmem:[%s9381_s28 + $0x1f8] sm:$0xff]  ;;  %v4846_v41 = vld [vmem:[#allocation14] sm:$0xff] }
 0x6be   : > { %v3777_v43 = vmax.f32 %v3647_v47, 0.0 }
 0x6bf   : > { %v3776_v55 = vmax.f32 %v3642_v52, 0.0  ;;  %v7333_v56 = vpop.f32.mrb[176].mxu1  ;;  %8308 = vmatprep.subr.bf16.mxu0 %v8307_v51  ;;  %7462 = vmatmul.mubr.f32.gmra.mrb[204].mxu1 %v8620_v57  ;;  %v8631_v57 = vld [vmem:[%s9381_s28 + $0x140] sm:$0xff] }
 0x6c0   : > { %v3657_v58 = vadd.f32 %v7333_v56, %v9818_v48  ;;  %v3651_v59 = vpop.f32.mrb[177].mxu1  ;;  %8310 = vmatpush3.bf16.msra.mxu0 %v8307_v51  ;;  %7464 = vmatprep.mubr.f32.mxu1 %v8621_v60 }
 0x6c1   : > { %v8311_v61 = vpack.c.bf16 %v3777_v43, %v3776_v55  ;;  %v3652_v62 = vadd.f32 %v9818_v48, %v3651_v59  ;;  %v8630_v43 = vld [vmem:[%s9381_s28 + $0x138] sm:$0xff] }
 0x6c2   : > { %v3779_v0 = vmax.f32 %v3657_v58, 0.0 }
 0x6c3   : > { %v3778_v1 = vmax.f32 %v3652_v62, 0.0  ;;  %v7336_v25 = vpop.f32.mrb[178].mxu1  ;;  %8312 = vmatprep.subr.bf16.mxu0 %v8311_v61  ;;  %7465 = vmatmul.mubr.f32.gmra.mrb[206].mxu1 %v8622_v2 }
 0x6c4   : > { %v3667_v5 = vadd.f32 %v7336_v25, %v9818_v48  ;;  %v3661_v6 = vpop.f32.mrb[179].mxu1  ;;  %8314 = vmatpush3.bf16.msra.mxu0 %v8311_v61  ;;  %7555 = vmatprep.mubr.f32.mxu1 %v8623_v7  ;;  %v8367_v61 = vpack.c.bf16 %v4385_v54, %v4384_v53  ;;  %v4387_v25 = vld [vmem:[#allocation13 + $0x68] sm:$0xff] }
 0x6c5   : > { %v8315_v8 = vpack.c.bf16 %v3779_v0, %v3778_v1  ;;  %v3662_v10 = vadd.f32 %v9818_v48, %v3661_v6  ;;  %8348 = vmatprep.subr.bf16.mxu0 %v8347_v63  ;;  %v8632_v0 = vld [vmem:[%s9381_s28 + $0x148] sm:$0xff]  ;;  %v4386_v1 = vld [vmem:[#allocation13 + $0x60] sm:$0xff] }
 0x6c6   : > { %v3781_v11 = vmax.f32 %v3667_v5, 0.0 }
 0x6c7   : > { %v3780_v13 = vmax.f32 %v3662_v10, 0.0  ;;  %v7339_v14 = vpop.f32.mrb[180].mxu1  ;;  %8316 = vmatprep.subr.bf16.mxu1 %v8315_v8  ;;  %7500 = vmatmul.mubr.f32.vlgmr.msra.gmra.mrb[208].mxu0 %v8624_v15 }
 0x6c8   : > { %v3677_v18 = vadd.f32 %v7339_v14, %v9818_v48  ;;  %v3671_v19 = vpop.f32.mrb[181].mxu1  ;;  %8318 = vmatpush3.bf16.msra.mxu1 %v8315_v8  ;;  %7502 = vmatprep.mubr.f32.mxu0 %v8625_v21  ;;  %v8371_v8 = vpack.c.bf16 %v4387_v25, %v4386_v1  ;;  %v4389_v14 = vld [vmem:[#allocation13 + $0x78] sm:$0xff]  ;;  %v4856_v1 = vld [vmem:[#allocation14 + $0x50] sm:$0xff] }
 0x6c9   : > { %v8319_v22 = vpack.c.bf16 %v3781_v11, %v3780_v13  ;;  %v3672_v23 = vadd.f32 %v9818_v48, %v3671_v19  ;;  %8350 = vmatpush3.bf16.msra.mxu0 %v8347_v63  ;;  %v4388_v13 = vld [vmem:[#allocation13 + $0x70] sm:$0xff]  ;;  %v4857_v25 = vld [vmem:[#allocation14 + $0x58] sm:$0xff] }
 0x6ca   : > { %v3783_v24 = vmax.f32 %v3677_v18, 0.0  ;;  %8352 = vmatprep.subr.bf16.mxu0 %v8351_v12 }
 0x6cb   : > { %v3782_v27 = vmax.f32 %v3672_v23, 0.0  ;;  %v7342_v28 = vpop.f32.mrb[182].mxu1  ;;  %8320 = vmatprep.subr.bf16.mxu1 %v8319_v22  ;;  %7503 = vmatmul.mubr.f32.gmra.mrb[210].mxu0 %v8626_v29  ;;  %v8640_v29 = vld [vmem:[%s9381_s28 + $0x190] sm:$0xff] }
 0x6cc   : > { %v3687_v9 = vadd.f32 %v7342_v28, %v9818_v48  ;;  %v3681_v31 = vpop.f32.mrb[183].mxu1  ;;  %8322 = vmatpush3.bf16.msra.mxu1 %v8319_v22  ;;  %7505 = vmatprep.mubr.f32.mxu0 %v8627_v32  ;;  %v8375_v22 = vpack.c.bf16 %v4389_v14, %v4388_v13  ;;  %v8639_v28 = vld [vmem:[%s9381_s28 + $0x188] sm:$0xff]  ;;  %v8645_v32 = vld [vmem:[%s9381_s28 + $0x1b8] sm:$0xff] }
 0x6cd   : > { %v8323_v33 = vpack.c.bf16 %v3783_v24, %v3782_v27  ;;  %v3682_v34 = vadd.f32 %v9818_v48, %v3681_v31  ;;  %8354 = vmatpush3.bf16.msra.mxu0 %v8351_v12  ;;  %v8634_v12 = vld [vmem:[%s9381_s28 + $0x158] sm:$0xff]  ;;  %v8636_v24 = vld [vmem:[%s9381_s28 + $0x168] sm:$0xff]  ;;  %v8644_v31 = vld [vmem:[%s9381_s28 + $0x1b0] sm:$0xff] }
 0x6ce   : > { %v3785_v35 = vmax.f32 %v3687_v9, 0.0  ;;  %8356 = vmatprep.subr.bf16.mxu0 %v8355_v26  ;;  %v8643_v9 = vld [vmem:[%s9381_s28 + $0x1a8] sm:$0xff] }
 0x6cf   : > { %v3784_v37 = vmax.f32 %v3682_v34, 0.0  ;;  %v7345_v38 = vpop.f32.mrb[184].mxu1  ;;  %8324 = vmatprep.subr.bf16.mxu1 %v8323_v33  ;;  %7506 = vmatmul.mubr.f32.gmra.mrb[212].mxu0 %v8628_v39  ;;  %v8647_v34 = vld [vmem:[%s9381_s28 + $0x1c8] sm:$0xff]  ;;  %v8652_v39 = vld [vmem:[%s9381_s28 + $0x1f0] sm:$0xff] }
 0x6d0   : > { %v3697_v42 = vadd.f32 %v7345_v38, %v9818_v48  ;;  %v3691_v44 = vpop.f32.mrb[185].mxu1  ;;  %8326 = vmatpush3.bf16.msra.mxu1 %v8323_v33  ;;  %7508 = vmatprep.mubr.f32.mxu0 %v8629_v45  ;;  %v8646_v33 = vld [vmem:[%s9381_s28 + $0x1c0] sm:$0xff]  ;;  %v8651_v38 = vld [vmem:[%s9381_s28 + $0x1e8] sm:$0xff] }
 0x6d1   : > { %v8327_v46 = vpack.c.bf16 %v3785_v35, %v3784_v37  ;;  %v3692_v47 = vadd.f32 %v9818_v48, %v3691_v44  ;;  %8358 = vmatpush3.bf16.msra.mxu0 %v8355_v26  ;;  %v8637_v26 = vld [vmem:[%s9381_s28 + $0x170] sm:$0xff]  ;;  %v8650_v37 = vld [vmem:[%s9381_s28 + $0x1e0] sm:$0xff] }
 0x6d2   : > { %v3787_v49 = vmax.f32 %v3697_v42, 0.0  ;;  %8360 = vmatprep.subr.bf16.mxu0 %v8359_v36  ;;  %v8648_v35 = vld [vmem:[%s9381_s28 + $0x1d0] sm:$0xff]  ;;  %v4847_v42 = vld [vmem:[#allocation14 + $0x8] sm:$0xff] }
 0x6d3   : > { %v3786_v51 = vmax.f32 %v3692_v47, 0.0  ;;  %v7348_v52 = vpop.f32.mrb[186].mxu1  ;;  %8328 = vmatprep.subr.bf16.mxu1 %v8327_v46  ;;  %7509 = vmatmul.mubr.f32.gmra.mrb[214].mxu0 %v8630_v43  ;;  %v4848_v44 = vld [vmem:[#allocation14 + $0x10] sm:$0xff]  ;;  %v4849_v47 = vld [vmem:[#allocation14 + $0x18] sm:$0xff] }
 0x6d4   : > { %v3707_v55 = vadd.f32 %v7348_v52, %v9818_v48  ;;  %v3701_v56 = vpop.f32.mrb[187].mxu1  ;;  %8330 = vmatpush3.bf16.msra.mxu1 %v8327_v46  ;;  %7511 = vmatprep.mubr.f32.mxu0 %v8631_v57  ;;  %v8379_v46 = vpack.c.bf16 %v4847_v42, %v4846_v41  ;;  %v4851_v52 = vld [vmem:[#allocation14 + $0x28] sm:$0xff]  ;;  %v4860_v42 = vld [vmem:[#allocation14 + $0x70] sm:$0xff] }
 0x6d5   : > { %v8331_v58 = vpack.c.bf16 %v3787_v49, %v3786_v51  ;;  %v3702_v59 = vadd.f32 %v9818_v48, %v3701_v56  ;;  %8362 = vmatpush3.bf16.msra.mxu0 %v8359_v36  ;;  %v8649_v36 = vld [vmem:[%s9381_s28 + $0x1d8] sm:$0xff]  ;;  %v4850_v51 = vld [vmem:[#allocation14 + $0x20] sm:$0xff] }
 0x6d6   : > { %v3789_v60 = vmax.f32 %v3707_v55, 0.0  ;;  %8364 = vmatprep.subr.bf16.mxu0 %v8363_v50  ;;  %v8387_v53 = vpack.c.bf16 %v4851_v52, %v4850_v51  ;;  %v4852_v55 = vld [vmem:[#allocation14 + $0x30] sm:$0xff]  ;;  %v4853_v56 = vld [vmem:[#allocation14 + $0x38] sm:$0xff] }
 0x6d7   : > { %v3788_v62 = vmax.f32 %v3702_v59, 0.0  ;;  %v7351_v63 = vpop.f32.mrb[188].mxu1  ;;  %8332 = vmatprep.subr.bf16.mxu1 %v8331_v58  ;;  %7512 = vmatmul.mubr.f32.gmra.mrb[216].mxu0 %v8632_v0 }
 0x6d8   : > { %v3717_v2 = vadd.f32 %v7351_v63, %v9818_v48  ;;  %v3711_v3 = vpop.f32.mrb[189].mxu1  ;;  %8334 = vmatpush3.bf16.msra.mxu1 %v8331_v58  ;;  %7514 = vmatprep.mubr.f32.mxu0 %v8633_v4  ;;  %v8391_v58 = vpack.c.bf16 %v4853_v56, %v4852_v55 }
 0x6d9   : > { %v8335_v5 = vpack.c.bf16 %v3789_v60, %v3788_v62  ;;  %v3712_v6 = vadd.f32 %v9818_v48, %v3711_v3  ;;  %8366 = vmatpush3.bf16.msra.mxu0 %v8363_v50  ;;  %v8383_v50 = vpack.c.bf16 %v4849_v47, %v4848_v44  ;;  %v4854_v60 = vld [vmem:[#allocation14 + $0x40] sm:$0xff]  ;;  %v8399_v3 = vpack.c.bf16 %v4857_v25, %v4856_v1  ;;  %v4861_v44 = vld [vmem:[#allocation14 + $0x78] sm:$0xff] }
 0x6da   : > { %v3791_v7 = vmax.f32 %v3717_v2, 0.0  ;;  %8368 = vmatprep.subr.bf16.mxu0 %v8367_v61  ;;  %v9949_v25 = vld [vmem:[%s10264_s4] ss:$0 sm:$0xff] }
 0x6db   : > { %v3790_v10 = vmax.f32 %v3712_v6, 0.0  ;;  %v7354_v11 = vpop.f32.mrb[190].mxu1  ;;  %8336 = vmatprep.subr.bf16.mxu1 %v8335_v5  ;;  %7515 = vmatmul.mubr.f32.gmra.mrb[218].mxu0 %v8634_v12  ;;  %v4859_v6 = vld [vmem:[#allocation14 + $0x68] sm:$0xff] }
 0x6dc   : > { %v3727_v15 = vadd.f32 %v7354_v11, %v9818_v48  ;;  %v3721_v16 = vpop.f32.mrb[191].mxu1  ;;  %8338 = vmatpush3.bf16.msra.mxu1 %v8335_v5  ;;  %7517 = vmatprep.mubr.f32.mxu0 %v8635_v17  ;;  %v4858_v5 = vld [vmem:[#allocation14 + $0x60] sm:$0xff] }
 0x6dd   : > { %v8339_v18 = vpack.c.bf16 %v3791_v7, %v3790_v10  ;;  %v3722_v19 = vadd.f32 %v9818_v48, %v3721_v16  ;;  %8370 = vmatpush3.bf16.msra.mxu0 %v8367_v61  ;;  %v8638_v48 = vld [vmem:[%s9381_s28 + $0x178] sm:$0xff]  ;;  %v4855_v61 = vld [vmem:[#allocation14 + $0x48] sm:$0xff] }
 0x6de   : > { %v3793_v21 = vmax.f32 %v3727_v15, 0.0  ;;  %8372 = vmatprep.subr.bf16.mxu0 %v8371_v8  ;;  %v8395_v63 = vpack.c.bf16 %v4855_v61, %v4854_v60 }
 0x6df   : > { %v3792_v23 = vmax.f32 %v3722_v19, 0.0  ;;  %8340 = vmatprep.subr.bf16.mxu1 %v8339_v18  ;;  %7518 = vmatmul.mubr.f32.gmra.mrb[220].mxu0 %v8636_v24 }
 0x6e0   : > { %8342 = vmatpush3.bf16.msra.mxu1 %v8339_v18  ;;  %7520 = vmatprep.mubr.f32.mxu0 %v8637_v26 }
 0x6e1   : > { %v8343_v27 = vpack.c.bf16 %v3793_v21, %v3792_v23  ;;  %8374 = vmatpush3.bf16.msra.mxu0 %v8371_v8  ;;  %v8403_v8 = vpack.c.bf16 %v4859_v6, %v4858_v5 }
 0x6e2   : > { %8376 = vmatprep.subr.bf16.mxu0 %v8375_v22 }
 0x6e3   : > { %8344 = vmatprep.subr.bf16.mxu1 %v8343_v27  ;;  %7521 = vmatmul.mubr.f32.gmra.mrb[222].mxu0 %v8638_v48 }
 0x6e4   : > { %8346 = vmatpush3.bf16.msra.mxu1 %v8343_v27 }
 0x6e5   : > { %8378 = vmatpush3.bf16.msra.mxu0 %v8375_v22  ;;  %8380 = vmatprep.subr.bf16.mxu1 %v8379_v46 }
 0x6e7   : > { %7556 = vmatmul.mubr.f32.vlgmr.msra.gmra.mrb[208].mxu1 %v8639_v28 }
 0x6e8   : > { %7558 = vmatprep.mubr.f32.mxu1 %v8640_v29  ;;  %8382 = vmatpush3.bf16.msra.mxu1 %v8379_v46 }
 0x6e9   : > { %8384 = vmatprep.subr.bf16.mxu1 %v8383_v50 }
 0x6eb   : > { %7559 = vmatmul.mubr.f32.gmra.mrb[210].mxu1 %v8641_v20 }
 0x6ec   : > { %7561 = vmatprep.mubr.f32.mxu1 %v8642_v30  ;;  %8386 = vmatpush3.bf16.msra.mxu1 %v8383_v50 }
 0x6ed   : > { %8388 = vmatprep.subr.bf16.mxu1 %v8387_v53 }
 0x6ef   : > { %7562 = vmatmul.mubr.f32.gmra.mrb[212].mxu1 %v8643_v9 }
 0x6f0   : > { %7564 = vmatprep.mubr.f32.mxu1 %v8644_v31  ;;  %8390 = vmatpush3.bf16.msra.mxu1 %v8387_v53 }
 0x6f1   : > { %8392 = vmatprep.subr.bf16.mxu1 %v8391_v58 }
 0x6f3   : > { %7565 = vmatmul.mubr.f32.gmra.mrb[214].mxu1 %v8645_v32 }
 0x6f4   : > { %7567 = vmatprep.mubr.f32.mxu1 %v8646_v33  ;;  %8394 = vmatpush3.bf16.msra.mxu1 %v8391_v58 }
 0x6f5   : > { %8396 = vmatprep.subr.bf16.mxu1 %v8395_v63 }
 0x6f7   : > { %7568 = vmatmul.mubr.f32.gmra.mrb[216].mxu1 %v8647_v34 }
 0x6f8   : > { %7570 = vmatprep.mubr.f32.mxu1 %v8648_v35  ;;  %8398 = vmatpush3.bf16.msra.mxu1 %v8395_v63 }
 0x6f9   : > { %8400 = vmatprep.subr.bf16.mxu1 %v8399_v3 }
 0x6fb   : > { %7571 = vmatmul.mubr.f32.gmra.mrb[218].mxu1 %v8649_v36 }
 0x6fc   : > { %7573 = vmatprep.mubr.f32.mxu1 %v8650_v37  ;;  %8402 = vmatpush3.bf16.msra.mxu1 %v8399_v3 }
 0x6fd   : > { %8404 = vmatprep.subr.bf16.mxu1 %v8403_v8 }
 0x6ff   : > { %7574 = vmatmul.mubr.f32.gmra.mrb[220].mxu1 %v8651_v38 }
 0x700   : > { %7576 = vmatprep.mubr.f32.mxu1 %v8652_v39  ;;  %8406 = vmatpush3.bf16.msra.mxu1 %v8403_v8 }
 0x703   : > { %7577 = vmatmul.mubr.f32.gmra.mrb[222].mxu1 %v8653_v40 }
 0x75a   : > { %v7389_v45 = vpop.f32.mrb[192].mxu0 }
 0x75b   : > { %v3860_v49 = vpop.f32.mrb[193].mxu0 }
 0x75c   : > { %7611 = vmatprep.mubr.f32.mxu0 %v3860_v49 }
 0x75d   : > { %7612 = vmatmul.mubr.f32.vlgmr.msra.gmra.mrb[224].mxu0 %v7389_v45  ;;  %v8407_v45 = vpack.c.bf16 %v4861_v44, %v4860_v42 }
 0x75e   : > { %v7392_v43 = vpop.f32.mrb[194].mxu0 }
 0x75f   : > { %v3870_v54 = vpop.f32.mrb[195].mxu0  ;;  %8408 = vmatprep.subr.bf16.mxu1 %v8407_v45 }
 0x760   : > { %7614 = vmatprep.mubr.f32.mxu0 %v3870_v54  ;;  %8410 = vmatpush3.bf16.msra.mxu1 %v8407_v45 }
 0x761   : > { %7615 = vmatmul.mubr.f32.gmra.mrb[226].mxu0 %v7392_v43 }
 0x762   : > { %v7395_v57 = vpop.f32.mrb[196].mxu0 }
 0x763   : > { %v3880_v59 = vpop.f32.mrb[197].mxu0 }
 0x764   : > { %7617 = vmatprep.mubr.f32.mxu0 %v3880_v59 }
 0x765   : > { %7618 = vmatmul.mubr.f32.gmra.mrb[228].mxu0 %v7395_v57 }
 0x766   : > { %v7398_v62 = vpop.f32.mrb[198].mxu0 }
 0x767   : > { %v3890_v0 = vpop.f32.mrb[199].mxu0 }
 0x768   : > { %7620 = vmatprep.mubr.f32.mxu0 %v3890_v0 }
 0x769   : > { %7621 = vmatmul.mubr.f32.gmra.mrb[230].mxu0 %v7398_v62 }
 0x76a   : > { %v7401_v2 = vpop.f32.mrb[200].mxu0 }
 0x76b   : > { %v3900_v4 = vpop.f32.mrb[201].mxu0 }
 0x76c   : > { %7623 = vmatprep.mubr.f32.mxu0 %v3900_v4 }
 0x76d   : > { %7624 = vmatmul.mubr.f32.gmra.mrb[232].mxu0 %v7401_v2 }
 0x76e   : > { %v7404_v7 = vpop.f32.mrb[202].mxu0 }
 0x76f   : > { %v3910_v10 = vpop.f32.mrb[203].mxu0 }
 0x770   : > { %7626 = vmatprep.mubr.f32.mxu0 %v3910_v10 }
 0x771   : > { %7627 = vmatmul.mubr.f32.gmra.mrb[234].mxu0 %v7404_v7 }
 0x772   : > { %v7407_v11 = vpop.f32.mrb[204].mxu0 }
 0x773   : > { %v3920_v12 = vpop.f32.mrb[205].mxu0 }
 0x774   : > { %7629 = vmatprep.mubr.f32.mxu0 %v3920_v12 }
 0x775   : > { %7630 = vmatmul.mubr.f32.gmra.mrb[236].mxu0 %v7407_v11 }
 0x776   : > { %v7410_v13 = vpop.f32.mrb[206].mxu0 }
 0x777   : > { %v3930_v14 = vpop.f32.mrb[207].mxu0 }
 0x778   : > { %7632 = vmatprep.mubr.f32.mxu0 %v3930_v14 }
 0x779   : > { %7633 = vmatmul.mubr.f32.gmra.mrb[238].mxu0 %v7410_v13 }
 0x77a   : > { %v7445_v15 = vpop.f32.mrb[192].mxu1 }
 0x77b   : > { %v4005_v16 = vpop.f32.mrb[193].mxu1 }
 0x77c   : > { %7635 = vmatprep.mubr.f32.mxu0 %v4005_v16 }
 0x77d   : > { %7636 = vmatmul.mubr.f32.gmra.mrb[240].mxu0 %v7445_v15 }
 0x77e   : > { %v7448_v17 = vpop.f32.mrb[194].mxu1 }
 0x77f   : > { %v4015_v18 = vpop.f32.mrb[195].mxu1 }
 0x780   : > { %7638 = vmatprep.mubr.f32.mxu0 %v4015_v18 }
 0x781   : > { %7639 = vmatmul.mubr.f32.gmra.mrb[242].mxu0 %v7448_v17 }
 0x782   : > { %v7451_v19 = vpop.f32.mrb[196].mxu1 }
 0x783   : > { %v4025_v21 = vpop.f32.mrb[197].mxu1 }
 0x784   : > { %7641 = vmatprep.mubr.f32.mxu0 %v4025_v21 }
 0x785   : > { %7642 = vmatmul.mubr.f32.gmra.mrb[244].mxu0 %v7451_v19 }
 0x786   : > { %v7454_v22 = vpop.f32.mrb[198].mxu1 }
 0x787   : > { %v4035_v23 = vpop.f32.mrb[199].mxu1 }
 0x788   : > { %7644 = vmatprep.mubr.f32.mxu0 %v4035_v23 }
 0x789   : > { %7645 = vmatmul.mubr.f32.gmra.mrb[246].mxu0 %v7454_v22 }
 0x78a   : > { %v7457_v24 = vpop.f32.mrb[200].mxu1 }
 0x78b   : > { %v4045_v26 = vpop.f32.mrb[201].mxu1 }
 0x78c   : > { %7647 = vmatprep.mubr.f32.mxu0 %v4045_v26 }
 0x78d   : > { %7648 = vmatmul.mubr.f32.gmra.mrb[248].mxu0 %v7457_v24 }
 0x78e   : > { %v7460_v27 = vpop.f32.mrb[202].mxu1 }
 0x78f   : > { %v4055_v48 = vpop.f32.mrb[203].mxu1 }
 0x790   : > { %7650 = vmatprep.mubr.f32.mxu0 %v4055_v48 }
 0x791   : > { %7651 = vmatmul.mubr.f32.gmra.mrb[250].mxu0 %v7460_v27 }
 0x792   : > { %v7463_v28 = vpop.f32.mrb[204].mxu1 }
 0x793   : > { %v4065_v29 = vpop.f32.mrb[205].mxu1 }
 0x794   : > { %7653 = vmatprep.mubr.f32.mxu0 %v4065_v29 }
 0x795   : > { %7654 = vmatmul.mubr.f32.gmra.mrb[252].mxu0 %v7463_v28 }
 0x796   : > { %v7466_v20 = vpop.f32.mrb[206].mxu1 }
 0x797   : > { %v4075_v30 = vpop.f32.mrb[207].mxu1 }
 0x798   : > { %7656 = vmatprep.mubr.f32.mxu0 %v4075_v30 }
 0x799   : > { %7657 = vmatmul.mubr.f32.gmra.mrb[254].mxu0 %v7466_v20 }
 0x79a   : > { %v7501_v9 = vpop.f32.mrb[208].mxu0 }
 0x79b   : > { %v4150_v31 = vpop.f32.mrb[209].mxu0 }
 0x79c   : > { %7659 = vmatprep.mubr.f32.mxu0 %v4150_v31 }
 0x79d   : > { %7660 = vmatmul.mubr.f32.gmra.mrb[0].mxu0 %v7501_v9 }
 0x79e   : > { %v7504_v32 = vpop.f32.mrb[210].mxu0 }
 0x79f   : > { %v4160_v33 = vpop.f32.mrb[211].mxu0 }
 0x7a0   : > { %7662 = vmatprep.mubr.f32.mxu0 %v4160_v33 }
 0x7a1   : > { %7663 = vmatmul.mubr.f32.gmra.mrb[2].mxu0 %v7504_v32 }
 0x7a2   : > { %v7507_v34 = vpop.f32.mrb[212].mxu0 }
 0x7a3   : > { %v4170_v35 = vpop.f32.mrb[213].mxu0 }
 0x7a4   : > { %7665 = vmatprep.mubr.f32.mxu0 %v4170_v35 }
 0x7a5   : > { %7666 = vmatmul.mubr.f32.gmra.mrb[4].mxu0 %v7507_v34 }
 0x7a6   : > { %v7510_v36 = vpop.f32.mrb[214].mxu0 }
 0x7a7   : > { %v4180_v37 = vpop.f32.mrb[215].mxu0 }
 0x7a8   : > { %7668 = vmatprep.mubr.f32.mxu0 %v4180_v37 }
 0x7a9   : > { %7669 = vmatmul.mubr.f32.gmra.mrb[6].mxu0 %v7510_v36 }
 0x7aa   : > { %v7513_v38 = vpop.f32.mrb[216].mxu0 }
 0x7ab   : > { %v4190_v39 = vpop.f32.mrb[217].mxu0 }
 0x7ac   : > { %7671 = vmatprep.mubr.f32.mxu0 %v4190_v39 }
 0x7ad   : > { %7672 = vmatmul.mubr.f32.gmra.mrb[8].mxu0 %v7513_v38 }
 0x7ae   : > { %v7516_v40 = vpop.f32.mrb[218].mxu0 }
 0x7af   : > { %v4200_v41 = vpop.f32.mrb[219].mxu0 }
 0x7b0   : > { %7674 = vmatprep.mubr.f32.mxu0 %v4200_v41 }
 0x7b1   : > { %7675 = vmatmul.mubr.f32.gmra.mrb[10].mxu0 %v7516_v40 }
 0x7b2   : > { %v7519_v46 = vpop.f32.mrb[220].mxu0 }
 0x7b3   : > { %v4210_v47 = vpop.f32.mrb[221].mxu0 }
 0x7b4   : > { %7677 = vmatprep.mubr.f32.mxu0 %v4210_v47 }
 0x7b5   : > { %7678 = vmatmul.mubr.f32.gmra.mrb[12].mxu0 %v7519_v46 }
 0x7b6   : > { %v7522_v49 = vpop.f32.mrb[222].mxu0 }
 0x7b7   : > { %v4220_v50 = vpop.f32.mrb[223].mxu0 }
 0x7b8   : > { %7680 = vmatprep.mubr.f32.mxu0 %v4220_v50 }
 0x7b9   : > { %7681 = vmatmul.mubr.f32.gmra.mrb[14].mxu0 %v7522_v49 }
 0x7ba   : > { %v7557_v51 = vpop.f32.mrb[208].mxu1 }
 0x7bb   : > { %v4295_v52 = vpop.f32.mrb[209].mxu1 }
 0x7bc   : > { %7683 = vmatprep.mubr.f32.mxu0 %v4295_v52 }
 0x7bd   : > { %7684 = vmatmul.mubr.f32.gmra.mrb[16].mxu0 %v7557_v51 }
 0x7be   : > { %v7560_v43 = vpop.f32.mrb[210].mxu1 }
 0x7bf   : > { %v4305_v53 = vpop.f32.mrb[211].mxu1 }
 0x7c0   : > { %7686 = vmatprep.mubr.f32.mxu0 %v4305_v53 }
 0x7c1   : > { %7687 = vmatmul.mubr.f32.gmra.mrb[18].mxu0 %v7560_v43 }
 0x7c2   : > { %v7563_v54 = vpop.f32.mrb[212].mxu1 }
 0x7c3   : > { %v4315_v55 = vpop.f32.mrb[213].mxu1 }
 0x7c4   : > { %7689 = vmatprep.mubr.f32.mxu0 %v4315_v55 }
 0x7c5   : > { %7690 = vmatmul.mubr.f32.gmra.mrb[20].mxu0 %v7563_v54 }
 0x7c6   : > { %v7566_v56 = vpop.f32.mrb[214].mxu1 }
 0x7c7   : > { %v4325_v57 = vpop.f32.mrb[215].mxu1 }
 0x7c8   : > { %7692 = vmatprep.mubr.f32.mxu0 %v4325_v57 }
 0x7c9   : > { %7693 = vmatmul.mubr.f32.gmra.mrb[22].mxu0 %v7566_v56 }
 0x7ca   : > { %v7569_v58 = vpop.f32.mrb[216].mxu1 }
 0x7cb   : > { %v4335_v59 = vpop.f32.mrb[217].mxu1 }
 0x7cc   : > { %7695 = vmatprep.mubr.f32.mxu0 %v4335_v59 }
 0x7cd   : > { %7696 = vmatmul.mubr.f32.gmra.mrb[24].mxu0 %v7569_v58 }
 0x7ce   : > { %v7572_v60 = vpop.f32.mrb[218].mxu1 }
 0x7cf   : > { %v4345_v61 = vpop.f32.mrb[219].mxu1 }
 0x7d0   : > { %7698 = vmatprep.mubr.f32.mxu0 %v4345_v61 }
 0x7d1   : > { %7699 = vmatmul.mubr.f32.gmra.mrb[26].mxu0 %v7572_v60 }
 0x7d2   : > { %v7575_v62 = vpop.f32.mrb[220].mxu1 }
 0x7d3   : > { %v4355_v63 = vpop.f32.mrb[221].mxu1 }
 0x7d4   : > { %7701 = vmatprep.mubr.f32.mxu0 %v4355_v63 }
 0x7d5   : > { %7702 = vmatmul.mubr.f32.gmra.mrb[28].mxu0 %v7575_v62 }
 0x7d6   : > { %v7578_v0 = vpop.f32.mrb[222].mxu1 }
 0x7d7   : > { %v4365_v1 = vpop.f32.mrb[223].mxu1 }
 0x7d8   : > { %7704 = vmatprep.mubr.f32.mxu0 %v4365_v1 }
 0x7d9   : > { %7705 = vmatmul.mubr.f32.gmra.mrb[30].mxu0 %v7578_v0 }
 0x830   : > { %v7613_v2 = vpop.f32.mrb[224].mxu0 }
 0x831   : > { %v4469_v3 = vadd.f32 %v7613_v2, %v9949_v25  ;;  %v4463_v4 = vpop.f32.mrb[225].mxu0 }
 0x832   : > { %v4464_v5 = vadd.f32 %v9949_v25, %v4463_v4 }
 0x833   : > { %v4783_v8 = vmax.f32 %v4469_v3, 0.0 }
 0x834   : > { %v4782_v6 = vmax.f32 %v4464_v5, 0.0  ;;  %v7616_v7 = vpop.f32.mrb[226].mxu0 }
 0x835   : > { %v4479_v10 = vadd.f32 %v7616_v7, %v9949_v25  ;;  %v4473_v11 = vpop.f32.mrb[227].mxu0 }
 0x836   : > { %v4474_v12 = vadd.f32 %v9949_v25, %v4473_v11  ;;  %7739 = vmatprep.mubr.f32.mxu1 %v4782_v6 }
 0x837   : > { %7740 = vmatmul.mubr.f32.vlgmr.msra.gmra.mrb[224].mxu1 %v4783_v8  ;;  %v4785_v15 = vmax.f32 %v4479_v10, 0.0 }
 0x838   : > { %v4784_v13 = vmax.f32 %v4474_v12, 0.0  ;;  %v7619_v14 = vpop.f32.mrb[228].mxu0 }
 0x839   : > { %v4489_v16 = vadd.f32 %v7619_v14, %v9949_v25  ;;  %v4483_v17 = vpop.f32.mrb[229].mxu0 }
 0x83a   : > { %v4484_v18 = vadd.f32 %v9949_v25, %v4483_v17  ;;  %7742 = vmatprep.mubr.f32.mxu1 %v4784_v13 }
 0x83b   : > { %7743 = vmatmul.mubr.f32.gmra.mrb[226].mxu1 %v4785_v15  ;;  %v4787_v22 = vmax.f32 %v4489_v16, 0.0 }
 0x83c   : > { %v4786_v19 = vmax.f32 %v4484_v18, 0.0  ;;  %v7622_v21 = vpop.f32.mrb[230].mxu0 }
 0x83d   : > { %v4499_v23 = vadd.f32 %v7622_v21, %v9949_v25  ;;  %v4493_v24 = vpop.f32.mrb[231].mxu0 }
 0x83e   : > { %v4494_v26 = vadd.f32 %v9949_v25, %v4493_v24  ;;  %7745 = vmatprep.mubr.f32.mxu1 %v4786_v19 }
 0x83f   : > { %7746 = vmatmul.mubr.f32.gmra.mrb[228].mxu1 %v4787_v22  ;;  %v4789_v28 = vmax.f32 %v4499_v23, 0.0 }
 0x840   : > { %v4788_v27 = vmax.f32 %v4494_v26, 0.0  ;;  %v7625_v48 = vpop.f32.mrb[232].mxu0 }
 0x841   : > { %v4509_v29 = vadd.f32 %v7625_v48, %v9949_v25  ;;  %v4503_v20 = vpop.f32.mrb[233].mxu0 }
 0x842   : > { %v4504_v30 = vadd.f32 %v9949_v25, %v4503_v20  ;;  %7748 = vmatprep.mubr.f32.mxu1 %v4788_v27 }
 0x843   : > { %7749 = vmatmul.mubr.f32.gmra.mrb[230].mxu1 %v4789_v28  ;;  %v4791_v32 = vmax.f32 %v4509_v29, 0.0 }
 0x844   : > { %v4790_v9 = vmax.f32 %v4504_v30, 0.0  ;;  %v7628_v31 = vpop.f32.mrb[234].mxu0 }
 0x845   : > { %v4519_v33 = vadd.f32 %v7628_v31, %v9949_v25  ;;  %v4513_v34 = vpop.f32.mrb[235].mxu0 }
 0x846   : > { %v4514_v35 = vadd.f32 %v9949_v25, %v4513_v34  ;;  %7751 = vmatprep.mubr.f32.mxu1 %v4790_v9 }
 0x847   : > { %7752 = vmatmul.mubr.f32.gmra.mrb[232].mxu1 %v4791_v32  ;;  %v4793_v38 = vmax.f32 %v4519_v33, 0.0 }
 0x848   : > { %v4792_v36 = vmax.f32 %v4514_v35, 0.0  ;;  %v7631_v37 = vpop.f32.mrb[236].mxu0 }
 0x849   : > { %v4529_v39 = vadd.f32 %v7631_v37, %v9949_v25  ;;  %v4523_v40 = vpop.f32.mrb[237].mxu0 }
 0x84a   : > { %v4524_v41 = vadd.f32 %v9949_v25, %v4523_v40  ;;  %7754 = vmatprep.mubr.f32.mxu1 %v4792_v36 }
 0x84b   : > { %7755 = vmatmul.mubr.f32.gmra.mrb[234].mxu1 %v4793_v38  ;;  %v4795_v45 = vmax.f32 %v4529_v39, 0.0 }
 0x84c   : > { %v4794_v42 = vmax.f32 %v4524_v41, 0.0  ;;  %v7634_v44 = vpop.f32.mrb[238].mxu0 }
 0x84d   : > { %v4539_v46 = vadd.f32 %v7634_v44, %v9949_v25  ;;  %v4533_v47 = vpop.f32.mrb[239].mxu0 }
 0x84e   : > { %v4534_v49 = vadd.f32 %v9949_v25, %v4533_v47  ;;  %7757 = vmatprep.mubr.f32.mxu1 %v4794_v42 }
 0x84f   : > { %7758 = vmatmul.mubr.f32.gmra.mrb[236].mxu1 %v4795_v45  ;;  %v4797_v52 = vmax.f32 %v4539_v46, 0.0 }
 0x850   : > { %v4796_v50 = vmax.f32 %v4534_v49, 0.0  ;;  %v7637_v51 = vpop.f32.mrb[240].mxu0 }
 0x851   : > { %v4549_v43 = vadd.f32 %v7637_v51, %v9949_v25  ;;  %v4543_v53 = vpop.f32.mrb[241].mxu0 }
 0x852   : > { %v4544_v54 = vadd.f32 %v9949_v25, %v4543_v53  ;;  %7760 = vmatprep.mubr.f32.mxu1 %v4796_v50 }
 0x853   : > { %7761 = vmatmul.mubr.f32.gmra.mrb[238].mxu1 %v4797_v52  ;;  %v4799_v57 = vmax.f32 %v4549_v43, 0.0 }
 0x854   : > { %v4798_v55 = vmax.f32 %v4544_v54, 0.0  ;;  %v7640_v56 = vpop.f32.mrb[242].mxu0 }
 0x855   : > { %v4559_v58 = vadd.f32 %v7640_v56, %v9949_v25  ;;  %v4553_v59 = vpop.f32.mrb[243].mxu0 }
 0x856   : > { %v4554_v60 = vadd.f32 %v9949_v25, %v4553_v59  ;;  %7763 = vmatprep.mubr.f32.mxu1 %v4798_v55 }
 0x857   : > { %7764 = vmatmul.mubr.f32.gmra.mrb[240].mxu1 %v4799_v57  ;;  %v4801_v63 = vmax.f32 %v4559_v58, 0.0 }
 0x858   : > { %v4800_v61 = vmax.f32 %v4554_v60, 0.0  ;;  %v7643_v62 = vpop.f32.mrb[244].mxu0 }
 0x859   : > { %v4569_v0 = vadd.f32 %v7643_v62, %v9949_v25  ;;  %v4563_v1 = vpop.f32.mrb[245].mxu0 }
 0x85a   : > { %v4564_v2 = vadd.f32 %v9949_v25, %v4563_v1  ;;  %7766 = vmatprep.mubr.f32.mxu1 %v4800_v61 }
 0x85b   : > { %7767 = vmatmul.mubr.f32.gmra.mrb[242].mxu1 %v4801_v63  ;;  %v4803_v5 = vmax.f32 %v4569_v0, 0.0 }
 0x85c   : > { %v4802_v3 = vmax.f32 %v4564_v2, 0.0  ;;  %v7646_v4 = vpop.f32.mrb[246].mxu0 }
 0x85d   : > { %v4579_v6 = vadd.f32 %v7646_v4, %v9949_v25  ;;  %v4573_v7 = vpop.f32.mrb[247].mxu0 }
 0x85e   : > { %v4574_v8 = vadd.f32 %v9949_v25, %v4573_v7  ;;  %7769 = vmatprep.mubr.f32.mxu1 %v4802_v3 }
 0x85f   : > { %7770 = vmatmul.mubr.f32.gmra.mrb[244].mxu1 %v4803_v5  ;;  %v4805_v12 = vmax.f32 %v4579_v6, 0.0 }
 0x860   : > { %v4804_v10 = vmax.f32 %v4574_v8, 0.0  ;;  %v7649_v11 = vpop.f32.mrb[248].mxu0 }
 0x861   : > { %v4589_v13 = vadd.f32 %v7649_v11, %v9949_v25  ;;  %v4583_v14 = vpop.f32.mrb[249].mxu0 }
 0x862   : > { %v4584_v15 = vadd.f32 %v9949_v25, %v4583_v14  ;;  %7772 = vmatprep.mubr.f32.mxu1 %v4804_v10 }
 0x863   : > { %7773 = vmatmul.mubr.f32.gmra.mrb[246].mxu1 %v4805_v12  ;;  %v4807_v18 = vmax.f32 %v4589_v13, 0.0 }
 0x864   : > { %v4806_v16 = vmax.f32 %v4584_v15, 0.0  ;;  %v7652_v17 = vpop.f32.mrb[250].mxu0 }
 0x865   : > { %v4599_v19 = vadd.f32 %v7652_v17, %v9949_v25  ;;  %v4593_v21 = vpop.f32.mrb[251].mxu0 }
 0x866   : > { %v4594_v22 = vadd.f32 %v9949_v25, %v4593_v21  ;;  %7775 = vmatprep.mubr.f32.mxu1 %v4806_v16 }
 0x867   : > { %7776 = vmatmul.mubr.f32.gmra.mrb[248].mxu1 %v4807_v18  ;;  %v4809_v26 = vmax.f32 %v4599_v19, 0.0 }
 0x868   : > { %v4808_v23 = vmax.f32 %v4594_v22, 0.0  ;;  %v7655_v24 = vpop.f32.mrb[252].mxu0 }
 0x869   : > { %v4609_v27 = vadd.f32 %v7655_v24, %v9949_v25  ;;  %v4603_v48 = vpop.f32.mrb[253].mxu0 }
 0x86a   : > { %v4604_v28 = vadd.f32 %v9949_v25, %v4603_v48  ;;  %7778 = vmatprep.mubr.f32.mxu1 %v4808_v23 }
 0x86b   : > { %7779 = vmatmul.mubr.f32.gmra.mrb[250].mxu1 %v4809_v26  ;;  %v4811_v30 = vmax.f32 %v4609_v27, 0.0 }
 0x86c   : > { %v4810_v29 = vmax.f32 %v4604_v28, 0.0  ;;  %v7658_v20 = vpop.f32.mrb[254].mxu0 }
 0x86d   : > { %v4619_v9 = vadd.f32 %v7658_v20, %v9949_v25  ;;  %v4613_v31 = vpop.f32.mrb[255].mxu0 }
 0x86e   : > { %v4614_v32 = vadd.f32 %v9949_v25, %v4613_v31  ;;  %7781 = vmatprep.mubr.f32.mxu1 %v4810_v29 }
 0x86f   : > { %7782 = vmatmul.mubr.f32.gmra.mrb[252].mxu1 %v4811_v30  ;;  %v4813_v35 = vmax.f32 %v4619_v9, 0.0 }
 0x870   : > { %v4812_v33 = vmax.f32 %v4614_v32, 0.0  ;;  %v7661_v34 = vpop.f32.mrb[0].mxu0 }
 0x871   : > { %v4629_v36 = vadd.f32 %v7661_v34, %v9949_v25  ;;  %v4623_v37 = vpop.f32.mrb[1].mxu0 }
 0x872   : > { %v4624_v38 = vadd.f32 %v9949_v25, %v4623_v37  ;;  %7784 = vmatprep.mubr.f32.mxu1 %v4812_v33 }
 0x873   : > { %7785 = vmatmul.mubr.f32.gmra.mrb[254].mxu1 %v4813_v35  ;;  %v4815_v41 = vmax.f32 %v4629_v36, 0.0 }
 0x874   : > { %v4814_v39 = vmax.f32 %v4624_v38, 0.0  ;;  %v7664_v40 = vpop.f32.mrb[2].mxu0 }
 0x875   : > { %v4639_v42 = vadd.f32 %v7664_v40, %v9949_v25  ;;  %v4633_v44 = vpop.f32.mrb[3].mxu0 }
 0x876   : > { %v4634_v45 = vadd.f32 %v9949_v25, %v4633_v44  ;;  %7787 = vmatprep.mubr.f32.mxu1 %v4814_v39 }
 0x877   : > { %7788 = vmatmul.mubr.f32.gmra.mrb[0].mxu1 %v4815_v41  ;;  %v4817_v49 = vmax.f32 %v4639_v42, 0.0 }
 0x878   : > { %v4816_v46 = vmax.f32 %v4634_v45, 0.0  ;;  %v7667_v47 = vpop.f32.mrb[4].mxu0 }
 0x879   : > { %v4649_v50 = vadd.f32 %v7667_v47, %v9949_v25  ;;  %v4643_v51 = vpop.f32.mrb[5].mxu0 }
 0x87a   : > { %v4644_v52 = vadd.f32 %v9949_v25, %v4643_v51  ;;  %7790 = vmatprep.mubr.f32.mxu1 %v4816_v46 }
 0x87b   : > { %7791 = vmatmul.mubr.f32.gmra.mrb[2].mxu1 %v4817_v49  ;;  %v4819_v54 = vmax.f32 %v4649_v50, 0.0 }
 0x87c   : > { %v4818_v43 = vmax.f32 %v4644_v52, 0.0  ;;  %v7670_v53 = vpop.f32.mrb[6].mxu0 }
 0x87d   : > { %v4659_v55 = vadd.f32 %v7670_v53, %v9949_v25  ;;  %v4653_v56 = vpop.f32.mrb[7].mxu0 }
 0x87e   : > { %v4654_v57 = vadd.f32 %v9949_v25, %v4653_v56  ;;  %7793 = vmatprep.mubr.f32.mxu1 %v4818_v43 }
 0x87f   : > { %7794 = vmatmul.mubr.f32.gmra.mrb[4].mxu1 %v4819_v54  ;;  %v4821_v60 = vmax.f32 %v4659_v55, 0.0 }
 0x880   : > { %v4820_v58 = vmax.f32 %v4654_v57, 0.0  ;;  %v7673_v59 = vpop.f32.mrb[8].mxu0 }
 0x881   : > { %v4669_v61 = vadd.f32 %v7673_v59, %v9949_v25  ;;  %v4663_v62 = vpop.f32.mrb[9].mxu0 }
 0x882   : > { %v4664_v63 = vadd.f32 %v9949_v25, %v4663_v62  ;;  %7796 = vmatprep.mubr.f32.mxu1 %v4820_v58 }
 0x883   : > { %7797 = vmatmul.mubr.f32.gmra.mrb[6].mxu1 %v4821_v60  ;;  %v4823_v2 = vmax.f32 %v4669_v61, 0.0 }
 0x884   : > { %v4822_v0 = vmax.f32 %v4664_v63, 0.0  ;;  %v7676_v1 = vpop.f32.mrb[10].mxu0 }
 0x885   : > { %v4679_v3 = vadd.f32 %v7676_v1, %v9949_v25  ;;  %v4673_v4 = vpop.f32.mrb[11].mxu0 }
 0x886   : > { %v4674_v5 = vadd.f32 %v9949_v25, %v4673_v4  ;;  %7799 = vmatprep.mubr.f32.mxu1 %v4822_v0 }
 0x887   : > { %7800 = vmatmul.mubr.f32.gmra.mrb[8].mxu1 %v4823_v2  ;;  %v4825_v8 = vmax.f32 %v4679_v3, 0.0 }
 0x888   : > { %v4824_v6 = vmax.f32 %v4674_v5, 0.0  ;;  %v7679_v7 = vpop.f32.mrb[12].mxu0  ;;  %v10018_v5 = vld [vmem:[%s10265_s5] ss:$0 sm:$0xff] }
 0x889   : > { %v4689_v10 = vadd.f32 %v7679_v7, %v9949_v25  ;;  %v4683_v11 = vpop.f32.mrb[13].mxu0 }
 0x88a   : > { %v4684_v12 = vadd.f32 %v9949_v25, %v4683_v11  ;;  %7802 = vmatprep.mubr.f32.mxu1 %v4824_v6 }
 0x88b   : > { %7803 = vmatmul.mubr.f32.gmra.mrb[10].mxu1 %v4825_v8  ;;  %v4827_v15 = vmax.f32 %v4689_v10, 0.0 }
 0x88c   : > { %v4826_v13 = vmax.f32 %v4684_v12, 0.0  ;;  %v7682_v14 = vpop.f32.mrb[14].mxu0 }
 0x88d   : > { %v4699_v16 = vadd.f32 %v7682_v14, %v9949_v25  ;;  %v4693_v17 = vpop.f32.mrb[15].mxu0 }
 0x88e   : > { %v4694_v18 = vadd.f32 %v9949_v25, %v4693_v17  ;;  %7805 = vmatprep.mubr.f32.mxu1 %v4826_v13 }
 0x88f   : > { %7806 = vmatmul.mubr.f32.gmra.mrb[12].mxu1 %v4827_v15  ;;  %v4829_v22 = vmax.f32 %v4699_v16, 0.0 }
 0x890   : > { %v4828_v19 = vmax.f32 %v4694_v18, 0.0  ;;  %v7685_v21 = vpop.f32.mrb[16].mxu0 }
 0x891   : > { %v4709_v23 = vadd.f32 %v7685_v21, %v9949_v25  ;;  %v4703_v24 = vpop.f32.mrb[17].mxu0 }
 0x892   : > { %v4704_v26 = vadd.f32 %v9949_v25, %v4703_v24  ;;  %7808 = vmatprep.mubr.f32.mxu1 %v4828_v19 }
 0x893   : > { %7809 = vmatmul.mubr.f32.gmra.mrb[14].mxu1 %v4829_v22  ;;  %v4831_v28 = vmax.f32 %v4709_v23, 0.0 }
 0x894   : > { %v4830_v27 = vmax.f32 %v4704_v26, 0.0  ;;  %v7688_v48 = vpop.f32.mrb[18].mxu0 }
 0x895   : > { %v4719_v29 = vadd.f32 %v7688_v48, %v9949_v25  ;;  %v4713_v20 = vpop.f32.mrb[19].mxu0 }
 0x896   : > { %v4714_v30 = vadd.f32 %v9949_v25, %v4713_v20  ;;  %7811 = vmatprep.mubr.f32.mxu1 %v4830_v27 }
 0x897   : > { %7812 = vmatmul.mubr.f32.gmra.mrb[16].mxu1 %v4831_v28  ;;  %v4833_v32 = vmax.f32 %v4719_v29, 0.0 }
 0x898   : > { %v4832_v9 = vmax.f32 %v4714_v30, 0.0  ;;  %v7691_v31 = vpop.f32.mrb[20].mxu0 }
 0x899   : > { %v4729_v33 = vadd.f32 %v7691_v31, %v9949_v25  ;;  %v4723_v34 = vpop.f32.mrb[21].mxu0 }
 0x89a   : > { %v4724_v35 = vadd.f32 %v9949_v25, %v4723_v34  ;;  %7814 = vmatprep.mubr.f32.mxu1 %v4832_v9 }
 0x89b   : > { %7815 = vmatmul.mubr.f32.gmra.mrb[18].mxu1 %v4833_v32  ;;  %v4835_v38 = vmax.f32 %v4729_v33, 0.0 }
 0x89c   : > { %v4834_v36 = vmax.f32 %v4724_v35, 0.0  ;;  %v7694_v37 = vpop.f32.mrb[22].mxu0 }
 0x89d   : > { %v4739_v39 = vadd.f32 %v7694_v37, %v9949_v25  ;;  %v4733_v40 = vpop.f32.mrb[23].mxu0 }
 0x89e   : > { %v4734_v41 = vadd.f32 %v9949_v25, %v4733_v40  ;;  %7817 = vmatprep.mubr.f32.mxu1 %v4834_v36 }
 0x89f   : > { %7818 = vmatmul.mubr.f32.gmra.mrb[20].mxu1 %v4835_v38  ;;  %v4837_v45 = vmax.f32 %v4739_v39, 0.0 }
 0x8a0   : > { %v4836_v42 = vmax.f32 %v4734_v41, 0.0  ;;  %v7697_v44 = vpop.f32.mrb[24].mxu0 }
 0x8a1   : > { %v4749_v46 = vadd.f32 %v7697_v44, %v9949_v25  ;;  %v4743_v47 = vpop.f32.mrb[25].mxu0 }
 0x8a2   : > { %v4744_v49 = vadd.f32 %v9949_v25, %v4743_v47  ;;  %7820 = vmatprep.mubr.f32.mxu1 %v4836_v42 }
 0x8a3   : > { %7821 = vmatmul.mubr.f32.gmra.mrb[22].mxu1 %v4837_v45  ;;  %v4839_v52 = vmax.f32 %v4749_v46, 0.0 }
 0x8a4   : > { %v4838_v50 = vmax.f32 %v4744_v49, 0.0  ;;  %v7700_v51 = vpop.f32.mrb[26].mxu0 }
 0x8a5   : > { %v4759_v43 = vadd.f32 %v7700_v51, %v9949_v25  ;;  %v4753_v53 = vpop.f32.mrb[27].mxu0 }
 0x8a6   : > { %v4754_v54 = vadd.f32 %v9949_v25, %v4753_v53  ;;  %7823 = vmatprep.mubr.f32.mxu1 %v4838_v50 }
 0x8a7   : > { %7824 = vmatmul.mubr.f32.gmra.mrb[24].mxu1 %v4839_v52  ;;  %v4841_v57 = vmax.f32 %v4759_v43, 0.0 }
 0x8a8   : > { %v4840_v55 = vmax.f32 %v4754_v54, 0.0  ;;  %v7703_v56 = vpop.f32.mrb[28].mxu0 }
 0x8a9   : > { %v4769_v58 = vadd.f32 %v7703_v56, %v9949_v25  ;;  %v4763_v59 = vpop.f32.mrb[29].mxu0 }
 0x8aa   : > { %v4764_v60 = vadd.f32 %v9949_v25, %v4763_v59  ;;  %7826 = vmatprep.mubr.f32.mxu1 %v4840_v55 }
 0x8ab   : > { %7827 = vmatmul.mubr.f32.gmra.mrb[26].mxu1 %v4841_v57  ;;  %v4843_v63 = vmax.f32 %v4769_v58, 0.0 }
 0x8ac   : > { %v4842_v61 = vmax.f32 %v4764_v60, 0.0  ;;  %v7706_v62 = vpop.f32.mrb[30].mxu0 }
 0x8ad   : > { %v4779_v0 = vadd.f32 %v7706_v62, %v9949_v25  ;;  %v4773_v1 = vpop.f32.mrb[31].mxu0 }
 0x8ae   : > { %v4774_v2 = vadd.f32 %v9949_v25, %v4773_v1  ;;  %7829 = vmatprep.mubr.f32.mxu1 %v4842_v61 }
 0x8af   : > { %7830 = vmatmul.mubr.f32.gmra.mrb[28].mxu1 %v4843_v63  ;;  %v4845_v4 = vmax.f32 %v4779_v0, 0.0 }
 0x8b0   : > { %v4844_v3 = vmax.f32 %v4774_v2, 0.0 }
 0x8b2   : > { %7832 = vmatprep.mubr.f32.mxu1 %v4844_v3 }
 0x8b3   : > { %7833 = vmatmul.mubr.f32.gmra.mrb[30].mxu1 %v4845_v4 }
 0x90a   : > { %v7741_v6 = vpop.f32.mrb[224].mxu1 }
 0x90b   : > { %v4941_v7 = vadd.f32 %v7741_v6, %v10018_v5  ;;  %v4935_v8 = vpop.f32.mrb[225].mxu1 }
 0x90c   : > { %v4936_v10 = vadd.f32 %v10018_v5, %v4935_v8 }
 0x90d   : > { %5255 = vst [vmem:[%s10023_s23 + $0x8] sm:$0xff] %v4941_v7 }
 0x90e   : > { %5254 = vst [vmem:[%s10023_s23] sm:$0xff] %v4936_v10  ;;  %v7744_v25 = vpop.f32.mrb[226].mxu1 }
 0x90f   : > { %v4951_v11 = vadd.f32 %v7744_v25, %v10018_v5  ;;  %v4945_v12 = vpop.f32.mrb[227].mxu1 }
 0x910   : > { %v4946_v13 = vadd.f32 %v10018_v5, %v4945_v12 }
 0x911   : > { %5257 = vst [vmem:[%s10023_s23 + $0x18] sm:$0xff] %v4951_v11 }
 0x912   : > { %5256 = vst [vmem:[%s10023_s23 + $0x10] sm:$0xff] %v4946_v13  ;;  %v7747_v14 = vpop.f32.mrb[228].mxu1 }
 0x913   : > { %v4961_v15 = vadd.f32 %v7747_v14, %v10018_v5  ;;  %v4955_v16 = vpop.f32.mrb[229].mxu1 }
 0x914   : > { %v4956_v17 = vadd.f32 %v10018_v5, %v4955_v16 }
 0x915   : > { %5259 = vst [vmem:[%s10023_s23 + $0x28] sm:$0xff] %v4961_v15 }
 0x916   : > { %5258 = vst [vmem:[%s10023_s23 + $0x20] sm:$0xff] %v4956_v17  ;;  %v7750_v18 = vpop.f32.mrb[230].mxu1 }
 0x917   : > { %v4971_v19 = vadd.f32 %v7750_v18, %v10018_v5  ;;  %v4965_v21 = vpop.f32.mrb[231].mxu1 }
 0x918   : > { %v4966_v22 = vadd.f32 %v10018_v5, %v4965_v21 }
 0x919   : > { %5261 = vst [vmem:[%s10023_s23 + $0x38] sm:$0xff] %v4971_v19 }
 0x91a   : > { %5260 = vst [vmem:[%s10023_s23 + $0x30] sm:$0xff] %v4966_v22  ;;  %v7753_v23 = vpop.f32.mrb[232].mxu1 }
 0x91b   : > { %v4981_v24 = vadd.f32 %v7753_v23, %v10018_v5  ;;  %v4975_v26 = vpop.f32.mrb[233].mxu1 }
 0x91c   : > { %v4976_v27 = vadd.f32 %v10018_v5, %v4975_v26 }
 0x91d   : > { %5263 = vst [vmem:[%s10023_s23 + $0x48] sm:$0xff] %v4981_v24 }
 0x91e   : > { %5262 = vst [vmem:[%s10023_s23 + $0x40] sm:$0xff] %v4976_v27  ;;  %v7756_v48 = vpop.f32.mrb[234].mxu1 }
 0x91f   : > { %v4991_v28 = vadd.f32 %v7756_v48, %v10018_v5  ;;  %v4985_v29 = vpop.f32.mrb[235].mxu1 }
 0x920   : > { %v4986_v20 = vadd.f32 %v10018_v5, %v4985_v29 }
 0x921   : > { %5265 = vst [vmem:[%s10023_s23 + $0x58] sm:$0xff] %v4991_v28 }
 0x922   : > { %5264 = vst [vmem:[%s10023_s23 + $0x50] sm:$0xff] %v4986_v20  ;;  %v7759_v30 = vpop.f32.mrb[236].mxu1 }
 0x923   : > { %v5001_v9 = vadd.f32 %v7759_v30, %v10018_v5  ;;  %v4995_v31 = vpop.f32.mrb[237].mxu1 }
 0x924   : > { %v4996_v32 = vadd.f32 %v10018_v5, %v4995_v31 }
 0x925   : > { %5267 = vst [vmem:[%s10023_s23 + $0x68] sm:$0xff] %v5001_v9 }
 0x926   : > { %5266 = vst [vmem:[%s10023_s23 + $0x60] sm:$0xff] %v4996_v32  ;;  %v7762_v33 = vpop.f32.mrb[238].mxu1 }
 0x927   : > { %v5011_v34 = vadd.f32 %v7762_v33, %v10018_v5  ;;  %v5005_v35 = vpop.f32.mrb[239].mxu1 }
 0x928   : > { %v5006_v36 = vadd.f32 %v10018_v5, %v5005_v35 }
 0x929   : > { %5269 = vst [vmem:[%s10023_s23 + $0x78] sm:$0xff] %v5011_v34 }
 0x92a   : > { %5268 = vst [vmem:[%s10023_s23 + $0x70] sm:$0xff] %v5006_v36  ;;  %v7765_v37 = vpop.f32.mrb[240].mxu1 }
 0x92b   : > { %v5021_v38 = vadd.f32 %v7765_v37, %v10018_v5  ;;  %v5015_v39 = vpop.f32.mrb[241].mxu1 }
 0x92c   : > { %v5016_v40 = vadd.f32 %v10018_v5, %v5015_v39 }
 0x92d   : > { %5271 = vst [vmem:[%s10023_s23 + $0x88] sm:$0xff] %v5021_v38 }
 0x92e   : > { %5270 = vst [vmem:[%s10023_s23 + $0x80] sm:$0xff] %v5016_v40  ;;  %v7768_v41 = vpop.f32.mrb[242].mxu1 }
 0x92f   : > { %v5031_v42 = vadd.f32 %v7768_v41, %v10018_v5  ;;  %v5025_v44 = vpop.f32.mrb[243].mxu1 }
 0x930   : > { %v5026_v45 = vadd.f32 %v10018_v5, %v5025_v44 }
 0x931   : > { %5273 = vst [vmem:[%s10023_s23 + $0x98] sm:$0xff] %v5031_v42 }
 0x932   : > { %5272 = vst [vmem:[%s10023_s23 + $0x90] sm:$0xff] %v5026_v45  ;;  %v7771_v46 = vpop.f32.mrb[244].mxu1 }
 0x933   : > { %v5041_v47 = vadd.f32 %v7771_v46, %v10018_v5  ;;  %v5035_v49 = vpop.f32.mrb[245].mxu1 }
 0x934   : > { %v5036_v50 = vadd.f32 %v10018_v5, %v5035_v49 }
 0x935   : > { %5275 = vst [vmem:[%s10023_s23 + $0xa8] sm:$0xff] %v5041_v47 }
 0x936   : > { %5274 = vst [vmem:[%s10023_s23 + $0xa0] sm:$0xff] %v5036_v50  ;;  %v7774_v51 = vpop.f32.mrb[246].mxu1 }
 0x937   : > { %v5051_v52 = vadd.f32 %v7774_v51, %v10018_v5  ;;  %v5045_v43 = vpop.f32.mrb[247].mxu1 }
 0x938   : > { %v5046_v53 = vadd.f32 %v10018_v5, %v5045_v43 }
 0x939   : > { %5277 = vst [vmem:[%s10023_s23 + $0xb8] sm:$0xff] %v5051_v52 }
 0x93a   : > { %5276 = vst [vmem:[%s10023_s23 + $0xb0] sm:$0xff] %v5046_v53  ;;  %v7777_v54 = vpop.f32.mrb[248].mxu1 }
 0x93b   : > { %v5061_v55 = vadd.f32 %v7777_v54, %v10018_v5  ;;  %v5055_v56 = vpop.f32.mrb[249].mxu1 }
 0x93c   : > { %v5056_v57 = vadd.f32 %v10018_v5, %v5055_v56 }
 0x93d   : > { %5279 = vst [vmem:[%s10023_s23 + $0xc8] sm:$0xff] %v5061_v55 }
 0x93e   : > { %5278 = vst [vmem:[%s10023_s23 + $0xc0] sm:$0xff] %v5056_v57  ;;  %v7780_v58 = vpop.f32.mrb[250].mxu1 }
 0x93f   : > { %v5071_v59 = vadd.f32 %v7780_v58, %v10018_v5  ;;  %v5065_v60 = vpop.f32.mrb[251].mxu1 }
 0x940   : > { %v5066_v61 = vadd.f32 %v10018_v5, %v5065_v60 }
 0x941   : > { %5281 = vst [vmem:[%s10023_s23 + $0xd8] sm:$0xff] %v5071_v59 }
 0x942   : > { %5280 = vst [vmem:[%s10023_s23 + $0xd0] sm:$0xff] %v5066_v61  ;;  %v7783_v62 = vpop.f32.mrb[252].mxu1 }
 0x943   : > { %v5081_v63 = vadd.f32 %v7783_v62, %v10018_v5  ;;  %v5075_v0 = vpop.f32.mrb[253].mxu1 }
 0x944   : > { %v5076_v1 = vadd.f32 %v10018_v5, %v5075_v0 }
 0x945   : > { %5283 = vst [vmem:[%s10023_s23 + $0xe8] sm:$0xff] %v5081_v63 }
 0x946   : > { %5282 = vst [vmem:[%s10023_s23 + $0xe0] sm:$0xff] %v5076_v1  ;;  %v7786_v2 = vpop.f32.mrb[254].mxu1 }
 0x947   : > { %v5091_v3 = vadd.f32 %v7786_v2, %v10018_v5  ;;  %v5085_v4 = vpop.f32.mrb[255].mxu1 }
 0x948   : > { %v5086_v6 = vadd.f32 %v10018_v5, %v5085_v4 }
 0x949   : > { %5285 = vst [vmem:[%s10023_s23 + $0xf8] sm:$0xff] %v5091_v3 }
 0x94a   : > { %5284 = vst [vmem:[%s10023_s23 + $0xf0] sm:$0xff] %v5086_v6  ;;  %v7789_v7 = vpop.f32.mrb[0].mxu1 }
 0x94b   : > { %v5101_v8 = vadd.f32 %v7789_v7, %v10018_v5  ;;  %v5095_v10 = vpop.f32.mrb[1].mxu1 }
 0x94c   : > { %v5096_v25 = vadd.f32 %v10018_v5, %v5095_v10 }
 0x94d   : > { %5287 = vst [vmem:[%s10023_s23 + $0x108] sm:$0xff] %v5101_v8 }
 0x94e   : > { %5286 = vst [vmem:[%s10023_s23 + $0x100] sm:$0xff] %v5096_v25  ;;  %v7792_v11 = vpop.f32.mrb[2].mxu1 }
 0x94f   : > { %v5111_v12 = vadd.f32 %v7792_v11, %v10018_v5  ;;  %v5105_v13 = vpop.f32.mrb[3].mxu1 }
 0x950   : > { %v5106_v14 = vadd.f32 %v10018_v5, %v5105_v13 }
 0x951   : > { %5289 = vst [vmem:[%s10023_s23 + $0x118] sm:$0xff] %v5111_v12 }
 0x952   : > { %5288 = vst [vmem:[%s10023_s23 + $0x110] sm:$0xff] %v5106_v14  ;;  %v7795_v15 = vpop.f32.mrb[4].mxu1 }
 0x953   : > { %v5121_v16 = vadd.f32 %v7795_v15, %v10018_v5  ;;  %v5115_v17 = vpop.f32.mrb[5].mxu1 }
 0x954   : > { %v5116_v18 = vadd.f32 %v10018_v5, %v5115_v17 }
 0x955   : > { %5291 = vst [vmem:[%s10023_s23 + $0x128] sm:$0xff] %v5121_v16 }
 0x956   : > { %5290 = vst [vmem:[%s10023_s23 + $0x120] sm:$0xff] %v5116_v18  ;;  %v7798_v19 = vpop.f32.mrb[6].mxu1 }
 0x957   : > { %v5131_v21 = vadd.f32 %v7798_v19, %v10018_v5  ;;  %v5125_v22 = vpop.f32.mrb[7].mxu1 }
 0x958   : > { %v5126_v23 = vadd.f32 %v10018_v5, %v5125_v22 }
 0x959   : > { %5293 = vst [vmem:[%s10023_s23 + $0x138] sm:$0xff] %v5131_v21 }
 0x95a   : > { %5292 = vst [vmem:[%s10023_s23 + $0x130] sm:$0xff] %v5126_v23  ;;  %v7801_v24 = vpop.f32.mrb[8].mxu1 }
 0x95b   : > { %v5141_v26 = vadd.f32 %v7801_v24, %v10018_v5  ;;  %v5135_v27 = vpop.f32.mrb[9].mxu1 }
 0x95c   : > { %v5136_v48 = vadd.f32 %v10018_v5, %v5135_v27 }
 0x95d   : > { %5295 = vst [vmem:[%s10023_s23 + $0x148] sm:$0xff] %v5141_v26 }
 0x95e   : > { %5294 = vst [vmem:[%s10023_s23 + $0x140] sm:$0xff] %v5136_v48  ;;  %v7804_v28 = vpop.f32.mrb[10].mxu1 }
 0x95f   : > { %v5151_v29 = vadd.f32 %v7804_v28, %v10018_v5  ;;  %v5145_v20 = vpop.f32.mrb[11].mxu1 }
 0x960   : > { %v5146_v30 = vadd.f32 %v10018_v5, %v5145_v20 }
 0x961   : > { %5297 = vst [vmem:[%s10023_s23 + $0x158] sm:$0xff] %v5151_v29 }
 0x962   : > { %5296 = vst [vmem:[%s10023_s23 + $0x150] sm:$0xff] %v5146_v30  ;;  %v7807_v9 = vpop.f32.mrb[12].mxu1 }
 0x963   : > { %v5161_v31 = vadd.f32 %v7807_v9, %v10018_v5  ;;  %v5155_v32 = vpop.f32.mrb[13].mxu1 }
 0x964   : > { %v5156_v33 = vadd.f32 %v10018_v5, %v5155_v32 }
 0x965   : > { %5299 = vst [vmem:[%s10023_s23 + $0x168] sm:$0xff] %v5161_v31 }
 0x966   : > { %5298 = vst [vmem:[%s10023_s23 + $0x160] sm:$0xff] %v5156_v33  ;;  %v7810_v34 = vpop.f32.mrb[14].mxu1 }
 0x967   : > { %v5171_v35 = vadd.f32 %v7810_v34, %v10018_v5  ;;  %v5165_v36 = vpop.f32.mrb[15].mxu1 }
 0x968   : > { %v5166_v37 = vadd.f32 %v10018_v5, %v5165_v36 }
 0x969   : > { %5301 = vst [vmem:[%s10023_s23 + $0x178] sm:$0xff] %v5171_v35 }
 0x96a   : > { %5300 = vst [vmem:[%s10023_s23 + $0x170] sm:$0xff] %v5166_v37  ;;  %v7813_v38 = vpop.f32.mrb[16].mxu1 }
 0x96b   : > { %v5181_v39 = vadd.f32 %v7813_v38, %v10018_v5  ;;  %v5175_v40 = vpop.f32.mrb[17].mxu1 }
 0x96c   : > { %v5176_v41 = vadd.f32 %v10018_v5, %v5175_v40 }
 0x96d   : > { %5303 = vst [vmem:[%s10023_s23 + $0x188] sm:$0xff] %v5181_v39 }
 0x96e   : > { %5302 = vst [vmem:[%s10023_s23 + $0x180] sm:$0xff] %v5176_v41  ;;  %v7816_v42 = vpop.f32.mrb[18].mxu1 }
 0x96f   : > { %v5191_v44 = vadd.f32 %v7816_v42, %v10018_v5  ;;  %v5185_v45 = vpop.f32.mrb[19].mxu1 }
 0x970   : > { %v5186_v46 = vadd.f32 %v10018_v5, %v5185_v45 }
 0x971   : > { %5305 = vst [vmem:[%s10023_s23 + $0x198] sm:$0xff] %v5191_v44 }
 0x972   : > { %5304 = vst [vmem:[%s10023_s23 + $0x190] sm:$0xff] %v5186_v46  ;;  %v7819_v47 = vpop.f32.mrb[20].mxu1 }
 0x973   : > { %v5201_v49 = vadd.f32 %v7819_v47, %v10018_v5  ;;  %v5195_v50 = vpop.f32.mrb[21].mxu1 }
 0x974   : > { %v5196_v51 = vadd.f32 %v10018_v5, %v5195_v50 }
 0x975   : > { %5307 = vst [vmem:[%s10023_s23 + $0x1a8] sm:$0xff] %v5201_v49 }
 0x976   : > { %5306 = vst [vmem:[%s10023_s23 + $0x1a0] sm:$0xff] %v5196_v51  ;;  %v7822_v52 = vpop.f32.mrb[22].mxu1 }
 0x977   : > { %v5211_v43 = vadd.f32 %v7822_v52, %v10018_v5  ;;  %v5205_v53 = vpop.f32.mrb[23].mxu1 }
 0x978   : > { %v5206_v54 = vadd.f32 %v10018_v5, %v5205_v53 }
 0x979   : > { %5309 = vst [vmem:[%s10023_s23 + $0x1b8] sm:$0xff] %v5211_v43 }
 0x97a   : > { %5308 = vst [vmem:[%s10023_s23 + $0x1b0] sm:$0xff] %v5206_v54  ;;  %v7825_v55 = vpop.f32.mrb[24].mxu1 }
 0x97b   : > { %v5221_v56 = vadd.f32 %v7825_v55, %v10018_v5  ;;  %v5215_v57 = vpop.f32.mrb[25].mxu1 }
 0x97c   : > { %v5216_v58 = vadd.f32 %v10018_v5, %v5215_v57 }
 0x97d   : > { %5311 = vst [vmem:[%s10023_s23 + $0x1c8] sm:$0xff] %v5221_v56 }
 0x97e   : > { %5310 = vst [vmem:[%s10023_s23 + $0x1c0] sm:$0xff] %v5216_v58  ;;  %v7828_v59 = vpop.f32.mrb[26].mxu1 }
 0x97f   : > { %v5231_v60 = vadd.f32 %v7828_v59, %v10018_v5  ;;  %v5225_v61 = vpop.f32.mrb[27].mxu1 }
 0x980   : > { %v5226_v62 = vadd.f32 %v10018_v5, %v5225_v61 }
 0x981   : > { %5313 = vst [vmem:[%s10023_s23 + $0x1d8] sm:$0xff] %v5231_v60 }
 0x982   : > { %5312 = vst [vmem:[%s10023_s23 + $0x1d0] sm:$0xff] %v5226_v62  ;;  %v7831_v63 = vpop.f32.mrb[28].mxu1 }
 0x983   : > { %v5241_v0 = vadd.f32 %v7831_v63, %v10018_v5  ;;  %v5235_v1 = vpop.f32.mrb[29].mxu1 }
 0x984   : > { %v5236_v2 = vadd.f32 %v10018_v5, %v5235_v1 }
 0x985   : > { %5315 = vst [vmem:[%s10023_s23 + $0x1e8] sm:$0xff] %v5241_v0 }
 0x986   : > { %5314 = vst [vmem:[%s10023_s23 + $0x1e0] sm:$0xff] %v5236_v2  ;;  %v7834_v3 = vpop.f32.mrb[30].mxu1 }
 0x987   : > { %v5251_v4 = vadd.f32 %v7834_v3, %v10018_v5  ;;  %v5245_v6 = vpop.f32.mrb[31].mxu1 }
 0x988   : > { %v5246_v7 = vadd.f32 %v10018_v5, %v5245_v6 }
 0x989   : > { %5317 = vst [vmem:[%s10023_s23 + $0x1f8] sm:$0xff] %v5251_v4 }
 0x98a   : > { %5316 = vst [vmem:[%s10023_s23 + $0x1f0] sm:$0xff] %v5246_v7 }
 0x98b   : > { %8895 = shalt.err (!%p8892_p3)
}
 0x98c   : > { %s8896_s2 = scalar_lea.hbm %s10153_s18, 8192  ;;  %s8900_s20 = scalar_lea.hbm %s10266_s14, 16384 }
 0x98d   : > { %p8897_p12 = scmp.ne.s32.totalorder %s10153_s18, %s8896_s2  ;;  %p8901_p0 = scmp.lt.u32.totalorder %s10153_s18, %s10266_s14 }
 0x98e   : > { %p8902_p6 = scmp.lt.u32.totalorder %s8900_s20, %s8896_s2  ;;  %p8904_p4 = scmp.lt.u32.totalorder %s8896_s2, %s10153_s18 }
 0x98f   : > { %p8898_p1 = pnand %p8897_p12, %p10267_p10 }
 0x990   : > { %p8903_p2 = por %p8902_p6, %p8901_p0 }
 0x991   : > { %p8899_p13 = pneg %p8898_p1 }
 0x992   : > { %p8905_p5 = por %p8904_p4, %p8903_p2 }
 0x994   : > { %p8906_p7 = pnand %p8905_p5, %p8899_p13 }
 0x996   : > { %8909 = shalt.err (!%p8906_p7)
}
 0x997   : > { %s8981_s23 = smov 128   ;;  %s8982_s22 = smov 8  }
 0x998   : > { %8439 = dma.vmem_to_hbm [thread:$0]  (%p10267_p10), %s10155_s11, 8192, %s10153_s18, %s5319_s19, %s8981_s23, %s8981_s23, %s8982_s22  }
 0x999 PF: > { %s5348_s13 = sand.u32 1, %s8956_s29   ;;  %p10268_p9 = scmp.ne.s32.totalorder %s10247_s24, 0 }
 0x99a   : > { %p10269_p8 = scmp.ge.s32.totalorder %s8968_s16, 2  ;;  %s5349_s8 = scalar_lea.sflag [#allocation4], %s5348_s13 }
 0x99c   : > { %p8468_p11 = pnand %p10269_p8, %p10268_p9 }
 0x99e   : > { %8951 = dma.done.wait (!%p8468_p11), %s5349_s8, 8192  }
 0x99f   : > { %8953 = vsyncadd (!%p8468_p11), %s5349_s8, 4294959104  ;;  %p33_p3 = scmp.ge.s32.totalorder %s9252_s21, 4   ;;  %s10270_s29 = smov %s8960_s30 }
 0x9a0   : > { %s10271_s30 = smov %s8964_s15  ;;  %s10272_s15 = smov %s9263_s7 }
 0x9a1   : > { %s10273_s16 = smov %s9252_s21  ;;  %35 = sbr.rel (!%p33_p3) target bundleno = 22 (0x16), region = 158 }
 0x9a8   :  { %5354 = vsyncpa [#allocation3], 1 }
 0x9a9   :  { %5356 = vsyncpa [#allocation3 + $0x1], 1 }
 0x9aa   :  { %5357 = vsyncpa [#allocation6], 1 }
 0x9ab   :  { %5359 = vsyncpa [#allocation6 + $0x1], 1 }
 0x9ac   :  { %5360 = vsyncpa [#allocation9], 1 }
 0x9ad   :  { %5361 = vsyncpa [#allocation12], 1 }
 0x9ae   :  { %5362 = vsyncpa [#allocation15], 1 }
 0x9af   :  { %5363 = vsyncpa [#allocation4], 1 }
 0x9b0   :  { %5365 = vsyncpa [#allocation4 + $0x1], 1 }

</bundles_post_ra>
